<compile_context>
chip_gen: v5e
topology: v5e:2x2
jax: 0.10.0
libtpu: 0.0.40
codegen_flags: <defaults>
</compile_context>

<pallas_src>
import functools

import jax
import jax.numpy as jnp
from jax.experimental import pallas as pl
from jax.experimental.pallas import tpu as pltpu


def _conv3x3x3_stage_kernel(*refs, H, W, add_residual):
    """One conv stage for one (n, d) output plane.

    refs (in order):
      x0, x1, x2 : (1, 1, Cin, P2pad)  padded-flattened input planes d, d+1, d+2
      w          : (27, Cout, Cin)     taps ordered (kz, ky, kx)
      b          : (Cout, 1)
      [res]      : (1, 1, Cout, P2pad) padded-flattened residual plane (d+1)
      o          : (1, 1, Cout, HX)    HX = H*(W+2), lane-dense output
    """
    if add_residual:
        x0, x1, x2, w_ref, b_ref, res_ref, o_ref = refs
    else:
        x0, x1, x2, w_ref, b_ref, o_ref = refs
        res_ref = None

    Wp = W + 2
    HX = H * Wp
    cout = o_ref.shape[2]

    acc = jnp.zeros((cout, HX), dtype=jnp.float32)
    planes = (x0, x1, x2)
    for kz in range(3):
        plane = planes[kz][0, 0]                      # (Cin, P2pad)
        for ky in range(3):
            for kx in range(3):
                t = (kz * 3 + ky) * 3 + kx
                off = ky * Wp + kx                    # static lane offset
                patch = plane[:, off:off + HX]        # (Cin, HX)
                acc = acc + jnp.dot(w_ref[t], patch,
                                    preferred_element_type=jnp.float32)
    acc = acc + b_ref[...]                            # (Cout, 1) over lanes
    if add_residual:
        acc = acc + res_ref[0, 0][:, Wp + 1:Wp + 1 + HX]
    o_ref[0, 0] = jnp.maximum(acc, 0.0).astype(o_ref.dtype)


def _conv3x3x3_stage(xf, w, b, xf_res, *, N, D, H, W):
    """xf: (N, D+2, Cin, P2pad) padded-flattened activations (f32).
       w: (Cout, Cin, 3, 3, 3); b: (Cout,).
       xf_res: same layout as xf (Cout channels) for the fused residual, or None.
       Returns (N, D, Cout, H*(W+2)) f32 with ReLU already applied."""
    Cout, Cin = w.shape[0], w.shape[1]
    Wp = W + 2
    HX = H * Wp
    P2pad = xf.shape[-1]

    # Taps reordered to (kz, ky, kx, O, I) -> (27, Cout, Cin).
    wk = jnp.transpose(w, (2, 3, 4, 0, 1)).reshape(27, Cout, Cin)
    b2 = b.reshape(Cout, 1)

    add_residual = xf_res is not None
    in_specs = [
        pl.BlockSpec((1, 1, Cin, P2pad), lambda n, d: (n, d, 0, 0)),
        pl.BlockSpec((1, 1, Cin, P2pad), lambda n, d: (n, d + 1, 0, 0)),
        pl.BlockSpec((1, 1, Cin, P2pad), lambda n, d: (n, d + 2, 0, 0)),
        pl.BlockSpec((27, Cout, Cin), lambda n, d: (0, 0, 0)),
        pl.BlockSpec((Cout, 1), lambda n, d: (0, 0)),
    ]
    args = [xf, xf, xf, wk, b2]
    if add_residual:
        in_specs.append(
            pl.BlockSpec((1, 1, Cout, P2pad), lambda n, d: (n, d + 1, 0, 0)))
        args.append(xf_res)

    kernel = functools.partial(_conv3x3x3_stage_kernel, H=H, W=W,
                               add_residual=add_residual)
    return pl.pallas_call(
        kernel,
        out_shape=jax.ShapeDtypeStruct((N, D, Cout, HX), jnp.float32),
        grid=(N, D),
        in_specs=in_specs,
        out_specs=pl.BlockSpec((1, 1, Cout, HX), lambda n, d: (n, d, 0, 0)),
        compiler_params=pltpu.CompilerParams(
            dimension_semantics=("parallel", "parallel")),
    )(*args)


def residual_conv_block(x, weights, biases):
    """ResidualConvBlock forward (normalization='none').

    x: (N, C, D, H, W) f32; weights[i]: (C, C, 3, 3, 3); biases[i]: (C,).
    Returns (N, C, D, H, W) f32: relu(conv_stack(x) + x).
    """
    N, C0, D, H, W = x.shape
    n_stages = len(weights)
    Cf = weights[0].shape[0]
    assert C0 == Cf, "residual add requires n_filters_in == n_filters_out"
    Wp = W + 2

    def pad_flat(a):
        # a: (N, D, C, H, W) -> zero pad D/H/W for the 'same' 3x3x3 conv (the
        # extra bottom H row gives slack for the shifted flat windows), then
        # flatten (H, W) into the lane dim: (N, D+2, C, (H+3)*(W+2)).
        ap = jnp.pad(a, ((0, 0), (1, 1), (0, 0), (1, 2), (1, 1)))
        n_, dp, c, hp, wp = ap.shape
        return ap.reshape(n_, dp, c, hp * wp)

    x_dc = jnp.transpose(x, (0, 2, 1, 3, 4))    # (N, D, C, H, W): one swap in
    xf0 = pad_flat(x_dc)                        # stage-0 input and residual source
    cur = x_dc
    for i in range(n_stages):
        last = i == n_stages - 1
        cur_f = xf0 if i == 0 else pad_flat(cur)
        out_flat = _conv3x3x3_stage(cur_f, weights[i], biases[i],
                                    xf0 if last else None, N=N, D=D, H=H, W=W)
        # drop the two slack columns per row:
        # (N, D, Cf, H*(W+2)) -> (N, D, Cf, H, W)
        cur = out_flat.reshape(N, D, Cf, H, Wp)[:, :, :, :, :W]
    return jnp.transpose(cur, (0, 2, 1, 3, 4))  # back to NCDHW once


def _reference(x, weights, biases):
    out = x
    n = len(weights)
    for i, (w, b) in enumerate(zip(weights, biases)):
        out = jax.lax.conv_general_dilated(
            out, w, window_strides=(1, 1, 1),
            padding=((1, 1), (1, 1), (1, 1)),
            dimension_numbers=("NCDHW", "OIDHW", "NCDHW"))
        out = out + b.reshape(1, -1, 1, 1, 1)
        if i != n - 1:
            out = jnp.maximum(out, 0.0)
    out = out + x
    return jnp.maximum(out, 0.0)


if __name__ == "__main__":
    key = jax.random.PRNGKey(0)
    n_stages, N, C, D, H, W = 2, 2, 16, 16, 16, 16

    keys = jax.random.split(key, 1 + 2 * n_stages)

    # Round data/params to bf16-representable f32 so the MXU's bf16 input passes
    # are exact and the kernel matches the XLA conv reference tightly.
    def _bf16_exact(a):
        return a.astype(jnp.bfloat16).astype(jnp.float32)

    x = _bf16_exact(jax.random.normal(keys[0], (N, C, D, H, W),
                                      dtype=jnp.float32))

    fan_in = C * 3 * 3 * 3
    bound = 1.0 / (fan_in ** 0.5)
    weights, biases = [], []
    for i in range(n_stages):
        w = jax.random.uniform(keys[1 + 2 * i], (C, C, 3, 3, 3),
                               dtype=jnp.float32, minval=-bound, maxval=bound)
        b = jax.random.uniform(keys[2 + 2 * i], (C,),
                               dtype=jnp.float32, minval=-bound, maxval=bound)
        weights.append(_bf16_exact(w))
        biases.append(_bf16_exact(b))

    run = jax.jit(residual_conv_block)
    out = jax.block_until_ready(run(x, weights, biases))

    ref = _reference(x, weights, biases)
    assert out.shape == (N, C, D, H, W)
    max_err = float(jnp.max(jnp.abs(out - ref)))
    assert jnp.allclose(out, ref, atol=1e-2, rtol=1e-2), f"max abs err {max_err}"
    print("KERNEL_OK")
</pallas_src>

<mosaic_0001>
module attributes {stable_mosaic.version = 11 : i64} {
  func.func @_conv3x3x3_stage_kernel(%arg0: i32, %arg1: i32, %arg2: memref<1x1x16x342xf32, #tpu.memory_space<vmem>>, %arg3: memref<1x1x16x342xf32, #tpu.memory_space<vmem>>, %arg4: memref<1x1x16x342xf32, #tpu.memory_space<vmem>>, %arg5: memref<27x16x16xf32, #tpu.memory_space<vmem>>, %arg6: memref<16x1xf32, #tpu.memory_space<vmem>>, %arg7: memref<1x1x16x288xf32, #tpu.memory_space<vmem>>) attributes {dimension_semantics = [#tpu.dimension_semantics<parallel>, #tpu.dimension_semantics<parallel>], iteration_bounds = array<i64: 2, 16>, scalar_prefetch = 0 : i64, scratch_operands = 0 : i64, tpu.core_type = #tpu.core_type<tc>, window_params = [{transform_indices = @transform_0, window_bounds = array<i64: 1, 1, 16, 342>}, {transform_indices = @transform_1, window_bounds = array<i64: 1, 1, 16, 342>}, {transform_indices = @transform_2, window_bounds = array<i64: 1, 1, 16, 342>}, {pipeline_mode = #tpu.pipeline_mode<synchronous>, transform_indices = @transform_3, window_bounds = array<i64: 27, 16, 16>}, {pipeline_mode = #tpu.pipeline_mode<synchronous>, transform_indices = @transform_4, window_bounds = array<i64: 16, 1>}, {transform_indices = @transform_5, window_bounds = array<i64: 1, 1, 16, 288>}]} {
    %cst = arith.constant 0.000000e+00 : f32
    %0 = vector.broadcast %cst : f32 to vector<16x288xf32>
    %c0 = arith.constant 0 : index
    %c0_0 = arith.constant 0 : index
    %c0_1 = arith.constant 0 : index
    %c0_2 = arith.constant 0 : index
    %1 = vector.load %arg2[%c0, %c0_0, %c0_1, %c0_2] : memref<1x1x16x342xf32, #tpu.memory_space<vmem>>, vector<1x1x16x342xf32>
    %2 = vector.shape_cast %1 : vector<1x1x16x342xf32> to vector<16x342xf32>
    %3 = vector.extract_strided_slice %2 {offsets = [0, 0], sizes = [16, 288], strides = [1, 1]} : vector<16x342xf32> to vector<16x288xf32>
    %c0_3 = arith.constant 0 : index
    %c0_4 = arith.constant 0 : index
    %c0_5 = arith.constant 0 : index
    %4 = vector.load %arg5[%c0_3, %c0_4, %c0_5] : memref<27x16x16xf32, #tpu.memory_space<vmem>>, vector<1x16x16xf32>
    %5 = vector.shape_cast %4 : vector<1x16x16xf32> to vector<16x16xf32>
    %cst_6 = arith.constant dense<0.000000e+00> : vector<16x288xf32>
    %6 = tpu.matmul %5, %3, %cst_6 {dimension_numbers = #tpu.dot_dimension_numbers<[1], [0], [0], [1], [0, 0, 1, 1], [], []>} : vector<16x16xf32>, vector<16x288xf32>, vector<16x288xf32> -> vector<16x288xf32>
    %7 = arith.addf %0, %6 : vector<16x288xf32>
    %8 = vector.extract_strided_slice %2 {offsets = [0, 1], sizes = [16, 288], strides = [1, 1]} : vector<16x342xf32> to vector<16x288xf32>
    %c1 = arith.constant 1 : index
    %c0_7 = arith.constant 0 : index
    %c0_8 = arith.constant 0 : index
    %9 = vector.load %arg5[%c1, %c0_7, %c0_8] : memref<27x16x16xf32, #tpu.memory_space<vmem>>, vector<1x16x16xf32>
    %10 = vector.shape_cast %9 : vector<1x16x16xf32> to vector<16x16xf32>
    %cst_9 = arith.constant dense<0.000000e+00> : vector<16x288xf32>
    %11 = tpu.matmul %10, %8, %cst_9 {dimension_numbers = #tpu.dot_dimension_numbers<[1], [0], [0], [1], [0, 0, 1, 1], [], []>} : vector<16x16xf32>, vector<16x288xf32>, vector<16x288xf32> -> vector<16x288xf32>
    %12 = arith.addf %7, %11 : vector<16x288xf32>
    %13 = vector.extract_strided_slice %2 {offsets = [0, 2], sizes = [16, 288], strides = [1, 1]} : vector<16x342xf32> to vector<16x288xf32>
    %c2 = arith.constant 2 : index
    %c0_10 = arith.constant 0 : index
    %c0_11 = arith.constant 0 : index
    %14 = vector.load %arg5[%c2, %c0_10, %c0_11] : memref<27x16x16xf32, #tpu.memory_space<vmem>>, vector<1x16x16xf32>
    %15 = vector.shape_cast %14 : vector<1x16x16xf32> to vector<16x16xf32>
    %cst_12 = arith.constant dense<0.000000e+00> : vector<16x288xf32>
    %16 = tpu.matmul %15, %13, %cst_12 {dimension_numbers = #tpu.dot_dimension_numbers<[1], [0], [0], [1], [0, 0, 1, 1], [], []>} : vector<16x16xf32>, vector<16x288xf32>, vector<16x288xf32> -> vector<16x288xf32>
    %17 = arith.addf %12, %16 : vector<16x288xf32>
    %18 = vector.extract_strided_slice %2 {offsets = [0, 18], sizes = [16, 288], strides = [1, 1]} : vector<16x342xf32> to vector<16x288xf32>
    %c3 = arith.constant 3 : index
    %c0_13 = arith.constant 0 : index
    %c0_14 = arith.constant 0 : index
    %19 = vector.load %arg5[%c3, %c0_13, %c0_14] : memref<27x16x16xf32, #tpu.memory_space<vmem>>, vector<1x16x16xf32>
    %20 = vector.shape_cast %19 : vector<1x16x16xf32> to vector<16x16xf32>
    %cst_15 = arith.constant dense<0.000000e+00> : vector<16x288xf32>
    %21 = tpu.matmul %20, %18, %cst_15 {dimension_numbers = #tpu.dot_dimension_numbers<[1], [0], [0], [1], [0, 0, 1, 1], [], []>} : vector<16x16xf32>, vector<16x288xf32>, vector<16x288xf32> -> vector<16x288xf32>
    %22 = arith.addf %17, %21 : vector<16x288xf32>
    %23 = vector.extract_strided_slice %2 {offsets = [0, 19], sizes = [16, 288], strides = [1, 1]} : vector<16x342xf32> to vector<16x288xf32>
    %c4 = arith.constant 4 : index
    %c0_16 = arith.constant 0 : index
    %c0_17 = arith.constant 0 : index
    %24 = vector.load %arg5[%c4, %c0_16, %c0_17] : memref<27x16x16xf32, #tpu.memory_space<vmem>>, vector<1x16x16xf32>
    %25 = vector.shape_cast %24 : vector<1x16x16xf32> to vector<16x16xf32>
    %cst_18 = arith.constant dense<0.000000e+00> : vector<16x288xf32>
    %26 = tpu.matmul %25, %23, %cst_18 {dimension_numbers = #tpu.dot_dimension_numbers<[1], [0], [0], [1], [0, 0, 1, 1], [], []>} : vector<16x16xf32>, vector<16x288xf32>, vector<16x288xf32> -> vector<16x288xf32>
    %27 = arith.addf %22, %26 : vector<16x288xf32>
    %28 = vector.extract_strided_slice %2 {offsets = [0, 20], sizes = [16, 288], strides = [1, 1]} : vector<16x342xf32> to vector<16x288xf32>
    %c5 = arith.constant 5 : index
    %c0_19 = arith.constant 0 : index
    %c0_20 = arith.constant 0 : index
    %29 = vector.load %arg5[%c5, %c0_19, %c0_20] : memref<27x16x16xf32, #tpu.memory_space<vmem>>, vector<1x16x16xf32>
    %30 = vector.shape_cast %29 : vector<1x16x16xf32> to vector<16x16xf32>
    %cst_21 = arith.constant dense<0.000000e+00> : vector<16x288xf32>
    %31 = tpu.matmul %30, %28, %cst_21 {dimension_numbers = #tpu.dot_dimension_numbers<[1], [0], [0], [1], [0, 0, 1, 1], [], []>} : vector<16x16xf32>, vector<16x288xf32>, vector<16x288xf32> -> vector<16x288xf32>
    %32 = arith.addf %27, %31 : vector<16x288xf32>
    %33 = vector.extract_strided_slice %2 {offsets = [0, 36], sizes = [16, 288], strides = [1, 1]} : vector<16x342xf32> to vector<16x288xf32>
    %c6 = arith.constant 6 : index
    %c0_22 = arith.constant 0 : index
    %c0_23 = arith.constant 0 : index
    %34 = vector.load %arg5[%c6, %c0_22, %c0_23] : memref<27x16x16xf32, #tpu.memory_space<vmem>>, vector<1x16x16xf32>
    %35 = vector.shape_cast %34 : vector<1x16x16xf32> to vector<16x16xf32>
    %cst_24 = arith.constant dense<0.000000e+00> : vector<16x288xf32>
    %36 = tpu.matmul %35, %33, %cst_24 {dimension_numbers = #tpu.dot_dimension_numbers<[1], [0], [0], [1], [0, 0, 1, 1], [], []>} : vector<16x16xf32>, vector<16x288xf32>, vector<16x288xf32> -> vector<16x288xf32>
    %37 = arith.addf %32, %36 : vector<16x288xf32>
    %38 = vector.extract_strided_slice %2 {offsets = [0, 37], sizes = [16, 288], strides = [1, 1]} : vector<16x342xf32> to vector<16x288xf32>
    %c7 = arith.constant 7 : index
    %c0_25 = arith.constant 0 : index
    %c0_26 = arith.constant 0 : index
    %39 = vector.load %arg5[%c7, %c0_25, %c0_26] : memref<27x16x16xf32, #tpu.memory_space<vmem>>, vector<1x16x16xf32>
    %40 = vector.shape_cast %39 : vector<1x16x16xf32> to vector<16x16xf32>
    %cst_27 = arith.constant dense<0.000000e+00> : vector<16x288xf32>
    %41 = tpu.matmul %40, %38, %cst_27 {dimension_numbers = #tpu.dot_dimension_numbers<[1], [0], [0], [1], [0, 0, 1, 1], [], []>} : vector<16x16xf32>, vector<16x288xf32>, vector<16x288xf32> -> vector<16x288xf32>
    %42 = arith.addf %37, %41 : vector<16x288xf32>
    %43 = vector.extract_strided_slice %2 {offsets = [0, 38], sizes = [16, 288], strides = [1, 1]} : vector<16x342xf32> to vector<16x288xf32>
    %c8 = arith.constant 8 : index
    %c0_28 = arith.constant 0 : index
    %c0_29 = arith.constant 0 : index
    %44 = vector.load %arg5[%c8, %c0_28, %c0_29] : memref<27x16x16xf32, #tpu.memory_space<vmem>>, vector<1x16x16xf32>
    %45 = vector.shape_cast %44 : vector<1x16x16xf32> to vector<16x16xf32>
    %cst_30 = arith.constant dense<0.000000e+00> : vector<16x288xf32>
    %46 = tpu.matmul %45, %43, %cst_30 {dimension_numbers = #tpu.dot_dimension_numbers<[1], [0], [0], [1], [0, 0, 1, 1], [], []>} : vector<16x16xf32>, vector<16x288xf32>, vector<16x288xf32> -> vector<16x288xf32>
    %47 = arith.addf %42, %46 : vector<16x288xf32>
    %c0_31 = arith.constant 0 : index
    %c0_32 = arith.constant 0 : index
    %c0_33 = arith.constant 0 : index
    %c0_34 = arith.constant 0 : index
    %48 = vector.load %arg3[%c0_31, %c0_32, %c0_33, %c0_34] : memref<1x1x16x342xf32, #tpu.memory_space<vmem>>, vector<1x1x16x342xf32>
    %49 = vector.shape_cast %48 : vector<1x1x16x342xf32> to vector<16x342xf32>
    %50 = vector.extract_strided_slice %49 {offsets = [0, 0], sizes = [16, 288], strides = [1, 1]} : vector<16x342xf32> to vector<16x288xf32>
    %c9 = arith.constant 9 : index
    %c0_35 = arith.constant 0 : index
    %c0_36 = arith.constant 0 : index
    %51 = vector.load %arg5[%c9, %c0_35, %c0_36] : memref<27x16x16xf32, #tpu.memory_space<vmem>>, vector<1x16x16xf32>
    %52 = vector.shape_cast %51 : vector<1x16x16xf32> to vector<16x16xf32>
    %cst_37 = arith.constant dense<0.000000e+00> : vector<16x288xf32>
    %53 = tpu.matmul %52, %50, %cst_37 {dimension_numbers = #tpu.dot_dimension_numbers<[1], [0], [0], [1], [0, 0, 1, 1], [], []>} : vector<16x16xf32>, vector<16x288xf32>, vector<16x288xf32> -> vector<16x288xf32>
    %54 = arith.addf %47, %53 : vector<16x288xf32>
    %55 = vector.extract_strided_slice %49 {offsets = [0, 1], sizes = [16, 288], strides = [1, 1]} : vector<16x342xf32> to vector<16x288xf32>
    %c10 = arith.constant 10 : index
    %c0_38 = arith.constant 0 : index
    %c0_39 = arith.constant 0 : index
    %56 = vector.load %arg5[%c10, %c0_38, %c0_39] : memref<27x16x16xf32, #tpu.memory_space<vmem>>, vector<1x16x16xf32>
    %57 = vector.shape_cast %56 : vector<1x16x16xf32> to vector<16x16xf32>
    %cst_40 = arith.constant dense<0.000000e+00> : vector<16x288xf32>
    %58 = tpu.matmul %57, %55, %cst_40 {dimension_numbers = #tpu.dot_dimension_numbers<[1], [0], [0], [1], [0, 0, 1, 1], [], []>} : vector<16x16xf32>, vector<16x288xf32>, vector<16x288xf32> -> vector<16x288xf32>
    %59 = arith.addf %54, %58 : vector<16x288xf32>
    %60 = vector.extract_strided_slice %49 {offsets = [0, 2], sizes = [16, 288], strides = [1, 1]} : vector<16x342xf32> to vector<16x288xf32>
    %c11 = arith.constant 11 : index
    %c0_41 = arith.constant 0 : index
    %c0_42 = arith.constant 0 : index
    %61 = vector.load %arg5[%c11, %c0_41, %c0_42] : memref<27x16x16xf32, #tpu.memory_space<vmem>>, vector<1x16x16xf32>
    %62 = vector.shape_cast %61 : vector<1x16x16xf32> to vector<16x16xf32>
    %cst_43 = arith.constant dense<0.000000e+00> : vector<16x288xf32>
    %63 = tpu.matmul %62, %60, %cst_43 {dimension_numbers = #tpu.dot_dimension_numbers<[1], [0], [0], [1], [0, 0, 1, 1], [], []>} : vector<16x16xf32>, vector<16x288xf32>, vector<16x288xf32> -> vector<16x288xf32>
    %64 = arith.addf %59, %63 : vector<16x288xf32>
    %65 = vector.extract_strided_slice %49 {offsets = [0, 18], sizes = [16, 288], strides = [1, 1]} : vector<16x342xf32> to vector<16x288xf32>
    %c12 = arith.constant 12 : index
    %c0_44 = arith.constant 0 : index
    %c0_45 = arith.constant 0 : index
    %66 = vector.load %arg5[%c12, %c0_44, %c0_45] : memref<27x16x16xf32, #tpu.memory_space<vmem>>, vector<1x16x16xf32>
    %67 = vector.shape_cast %66 : vector<1x16x16xf32> to vector<16x16xf32>
    %cst_46 = arith.constant dense<0.000000e+00> : vector<16x288xf32>
    %68 = tpu.matmul %67, %65, %cst_46 {dimension_numbers = #tpu.dot_dimension_numbers<[1], [0], [0], [1], [0, 0, 1, 1], [], []>} : vector<16x16xf32>, vector<16x288xf32>, vector<16x288xf32> -> vector<16x288xf32>
    %69 = arith.addf %64, %68 : vector<16x288xf32>
    %70 = vector.extract_strided_slice %49 {offsets = [0, 19], sizes = [16, 288], strides = [1, 1]} : vector<16x342xf32> to vector<16x288xf32>
    %c13 = arith.constant 13 : index
    %c0_47 = arith.constant 0 : index
    %c0_48 = arith.constant 0 : index
    %71 = vector.load %arg5[%c13, %c0_47, %c0_48] : memref<27x16x16xf32, #tpu.memory_space<vmem>>, vector<1x16x16xf32>
    %72 = vector.shape_cast %71 : vector<1x16x16xf32> to vector<16x16xf32>
    %cst_49 = arith.constant dense<0.000000e+00> : vector<16x288xf32>
    %73 = tpu.matmul %72, %70, %cst_49 {dimension_numbers = #tpu.dot_dimension_numbers<[1], [0], [0], [1], [0, 0, 1, 1], [], []>} : vector<16x16xf32>, vector<16x288xf32>, vector<16x288xf32> -> vector<16x288xf32>
    %74 = arith.addf %69, %73 : vector<16x288xf32>
    %75 = vector.extract_strided_slice %49 {offsets = [0, 20], sizes = [16, 288], strides = [1, 1]} : vector<16x342xf32> to vector<16x288xf32>
    %c14 = arith.constant 14 : index
    %c0_50 = arith.constant 0 : index
    %c0_51 = arith.constant 0 : index
    %76 = vector.load %arg5[%c14, %c0_50, %c0_51] : memref<27x16x16xf32, #tpu.memory_space<vmem>>, vector<1x16x16xf32>
    %77 = vector.shape_cast %76 : vector<1x16x16xf32> to vector<16x16xf32>
    %cst_52 = arith.constant dense<0.000000e+00> : vector<16x288xf32>
    %78 = tpu.matmul %77, %75, %cst_52 {dimension_numbers = #tpu.dot_dimension_numbers<[1], [0], [0], [1], [0, 0, 1, 1], [], []>} : vector<16x16xf32>, vector<16x288xf32>, vector<16x288xf32> -> vector<16x288xf32>
    %79 = arith.addf %74, %78 : vector<16x288xf32>
    %80 = vector.extract_strided_slice %49 {offsets = [0, 36], sizes = [16, 288], strides = [1, 1]} : vector<16x342xf32> to vector<16x288xf32>
    %c15 = arith.constant 15 : index
    %c0_53 = arith.constant 0 : index
    %c0_54 = arith.constant 0 : index
    %81 = vector.load %arg5[%c15, %c0_53, %c0_54] : memref<27x16x16xf32, #tpu.memory_space<vmem>>, vector<1x16x16xf32>
    %82 = vector.shape_cast %81 : vector<1x16x16xf32> to vector<16x16xf32>
    %cst_55 = arith.constant dense<0.000000e+00> : vector<16x288xf32>
    %83 = tpu.matmul %82, %80, %cst_55 {dimension_numbers = #tpu.dot_dimension_numbers<[1], [0], [0], [1], [0, 0, 1, 1], [], []>} : vector<16x16xf32>, vector<16x288xf32>, vector<16x288xf32> -> vector<16x288xf32>
    %84 = arith.addf %79, %83 : vector<16x288xf32>
    %85 = vector.extract_strided_slice %49 {offsets = [0, 37], sizes = [16, 288], strides = [1, 1]} : vector<16x342xf32> to vector<16x288xf32>
    %c16 = arith.constant 16 : index
    %c0_56 = arith.constant 0 : index
    %c0_57 = arith.constant 0 : index
    %86 = vector.load %arg5[%c16, %c0_56, %c0_57] : memref<27x16x16xf32, #tpu.memory_space<vmem>>, vector<1x16x16xf32>
    %87 = vector.shape_cast %86 : vector<1x16x16xf32> to vector<16x16xf32>
    %cst_58 = arith.constant dense<0.000000e+00> : vector<16x288xf32>
    %88 = tpu.matmul %87, %85, %cst_58 {dimension_numbers = #tpu.dot_dimension_numbers<[1], [0], [0], [1], [0, 0, 1, 1], [], []>} : vector<16x16xf32>, vector<16x288xf32>, vector<16x288xf32> -> vector<16x288xf32>
    %89 = arith.addf %84, %88 : vector<16x288xf32>
    %90 = vector.extract_strided_slice %49 {offsets = [0, 38], sizes = [16, 288], strides = [1, 1]} : vector<16x342xf32> to vector<16x288xf32>
    %c17 = arith.constant 17 : index
    %c0_59 = arith.constant 0 : index
    %c0_60 = arith.constant 0 : index
    %91 = vector.load %arg5[%c17, %c0_59, %c0_60] : memref<27x16x16xf32, #tpu.memory_space<vmem>>, vector<1x16x16xf32>
    %92 = vector.shape_cast %91 : vector<1x16x16xf32> to vector<16x16xf32>
    %cst_61 = arith.constant dense<0.000000e+00> : vector<16x288xf32>
    %93 = tpu.matmul %92, %90, %cst_61 {dimension_numbers = #tpu.dot_dimension_numbers<[1], [0], [0], [1], [0, 0, 1, 1], [], []>} : vector<16x16xf32>, vector<16x288xf32>, vector<16x288xf32> -> vector<16x288xf32>
    %94 = arith.addf %89, %93 : vector<16x288xf32>
    %c0_62 = arith.constant 0 : index
    %c0_63 = arith.constant 0 : index
    %c0_64 = arith.constant 0 : index
    %c0_65 = arith.constant 0 : index
    %95 = vector.load %arg4[%c0_62, %c0_63, %c0_64, %c0_65] : memref<1x1x16x342xf32, #tpu.memory_space<vmem>>, vector<1x1x16x342xf32>
    %96 = vector.shape_cast %95 : vector<1x1x16x342xf32> to vector<16x342xf32>
    %97 = vector.extract_strided_slice %96 {offsets = [0, 0], sizes = [16, 288], strides = [1, 1]} : vector<16x342xf32> to vector<16x288xf32>
    %c18 = arith.constant 18 : index
    %c0_66 = arith.constant 0 : index
    %c0_67 = arith.constant 0 : index
    %98 = vector.load %arg5[%c18, %c0_66, %c0_67] : memref<27x16x16xf32, #tpu.memory_space<vmem>>, vector<1x16x16xf32>
    %99 = vector.shape_cast %98 : vector<1x16x16xf32> to vector<16x16xf32>
    %cst_68 = arith.constant dense<0.000000e+00> : vector<16x288xf32>
    %100 = tpu.matmul %99, %97, %cst_68 {dimension_numbers = #tpu.dot_dimension_numbers<[1], [0], [0], [1], [0, 0, 1, 1], [], []>} : vector<16x16xf32>, vector<16x288xf32>, vector<16x288xf32> -> vector<16x288xf32>
    %101 = arith.addf %94, %100 : vector<16x288xf32>
    %102 = vector.extract_strided_slice %96 {offsets = [0, 1], sizes = [16, 288], strides = [1, 1]} : vector<16x342xf32> to vector<16x288xf32>
    %c19 = arith.constant 19 : index
    %c0_69 = arith.constant 0 : index
    %c0_70 = arith.constant 0 : index
    %103 = vector.load %arg5[%c19, %c0_69, %c0_70] : memref<27x16x16xf32, #tpu.memory_space<vmem>>, vector<1x16x16xf32>
    %104 = vector.shape_cast %103 : vector<1x16x16xf32> to vector<16x16xf32>
    %cst_71 = arith.constant dense<0.000000e+00> : vector<16x288xf32>
    %105 = tpu.matmul %104, %102, %cst_71 {dimension_numbers = #tpu.dot_dimension_numbers<[1], [0], [0], [1], [0, 0, 1, 1], [], []>} : vector<16x16xf32>, vector<16x288xf32>, vector<16x288xf32> -> vector<16x288xf32>
    %106 = arith.addf %101, %105 : vector<16x288xf32>
    %107 = vector.extract_strided_slice %96 {offsets = [0, 2], sizes = [16, 288], strides = [1, 1]} : vector<16x342xf32> to vector<16x288xf32>
    %c20 = arith.constant 20 : index
    %c0_72 = arith.constant 0 : index
    %c0_73 = arith.constant 0 : index
    %108 = vector.load %arg5[%c20, %c0_72, %c0_73] : memref<27x16x16xf32, #tpu.memory_space<vmem>>, vector<1x16x16xf32>
    %109 = vector.shape_cast %108 : vector<1x16x16xf32> to vector<16x16xf32>
    %cst_74 = arith.constant dense<0.000000e+00> : vector<16x288xf32>
    %110 = tpu.matmul %109, %107, %cst_74 {dimension_numbers = #tpu.dot_dimension_numbers<[1], [0], [0], [1], [0, 0, 1, 1], [], []>} : vector<16x16xf32>, vector<16x288xf32>, vector<16x288xf32> -> vector<16x288xf32>
    %111 = arith.addf %106, %110 : vector<16x288xf32>
    %112 = vector.extract_strided_slice %96 {offsets = [0, 18], sizes = [16, 288], strides = [1, 1]} : vector<16x342xf32> to vector<16x288xf32>
    %c21 = arith.constant 21 : index
    %c0_75 = arith.constant 0 : index
    %c0_76 = arith.constant 0 : index
    %113 = vector.load %arg5[%c21, %c0_75, %c0_76] : memref<27x16x16xf32, #tpu.memory_space<vmem>>, vector<1x16x16xf32>
    %114 = vector.shape_cast %113 : vector<1x16x16xf32> to vector<16x16xf32>
    %cst_77 = arith.constant dense<0.000000e+00> : vector<16x288xf32>
    %115 = tpu.matmul %114, %112, %cst_77 {dimension_numbers = #tpu.dot_dimension_numbers<[1], [0], [0], [1], [0, 0, 1, 1], [], []>} : vector<16x16xf32>, vector<16x288xf32>, vector<16x288xf32> -> vector<16x288xf32>
    %116 = arith.addf %111, %115 : vector<16x288xf32>
    %117 = vector.extract_strided_slice %96 {offsets = [0, 19], sizes = [16, 288], strides = [1, 1]} : vector<16x342xf32> to vector<16x288xf32>
    %c22 = arith.constant 22 : index
    %c0_78 = arith.constant 0 : index
    %c0_79 = arith.constant 0 : index
    %118 = vector.load %arg5[%c22, %c0_78, %c0_79] : memref<27x16x16xf32, #tpu.memory_space<vmem>>, vector<1x16x16xf32>
    %119 = vector.shape_cast %118 : vector<1x16x16xf32> to vector<16x16xf32>
    %cst_80 = arith.constant dense<0.000000e+00> : vector<16x288xf32>
    %120 = tpu.matmul %119, %117, %cst_80 {dimension_numbers = #tpu.dot_dimension_numbers<[1], [0], [0], [1], [0, 0, 1, 1], [], []>} : vector<16x16xf32>, vector<16x288xf32>, vector<16x288xf32> -> vector<16x288xf32>
    %121 = arith.addf %116, %120 : vector<16x288xf32>
    %122 = vector.extract_strided_slice %96 {offsets = [0, 20], sizes = [16, 288], strides = [1, 1]} : vector<16x342xf32> to vector<16x288xf32>
    %c23 = arith.constant 23 : index
    %c0_81 = arith.constant 0 : index
    %c0_82 = arith.constant 0 : index
    %123 = vector.load %arg5[%c23, %c0_81, %c0_82] : memref<27x16x16xf32, #tpu.memory_space<vmem>>, vector<1x16x16xf32>
    %124 = vector.shape_cast %123 : vector<1x16x16xf32> to vector<16x16xf32>
    %cst_83 = arith.constant dense<0.000000e+00> : vector<16x288xf32>
    %125 = tpu.matmul %124, %122, %cst_83 {dimension_numbers = #tpu.dot_dimension_numbers<[1], [0], [0], [1], [0, 0, 1, 1], [], []>} : vector<16x16xf32>, vector<16x288xf32>, vector<16x288xf32> -> vector<16x288xf32>
    %126 = arith.addf %121, %125 : vector<16x288xf32>
    %127 = vector.extract_strided_slice %96 {offsets = [0, 36], sizes = [16, 288], strides = [1, 1]} : vector<16x342xf32> to vector<16x288xf32>
    %c24 = arith.constant 24 : index
    %c0_84 = arith.constant 0 : index
    %c0_85 = arith.constant 0 : index
    %128 = vector.load %arg5[%c24, %c0_84, %c0_85] : memref<27x16x16xf32, #tpu.memory_space<vmem>>, vector<1x16x16xf32>
    %129 = vector.shape_cast %128 : vector<1x16x16xf32> to vector<16x16xf32>
    %cst_86 = arith.constant dense<0.000000e+00> : vector<16x288xf32>
    %130 = tpu.matmul %129, %127, %cst_86 {dimension_numbers = #tpu.dot_dimension_numbers<[1], [0], [0], [1], [0, 0, 1, 1], [], []>} : vector<16x16xf32>, vector<16x288xf32>, vector<16x288xf32> -> vector<16x288xf32>
    %131 = arith.addf %126, %130 : vector<16x288xf32>
    %132 = vector.extract_strided_slice %96 {offsets = [0, 37], sizes = [16, 288], strides = [1, 1]} : vector<16x342xf32> to vector<16x288xf32>
    %c25 = arith.constant 25 : index
    %c0_87 = arith.constant 0 : index
    %c0_88 = arith.constant 0 : index
    %133 = vector.load %arg5[%c25, %c0_87, %c0_88] : memref<27x16x16xf32, #tpu.memory_space<vmem>>, vector<1x16x16xf32>
    %134 = vector.shape_cast %133 : vector<1x16x16xf32> to vector<16x16xf32>
    %cst_89 = arith.constant dense<0.000000e+00> : vector<16x288xf32>
    %135 = tpu.matmul %134, %132, %cst_89 {dimension_numbers = #tpu.dot_dimension_numbers<[1], [0], [0], [1], [0, 0, 1, 1], [], []>} : vector<16x16xf32>, vector<16x288xf32>, vector<16x288xf32> -> vector<16x288xf32>
    %136 = arith.addf %131, %135 : vector<16x288xf32>
    %137 = vector.extract_strided_slice %96 {offsets = [0, 38], sizes = [16, 288], strides = [1, 1]} : vector<16x342xf32> to vector<16x288xf32>
    %c26 = arith.constant 26 : index
    %c0_90 = arith.constant 0 : index
    %c0_91 = arith.constant 0 : index
    %138 = vector.load %arg5[%c26, %c0_90, %c0_91] : memref<27x16x16xf32, #tpu.memory_space<vmem>>, vector<1x16x16xf32>
    %139 = vector.shape_cast %138 : vector<1x16x16xf32> to vector<16x16xf32>
    %cst_92 = arith.constant dense<0.000000e+00> : vector<16x288xf32>
    %140 = tpu.matmul %139, %137, %cst_92 {dimension_numbers = #tpu.dot_dimension_numbers<[1], [0], [0], [1], [0, 0, 1, 1], [], []>} : vector<16x16xf32>, vector<16x288xf32>, vector<16x288xf32> -> vector<16x288xf32>
    %141 = arith.addf %136, %140 : vector<16x288xf32>
    %c0_93 = arith.constant 0 : index
    %c0_94 = arith.constant 0 : index
    %142 = vector.load %arg6[%c0_93, %c0_94] : memref<16x1xf32, #tpu.memory_space<vmem>>, vector<16x1xf32>
    %143 = vector.broadcast %142 : vector<16x1xf32> to vector<16x288xf32>
    %144 = arith.addf %141, %143 : vector<16x288xf32>
    %cst_95 = arith.constant 0.000000e+00 : f32
    %145 = vector.broadcast %cst_95 : f32 to vector<16x288xf32>
    %146 = arith.maximumf %144, %145 : vector<16x288xf32>
    %c0_96 = arith.constant 0 : index
    %c0_97 = arith.constant 0 : index
    %c0_98 = arith.constant 0 : index
    %c0_99 = arith.constant 0 : index
    %147 = vector.load %arg7[%c0_96, %c0_97, %c0_98, %c0_99] : memref<1x1x16x288xf32, #tpu.memory_space<vmem>>, vector<1x1x16x288xf32>
    %148 = vector.shape_cast %147 : vector<1x1x16x288xf32> to vector<16x288xf32>
    %149 = vector.shape_cast %146 : vector<16x288xf32> to vector<1x1x16x288xf32>
    tpu.vector_store %arg7[%c0_96, %c0_97, %c0_98, %c0_99], %149 {strides = array<i32>} : memref<1x1x16x288xf32, #tpu.memory_space<vmem>>, vector<1x1x16x288xf32>,
    return
  }
  func.func @transform_0(%arg0: i32, %arg1: i32) -> (i32, i32, i32, i32) {
    %c0_i32 = arith.constant 0 : i32
    %c0_i32_0 = arith.constant 0 : i32
    %c0_i32_1 = arith.constant 0 : i32
    return %arg0, %arg1, %c0_i32, %c0_i32_0 : i32, i32, i32, i32
  }
  func.func @transform_1(%arg0: i32, %arg1: i32) -> (i32, i32, i32, i32) {
    %c1_i32 = arith.constant 1 : i32
    %0 = arith.addi %arg1, %c1_i32 : i32
    %c0_i32 = arith.constant 0 : i32
    %c0_i32_0 = arith.constant 0 : i32
    %c0_i32_1 = arith.constant 0 : i32
    return %arg0, %0, %c0_i32, %c0_i32_0 : i32, i32, i32, i32
  }
  func.func @transform_2(%arg0: i32, %arg1: i32) -> (i32, i32, i32, i32) {
    %c2_i32 = arith.constant 2 : i32
    %0 = arith.addi %arg1, %c2_i32 : i32
    %c0_i32 = arith.constant 0 : i32
    %c0_i32_0 = arith.constant 0 : i32
    %c0_i32_1 = arith.constant 0 : i32
    return %arg0, %0, %c0_i32, %c0_i32_0 : i32, i32, i32, i32
  }
  func.func @transform_3(%arg0: i32, %arg1: i32) -> (i32, i32, i32) {
    %c0_i32 = arith.constant 0 : i32
    %c0_i32_0 = arith.constant 0 : i32
    %c0_i32_1 = arith.constant 0 : i32
    %c0_i32_2 = arith.constant 0 : i32
    return %c0_i32, %c0_i32_0, %c0_i32_1 : i32, i32, i32
  }
  func.func @transform_4(%arg0: i32, %arg1: i32) -> (i32, i32) {
    %c0_i32 = arith.constant 0 : i32
    %c0_i32_0 = arith.constant 0 : i32
    %c0_i32_1 = arith.constant 0 : i32
    return %c0_i32, %c0_i32_0 : i32, i32
  }
  func.func @transform_5(%arg0: i32, %arg1: i32) -> (i32, i32, i32, i32) {
    %c0_i32 = arith.constant 0 : i32
    %c0_i32_0 = arith.constant 0 : i32
    %c0_i32_1 = arith.constant 0 : i32
    return %arg0, %arg1, %c0_i32, %c0_i32_0 : i32, i32, i32, i32
  }
}

module attributes {stable_mosaic.version = 11 : i64} {
  func.func @_conv3x3x3_stage_kernel(%arg0: i32, %arg1: i32, %arg2: memref<1x1x16x342xf32, #tpu.memory_space<vmem>>, %arg3: memref<1x1x16x342xf32, #tpu.memory_space<vmem>>, %arg4: memref<1x1x16x342xf32, #tpu.memory_space<vmem>>, %arg5: memref<27x16x16xf32, #tpu.memory_space<vmem>>, %arg6: memref<16x1xf32, #tpu.memory_space<vmem>>, %arg7: memref<1x1x16x342xf32, #tpu.memory_space<vmem>>, %arg8: memref<1x1x16x288xf32, #tpu.memory_space<vmem>>) attributes {dimension_semantics = [#tpu.dimension_semantics<parallel>, #tpu.dimension_semantics<parallel>], iteration_bounds = array<i64: 2, 16>, scalar_prefetch = 0 : i64, scratch_operands = 0 : i64, tpu.core_type = #tpu.core_type<tc>, window_params = [{transform_indices = @transform_0, window_bounds = array<i64: 1, 1, 16, 342>}, {transform_indices = @transform_1, window_bounds = array<i64: 1, 1, 16, 342>}, {transform_indices = @transform_2, window_bounds = array<i64: 1, 1, 16, 342>}, {pipeline_mode = #tpu.pipeline_mode<synchronous>, transform_indices = @transform_3, window_bounds = array<i64: 27, 16, 16>}, {pipeline_mode = #tpu.pipeline_mode<synchronous>, transform_indices = @transform_4, window_bounds = array<i64: 16, 1>}, {transform_indices = @transform_5, window_bounds = array<i64: 1, 1, 16, 342>}, {transform_indices = @transform_6, window_bounds = array<i64: 1, 1, 16, 288>}]} {
    %cst = arith.constant 0.000000e+00 : f32
    %0 = vector.broadcast %cst : f32 to vector<16x288xf32>
    %c0 = arith.constant 0 : index
    %c0_0 = arith.constant 0 : index
    %c0_1 = arith.constant 0 : index
    %c0_2 = arith.constant 0 : index
    %1 = vector.load %arg2[%c0, %c0_0, %c0_1, %c0_2] : memref<1x1x16x342xf32, #tpu.memory_space<vmem>>, vector<1x1x16x342xf32>
    %2 = vector.shape_cast %1 : vector<1x1x16x342xf32> to vector<16x342xf32>
    %3 = vector.extract_strided_slice %2 {offsets = [0, 0], sizes = [16, 288], strides = [1, 1]} : vector<16x342xf32> to vector<16x288xf32>
    %c0_3 = arith.constant 0 : index
    %c0_4 = arith.constant 0 : index
    %c0_5 = arith.constant 0 : index
    %4 = vector.load %arg5[%c0_3, %c0_4, %c0_5] : memref<27x16x16xf32, #tpu.memory_space<vmem>>, vector<1x16x16xf32>
    %5 = vector.shape_cast %4 : vector<1x16x16xf32> to vector<16x16xf32>
    %cst_6 = arith.constant dense<0.000000e+00> : vector<16x288xf32>
    %6 = tpu.matmul %5, %3, %cst_6 {dimension_numbers = #tpu.dot_dimension_numbers<[1], [0], [0], [1], [0, 0, 1, 1], [], []>} : vector<16x16xf32>, vector<16x288xf32>, vector<16x288xf32> -> vector<16x288xf32>
    %7 = arith.addf %0, %6 : vector<16x288xf32>
    %8 = vector.extract_strided_slice %2 {offsets = [0, 1], sizes = [16, 288], strides = [1, 1]} : vector<16x342xf32> to vector<16x288xf32>
    %c1 = arith.constant 1 : index
    %c0_7 = arith.constant 0 : index
    %c0_8 = arith.constant 0 : index
    %9 = vector.load %arg5[%c1, %c0_7, %c0_8] : memref<27x16x16xf32, #tpu.memory_space<vmem>>, vector<1x16x16xf32>
    %10 = vector.shape_cast %9 : vector<1x16x16xf32> to vector<16x16xf32>
    %cst_9 = arith.constant dense<0.000000e+00> : vector<16x288xf32>
    %11 = tpu.matmul %10, %8, %cst_9 {dimension_numbers = #tpu.dot_dimension_numbers<[1], [0], [0], [1], [0, 0, 1, 1], [], []>} : vector<16x16xf32>, vector<16x288xf32>, vector<16x288xf32> -> vector<16x288xf32>
    %12 = arith.addf %7, %11 : vector<16x288xf32>
    %13 = vector.extract_strided_slice %2 {offsets = [0, 2], sizes = [16, 288], strides = [1, 1]} : vector<16x342xf32> to vector<16x288xf32>
    %c2 = arith.constant 2 : index
    %c0_10 = arith.constant 0 : index
    %c0_11 = arith.constant 0 : index
    %14 = vector.load %arg5[%c2, %c0_10, %c0_11] : memref<27x16x16xf32, #tpu.memory_space<vmem>>, vector<1x16x16xf32>
    %15 = vector.shape_cast %14 : vector<1x16x16xf32> to vector<16x16xf32>
    %cst_12 = arith.constant dense<0.000000e+00> : vector<16x288xf32>
    %16 = tpu.matmul %15, %13, %cst_12 {dimension_numbers = #tpu.dot_dimension_numbers<[1], [0], [0], [1], [0, 0, 1, 1], [], []>} : vector<16x16xf32>, vector<16x288xf32>, vector<16x288xf32> -> vector<16x288xf32>
    %17 = arith.addf %12, %16 : vector<16x288xf32>
    %18 = vector.extract_strided_slice %2 {offsets = [0, 18], sizes = [16, 288], strides = [1, 1]} : vector<16x342xf32> to vector<16x288xf32>
    %c3 = arith.constant 3 : index
    %c0_13 = arith.constant 0 : index
    %c0_14 = arith.constant 0 : index
    %19 = vector.load %arg5[%c3, %c0_13, %c0_14] : memref<27x16x16xf32, #tpu.memory_space<vmem>>, vector<1x16x16xf32>
    %20 = vector.shape_cast %19 : vector<1x16x16xf32> to vector<16x16xf32>
    %cst_15 = arith.constant dense<0.000000e+00> : vector<16x288xf32>
    %21 = tpu.matmul %20, %18, %cst_15 {dimension_numbers = #tpu.dot_dimension_numbers<[1], [0], [0], [1], [0, 0, 1, 1], [], []>} : vector<16x16xf32>, vector<16x288xf32>, vector<16x288xf32> -> vector<16x288xf32>
    %22 = arith.addf %17, %21 : vector<16x288xf32>
    %23 = vector.extract_strided_slice %2 {offsets = [0, 19], sizes = [16, 288], strides = [1, 1]} : vector<16x342xf32> to vector<16x288xf32>
    %c4 = arith.constant 4 : index
    %c0_16 = arith.constant 0 : index
    %c0_17 = arith.constant 0 : index
    %24 = vector.load %arg5[%c4, %c0_16, %c0_17] : memref<27x16x16xf32, #tpu.memory_space<vmem>>, vector<1x16x16xf32>
    %25 = vector.shape_cast %24 : vector<1x16x16xf32> to vector<16x16xf32>
    %cst_18 = arith.constant dense<0.000000e+00> : vector<16x288xf32>
    %26 = tpu.matmul %25, %23, %cst_18 {dimension_numbers = #tpu.dot_dimension_numbers<[1], [0], [0], [1], [0, 0, 1, 1], [], []>} : vector<16x16xf32>, vector<16x288xf32>, vector<16x288xf32> -> vector<16x288xf32>
    %27 = arith.addf %22, %26 : vector<16x288xf32>
    %28 = vector.extract_strided_slice %2 {offsets = [0, 20], sizes = [16, 288], strides = [1, 1]} : vector<16x342xf32> to vector<16x288xf32>
    %c5 = arith.constant 5 : index
    %c0_19 = arith.constant 0 : index
    %c0_20 = arith.constant 0 : index
    %29 = vector.load %arg5[%c5, %c0_19, %c0_20] : memref<27x16x16xf32, #tpu.memory_space<vmem>>, vector<1x16x16xf32>
    %30 = vector.shape_cast %29 : vector<1x16x16xf32> to vector<16x16xf32>
    %cst_21 = arith.constant dense<0.000000e+00> : vector<16x288xf32>
    %31 = tpu.matmul %30, %28, %cst_21 {dimension_numbers = #tpu.dot_dimension_numbers<[1], [0], [0], [1], [0, 0, 1, 1], [], []>} : vector<16x16xf32>, vector<16x288xf32>, vector<16x288xf32> -> vector<16x288xf32>
    %32 = arith.addf %27, %31 : vector<16x288xf32>
    %33 = vector.extract_strided_slice %2 {offsets = [0, 36], sizes = [16, 288], strides = [1, 1]} : vector<16x342xf32> to vector<16x288xf32>
    %c6 = arith.constant 6 : index
    %c0_22 = arith.constant 0 : index
    %c0_23 = arith.constant 0 : index
    %34 = vector.load %arg5[%c6, %c0_22, %c0_23] : memref<27x16x16xf32, #tpu.memory_space<vmem>>, vector<1x16x16xf32>
    %35 = vector.shape_cast %34 : vector<1x16x16xf32> to vector<16x16xf32>
    %cst_24 = arith.constant dense<0.000000e+00> : vector<16x288xf32>
    %36 = tpu.matmul %35, %33, %cst_24 {dimension_numbers = #tpu.dot_dimension_numbers<[1], [0], [0], [1], [0, 0, 1, 1], [], []>} : vector<16x16xf32>, vector<16x288xf32>, vector<16x288xf32> -> vector<16x288xf32>
    %37 = arith.addf %32, %36 : vector<16x288xf32>
    %38 = vector.extract_strided_slice %2 {offsets = [0, 37], sizes = [16, 288], strides = [1, 1]} : vector<16x342xf32> to vector<16x288xf32>
    %c7 = arith.constant 7 : index
    %c0_25 = arith.constant 0 : index
    %c0_26 = arith.constant 0 : index
    %39 = vector.load %arg5[%c7, %c0_25, %c0_26] : memref<27x16x16xf32, #tpu.memory_space<vmem>>, vector<1x16x16xf32>
    %40 = vector.shape_cast %39 : vector<1x16x16xf32> to vector<16x16xf32>
    %cst_27 = arith.constant dense<0.000000e+00> : vector<16x288xf32>
    %41 = tpu.matmul %40, %38, %cst_27 {dimension_numbers = #tpu.dot_dimension_numbers<[1], [0], [0], [1], [0, 0, 1, 1], [], []>} : vector<16x16xf32>, vector<16x288xf32>, vector<16x288xf32> -> vector<16x288xf32>
    %42 = arith.addf %37, %41 : vector<16x288xf32>
    %43 = vector.extract_strided_slice %2 {offsets = [0, 38], sizes = [16, 288], strides = [1, 1]} : vector<16x342xf32> to vector<16x288xf32>
    %c8 = arith.constant 8 : index
    %c0_28 = arith.constant 0 : index
    %c0_29 = arith.constant 0 : index
    %44 = vector.load %arg5[%c8, %c0_28, %c0_29] : memref<27x16x16xf32, #tpu.memory_space<vmem>>, vector<1x16x16xf32>
    %45 = vector.shape_cast %44 : vector<1x16x16xf32> to vector<16x16xf32>
    %cst_30 = arith.constant dense<0.000000e+00> : vector<16x288xf32>
    %46 = tpu.matmul %45, %43, %cst_30 {dimension_numbers = #tpu.dot_dimension_numbers<[1], [0], [0], [1], [0, 0, 1, 1], [], []>} : vector<16x16xf32>, vector<16x288xf32>, vector<16x288xf32> -> vector<16x288xf32>
    %47 = arith.addf %42, %46 : vector<16x288xf32>
    %c0_31 = arith.constant 0 : index
    %c0_32 = arith.constant 0 : index
    %c0_33 = arith.constant 0 : index
    %c0_34 = arith.constant 0 : index
    %48 = vector.load %arg3[%c0_31, %c0_32, %c0_33, %c0_34] : memref<1x1x16x342xf32, #tpu.memory_space<vmem>>, vector<1x1x16x342xf32>
    %49 = vector.shape_cast %48 : vector<1x1x16x342xf32> to vector<16x342xf32>
    %50 = vector.extract_strided_slice %49 {offsets = [0, 0], sizes = [16, 288], strides = [1, 1]} : vector<16x342xf32> to vector<16x288xf32>
    %c9 = arith.constant 9 : index
    %c0_35 = arith.constant 0 : index
    %c0_36 = arith.constant 0 : index
    %51 = vector.load %arg5[%c9, %c0_35, %c0_36] : memref<27x16x16xf32, #tpu.memory_space<vmem>>, vector<1x16x16xf32>
    %52 = vector.shape_cast %51 : vector<1x16x16xf32> to vector<16x16xf32>
    %cst_37 = arith.constant dense<0.000000e+00> : vector<16x288xf32>
    %53 = tpu.matmul %52, %50, %cst_37 {dimension_numbers = #tpu.dot_dimension_numbers<[1], [0], [0], [1], [0, 0, 1, 1], [], []>} : vector<16x16xf32>, vector<16x288xf32>, vector<16x288xf32> -> vector<16x288xf32>
    %54 = arith.addf %47, %53 : vector<16x288xf32>
    %55 = vector.extract_strided_slice %49 {offsets = [0, 1], sizes = [16, 288], strides = [1, 1]} : vector<16x342xf32> to vector<16x288xf32>
    %c10 = arith.constant 10 : index
    %c0_38 = arith.constant 0 : index
    %c0_39 = arith.constant 0 : index
    %56 = vector.load %arg5[%c10, %c0_38, %c0_39] : memref<27x16x16xf32, #tpu.memory_space<vmem>>, vector<1x16x16xf32>
    %57 = vector.shape_cast %56 : vector<1x16x16xf32> to vector<16x16xf32>
    %cst_40 = arith.constant dense<0.000000e+00> : vector<16x288xf32>
    %58 = tpu.matmul %57, %55, %cst_40 {dimension_numbers = #tpu.dot_dimension_numbers<[1], [0], [0], [1], [0, 0, 1, 1], [], []>} : vector<16x16xf32>, vector<16x288xf32>, vector<16x288xf32> -> vector<16x288xf32>
    %59 = arith.addf %54, %58 : vector<16x288xf32>
    %60 = vector.extract_strided_slice %49 {offsets = [0, 2], sizes = [16, 288], strides = [1, 1]} : vector<16x342xf32> to vector<16x288xf32>
    %c11 = arith.constant 11 : index
    %c0_41 = arith.constant 0 : index
    %c0_42 = arith.constant 0 : index
    %61 = vector.load %arg5[%c11, %c0_41, %c0_42] : memref<27x16x16xf32, #tpu.memory_space<vmem>>, vector<1x16x16xf32>
    %62 = vector.shape_cast %61 : vector<1x16x16xf32> to vector<16x16xf32>
    %cst_43 = arith.constant dense<0.000000e+00> : vector<16x288xf32>
    %63 = tpu.matmul %62, %60, %cst_43 {dimension_numbers = #tpu.dot_dimension_numbers<[1], [0], [0], [1], [0, 0, 1, 1], [], []>} : vector<16x16xf32>, vector<16x288xf32>, vector<16x288xf32> -> vector<16x288xf32>
    %64 = arith.addf %59, %63 : vector<16x288xf32>
    %65 = vector.extract_strided_slice %49 {offsets = [0, 18], sizes = [16, 288], strides = [1, 1]} : vector<16x342xf32> to vector<16x288xf32>
    %c12 = arith.constant 12 : index
    %c0_44 = arith.constant 0 : index
    %c0_45 = arith.constant 0 : index
    %66 = vector.load %arg5[%c12, %c0_44, %c0_45] : memref<27x16x16xf32, #tpu.memory_space<vmem>>, vector<1x16x16xf32>
    %67 = vector.shape_cast %66 : vector<1x16x16xf32> to vector<16x16xf32>
    %cst_46 = arith.constant dense<0.000000e+00> : vector<16x288xf32>
    %68 = tpu.matmul %67, %65, %cst_46 {dimension_numbers = #tpu.dot_dimension_numbers<[1], [0], [0], [1], [0, 0, 1, 1], [], []>} : vector<16x16xf32>, vector<16x288xf32>, vector<16x288xf32> -> vector<16x288xf32>
    %69 = arith.addf %64, %68 : vector<16x288xf32>
    %70 = vector.extract_strided_slice %49 {offsets = [0, 19], sizes = [16, 288], strides = [1, 1]} : vector<16x342xf32> to vector<16x288xf32>
    %c13 = arith.constant 13 : index
    %c0_47 = arith.constant 0 : index
    %c0_48 = arith.constant 0 : index
    %71 = vector.load %arg5[%c13, %c0_47, %c0_48] : memref<27x16x16xf32, #tpu.memory_space<vmem>>, vector<1x16x16xf32>
    %72 = vector.shape_cast %71 : vector<1x16x16xf32> to vector<16x16xf32>
    %cst_49 = arith.constant dense<0.000000e+00> : vector<16x288xf32>
    %73 = tpu.matmul %72, %70, %cst_49 {dimension_numbers = #tpu.dot_dimension_numbers<[1], [0], [0], [1], [0, 0, 1, 1], [], []>} : vector<16x16xf32>, vector<16x288xf32>, vector<16x288xf32> -> vector<16x288xf32>
    %74 = arith.addf %69, %73 : vector<16x288xf32>
    %75 = vector.extract_strided_slice %49 {offsets = [0, 20], sizes = [16, 288], strides = [1, 1]} : vector<16x342xf32> to vector<16x288xf32>
    %c14 = arith.constant 14 : index
    %c0_50 = arith.constant 0 : index
    %c0_51 = arith.constant 0 : index
    %76 = vector.load %arg5[%c14, %c0_50, %c0_51] : memref<27x16x16xf32, #tpu.memory_space<vmem>>, vector<1x16x16xf32>
    %77 = vector.shape_cast %76 : vector<1x16x16xf32> to vector<16x16xf32>
    %cst_52 = arith.constant dense<0.000000e+00> : vector<16x288xf32>
    %78 = tpu.matmul %77, %75, %cst_52 {dimension_numbers = #tpu.dot_dimension_numbers<[1], [0], [0], [1], [0, 0, 1, 1], [], []>} : vector<16x16xf32>, vector<16x288xf32>, vector<16x288xf32> -> vector<16x288xf32>
    %79 = arith.addf %74, %78 : vector<16x288xf32>
    %80 = vector.extract_strided_slice %49 {offsets = [0, 36], sizes = [16, 288], strides = [1, 1]} : vector<16x342xf32> to vector<16x288xf32>
    %c15 = arith.constant 15 : index
    %c0_53 = arith.constant 0 : index
    %c0_54 = arith.constant 0 : index
    %81 = vector.load %arg5[%c15, %c0_53, %c0_54] : memref<27x16x16xf32, #tpu.memory_space<vmem>>, vector<1x16x16xf32>
    %82 = vector.shape_cast %81 : vector<1x16x16xf32> to vector<16x16xf32>
    %cst_55 = arith.constant dense<0.000000e+00> : vector<16x288xf32>
    %83 = tpu.matmul %82, %80, %cst_55 {dimension_numbers = #tpu.dot_dimension_numbers<[1], [0], [0], [1], [0, 0, 1, 1], [], []>} : vector<16x16xf32>, vector<16x288xf32>, vector<16x288xf32> -> vector<16x288xf32>
    %84 = arith.addf %79, %83 : vector<16x288xf32>
    %85 = vector.extract_strided_slice %49 {offsets = [0, 37], sizes = [16, 288], strides = [1, 1]} : vector<16x342xf32> to vector<16x288xf32>
    %c16 = arith.constant 16 : index
    %c0_56 = arith.constant 0 : index
    %c0_57 = arith.constant 0 : index
    %86 = vector.load %arg5[%c16, %c0_56, %c0_57] : memref<27x16x16xf32, #tpu.memory_space<vmem>>, vector<1x16x16xf32>
    %87 = vector.shape_cast %86 : vector<1x16x16xf32> to vector<16x16xf32>
    %cst_58 = arith.constant dense<0.000000e+00> : vector<16x288xf32>
    %88 = tpu.matmul %87, %85, %cst_58 {dimension_numbers = #tpu.dot_dimension_numbers<[1], [0], [0], [1], [0, 0, 1, 1], [], []>} : vector<16x16xf32>, vector<16x288xf32>, vector<16x288xf32> -> vector<16x288xf32>
    %89 = arith.addf %84, %88 : vector<16x288xf32>
    %90 = vector.extract_strided_slice %49 {offsets = [0, 38], sizes = [16, 288], strides = [1, 1]} : vector<16x342xf32> to vector<16x288xf32>
    %c17 = arith.constant 17 : index
    %c0_59 = arith.constant 0 : index
    %c0_60 = arith.constant 0 : index
    %91 = vector.load %arg5[%c17, %c0_59, %c0_60] : memref<27x16x16xf32, #tpu.memory_space<vmem>>, vector<1x16x16xf32>
    %92 = vector.shape_cast %91 : vector<1x16x16xf32> to vector<16x16xf32>
    %cst_61 = arith.constant dense<0.000000e+00> : vector<16x288xf32>
    %93 = tpu.matmul %92, %90, %cst_61 {dimension_numbers = #tpu.dot_dimension_numbers<[1], [0], [0], [1], [0, 0, 1, 1], [], []>} : vector<16x16xf32>, vector<16x288xf32>, vector<16x288xf32> -> vector<16x288xf32>
    %94 = arith.addf %89, %93 : vector<16x288xf32>
    %c0_62 = arith.constant 0 : index
    %c0_63 = arith.constant 0 : index
    %c0_64 = arith.constant 0 : index
    %c0_65 = arith.constant 0 : index
    %95 = vector.load %arg4[%c0_62, %c0_63, %c0_64, %c0_65] : memref<1x1x16x342xf32, #tpu.memory_space<vmem>>, vector<1x1x16x342xf32>
    %96 = vector.shape_cast %95 : vector<1x1x16x342xf32> to vector<16x342xf32>
    %97 = vector.extract_strided_slice %96 {offsets = [0, 0], sizes = [16, 288], strides = [1, 1]} : vector<16x342xf32> to vector<16x288xf32>
    %c18 = arith.constant 18 : index
    %c0_66 = arith.constant 0 : index
    %c0_67 = arith.constant 0 : index
    %98 = vector.load %arg5[%c18, %c0_66, %c0_67] : memref<27x16x16xf32, #tpu.memory_space<vmem>>, vector<1x16x16xf32>
    %99 = vector.shape_cast %98 : vector<1x16x16xf32> to vector<16x16xf32>
    %cst_68 = arith.constant dense<0.000000e+00> : vector<16x288xf32>
    %100 = tpu.matmul %99, %97, %cst_68 {dimension_numbers = #tpu.dot_dimension_numbers<[1], [0], [0], [1], [0, 0, 1, 1], [], []>} : vector<16x16xf32>, vector<16x288xf32>, vector<16x288xf32> -> vector<16x288xf32>
    %101 = arith.addf %94, %100 : vector<16x288xf32>
    %102 = vector.extract_strided_slice %96 {offsets = [0, 1], sizes = [16, 288], strides = [1, 1]} : vector<16x342xf32> to vector<16x288xf32>
    %c19 = arith.constant 19 : index
    %c0_69 = arith.constant 0 : index
    %c0_70 = arith.constant 0 : index
    %103 = vector.load %arg5[%c19, %c0_69, %c0_70] : memref<27x16x16xf32, #tpu.memory_space<vmem>>, vector<1x16x16xf32>
    %104 = vector.shape_cast %103 : vector<1x16x16xf32> to vector<16x16xf32>
    %cst_71 = arith.constant dense<0.000000e+00> : vector<16x288xf32>
    %105 = tpu.matmul %104, %102, %cst_71 {dimension_numbers = #tpu.dot_dimension_numbers<[1], [0], [0], [1], [0, 0, 1, 1], [], []>} : vector<16x16xf32>, vector<16x288xf32>, vector<16x288xf32> -> vector<16x288xf32>
    %106 = arith.addf %101, %105 : vector<16x288xf32>
    %107 = vector.extract_strided_slice %96 {offsets = [0, 2], sizes = [16, 288], strides = [1, 1]} : vector<16x342xf32> to vector<16x288xf32>
    %c20 = arith.constant 20 : index
    %c0_72 = arith.constant 0 : index
    %c0_73 = arith.constant 0 : index
    %108 = vector.load %arg5[%c20, %c0_72, %c0_73] : memref<27x16x16xf32, #tpu.memory_space<vmem>>, vector<1x16x16xf32>
    %109 = vector.shape_cast %108 : vector<1x16x16xf32> to vector<16x16xf32>
    %cst_74 = arith.constant dense<0.000000e+00> : vector<16x288xf32>
    %110 = tpu.matmul %109, %107, %cst_74 {dimension_numbers = #tpu.dot_dimension_numbers<[1], [0], [0], [1], [0, 0, 1, 1], [], []>} : vector<16x16xf32>, vector<16x288xf32>, vector<16x288xf32> -> vector<16x288xf32>
    %111 = arith.addf %106, %110 : vector<16x288xf32>
    %112 = vector.extract_strided_slice %96 {offsets = [0, 18], sizes = [16, 288], strides = [1, 1]} : vector<16x342xf32> to vector<16x288xf32>
    %c21 = arith.constant 21 : index
    %c0_75 = arith.constant 0 : index
    %c0_76 = arith.constant 0 : index
    %113 = vector.load %arg5[%c21, %c0_75, %c0_76] : memref<27x16x16xf32, #tpu.memory_space<vmem>>, vector<1x16x16xf32>
    %114 = vector.shape_cast %113 : vector<1x16x16xf32> to vector<16x16xf32>
    %cst_77 = arith.constant dense<0.000000e+00> : vector<16x288xf32>
    %115 = tpu.matmul %114, %112, %cst_77 {dimension_numbers = #tpu.dot_dimension_numbers<[1], [0], [0], [1], [0, 0, 1, 1], [], []>} : vector<16x16xf32>, vector<16x288xf32>, vector<16x288xf32> -> vector<16x288xf32>
    %116 = arith.addf %111, %115 : vector<16x288xf32>
    %117 = vector.extract_strided_slice %96 {offsets = [0, 19], sizes = [16, 288], strides = [1, 1]} : vector<16x342xf32> to vector<16x288xf32>
    %c22 = arith.constant 22 : index
    %c0_78 = arith.constant 0 : index
    %c0_79 = arith.constant 0 : index
    %118 = vector.load %arg5[%c22, %c0_78, %c0_79] : memref<27x16x16xf32, #tpu.memory_space<vmem>>, vector<1x16x16xf32>
    %119 = vector.shape_cast %118 : vector<1x16x16xf32> to vector<16x16xf32>
    %cst_80 = arith.constant dense<0.000000e+00> : vector<16x288xf32>
    %120 = tpu.matmul %119, %117, %cst_80 {dimension_numbers = #tpu.dot_dimension_numbers<[1], [0], [0], [1], [0, 0, 1, 1], [], []>} : vector<16x16xf32>, vector<16x288xf32>, vector<16x288xf32> -> vector<16x288xf32>
    %121 = arith.addf %116, %120 : vector<16x288xf32>
    %122 = vector.extract_strided_slice %96 {offsets = [0, 20], sizes = [16, 288], strides = [1, 1]} : vector<16x342xf32> to vector<16x288xf32>
    %c23 = arith.constant 23 : index
    %c0_81 = arith.constant 0 : index
    %c0_82 = arith.constant 0 : index
    %123 = vector.load %arg5[%c23, %c0_81, %c0_82] : memref<27x16x16xf32, #tpu.memory_space<vmem>>, vector<1x16x16xf32>
    %124 = vector.shape_cast %123 : vector<1x16x16xf32> to vector<16x16xf32>
    %cst_83 = arith.constant dense<0.000000e+00> : vector<16x288xf32>
    %125 = tpu.matmul %124, %122, %cst_83 {dimension_numbers = #tpu.dot_dimension_numbers<[1], [0], [0], [1], [0, 0, 1, 1], [], []>} : vector<16x16xf32>, vector<16x288xf32>, vector<16x288xf32> -> vector<16x288xf32>
    %126 = arith.addf %121, %125 : vector<16x288xf32>
    %127 = vector.extract_strided_slice %96 {offsets = [0, 36], sizes = [16, 288], strides = [1, 1]} : vector<16x342xf32> to vector<16x288xf32>
    %c24 = arith.constant 24 : index
    %c0_84 = arith.constant 0 : index
    %c0_85 = arith.constant 0 : index
    %128 = vector.load %arg5[%c24, %c0_84, %c0_85] : memref<27x16x16xf32, #tpu.memory_space<vmem>>, vector<1x16x16xf32>
    %129 = vector.shape_cast %128 : vector<1x16x16xf32> to vector<16x16xf32>
    %cst_86 = arith.constant dense<0.000000e+00> : vector<16x288xf32>
    %130 = tpu.matmul %129, %127, %cst_86 {dimension_numbers = #tpu.dot_dimension_numbers<[1], [0], [0], [1], [0, 0, 1, 1], [], []>} : vector<16x16xf32>, vector<16x288xf32>, vector<16x288xf32> -> vector<16x288xf32>
    %131 = arith.addf %126, %130 : vector<16x288xf32>
    %132 = vector.extract_strided_slice %96 {offsets = [0, 37], sizes = [16, 288], strides = [1, 1]} : vector<16x342xf32> to vector<16x288xf32>
    %c25 = arith.constant 25 : index
    %c0_87 = arith.constant 0 : index
    %c0_88 = arith.constant 0 : index
    %133 = vector.load %arg5[%c25, %c0_87, %c0_88] : memref<27x16x16xf32, #tpu.memory_space<vmem>>, vector<1x16x16xf32>
    %134 = vector.shape_cast %133 : vector<1x16x16xf32> to vector<16x16xf32>
    %cst_89 = arith.constant dense<0.000000e+00> : vector<16x288xf32>
    %135 = tpu.matmul %134, %132, %cst_89 {dimension_numbers = #tpu.dot_dimension_numbers<[1], [0], [0], [1], [0, 0, 1, 1], [], []>} : vector<16x16xf32>, vector<16x288xf32>, vector<16x288xf32> -> vector<16x288xf32>
    %136 = arith.addf %131, %135 : vector<16x288xf32>
    %137 = vector.extract_strided_slice %96 {offsets = [0, 38], sizes = [16, 288], strides = [1, 1]} : vector<16x342xf32> to vector<16x288xf32>
    %c26 = arith.constant 26 : index
    %c0_90 = arith.constant 0 : index
    %c0_91 = arith.constant 0 : index
    %138 = vector.load %arg5[%c26, %c0_90, %c0_91] : memref<27x16x16xf32, #tpu.memory_space<vmem>>, vector<1x16x16xf32>
    %139 = vector.shape_cast %138 : vector<1x16x16xf32> to vector<16x16xf32>
    %cst_92 = arith.constant dense<0.000000e+00> : vector<16x288xf32>
    %140 = tpu.matmul %139, %137, %cst_92 {dimension_numbers = #tpu.dot_dimension_numbers<[1], [0], [0], [1], [0, 0, 1, 1], [], []>} : vector<16x16xf32>, vector<16x288xf32>, vector<16x288xf32> -> vector<16x288xf32>
    %141 = arith.addf %136, %140 : vector<16x288xf32>
    %c0_93 = arith.constant 0 : index
    %c0_94 = arith.constant 0 : index
    %142 = vector.load %arg6[%c0_93, %c0_94] : memref<16x1xf32, #tpu.memory_space<vmem>>, vector<16x1xf32>
    %143 = vector.broadcast %142 : vector<16x1xf32> to vector<16x288xf32>
    %144 = arith.addf %141, %143 : vector<16x288xf32>
    %c0_95 = arith.constant 0 : index
    %c0_96 = arith.constant 0 : index
    %c0_97 = arith.constant 0 : index
    %c0_98 = arith.constant 0 : index
    %145 = vector.load %arg7[%c0_95, %c0_96, %c0_97, %c0_98] : memref<1x1x16x342xf32, #tpu.memory_space<vmem>>, vector<1x1x16x342xf32>
    %146 = vector.shape_cast %145 : vector<1x1x16x342xf32> to vector<16x342xf32>
    %147 = vector.extract_strided_slice %146 {offsets = [0, 19], sizes = [16, 288], strides = [1, 1]} : vector<16x342xf32> to vector<16x288xf32>
    %148 = arith.addf %144, %147 : vector<16x288xf32>
    %cst_99 = arith.constant 0.000000e+00 : f32
    %149 = vector.broadcast %cst_99 : f32 to vector<16x288xf32>
    %150 = arith.maximumf %148, %149 : vector<16x288xf32>
    %c0_100 = arith.constant 0 : index
    %c0_101 = arith.constant 0 : index
    %c0_102 = arith.constant 0 : index
    %c0_103 = arith.constant 0 : index
    %151 = vector.load %arg8[%c0_100, %c0_101, %c0_102, %c0_103] : memref<1x1x16x288xf32, #tpu.memory_space<vmem>>, vector<1x1x16x288xf32>
    %152 = vector.shape_cast %151 : vector<1x1x16x288xf32> to vector<16x288xf32>
    %153 = vector.shape_cast %150 : vector<16x288xf32> to vector<1x1x16x288xf32>
    tpu.vector_store %arg8[%c0_100, %c0_101, %c0_102, %c0_103], %153 {strides = array<i32>} : memref<1x1x16x288xf32, #tpu.memory_space<vmem>>, vector<1x1x16x288xf32>,
    return
  }
  func.func @transform_0(%arg0: i32, %arg1: i32) -> (i32, i32, i32, i32) {
    %c0_i32 = arith.constant 0 : i32
    %c0_i32_0 = arith.constant 0 : i32
    %c0_i32_1 = arith.constant 0 : i32
    return %arg0, %arg1, %c0_i32, %c0_i32_0 : i32, i32, i32, i32
  }
  func.func @transform_1(%arg0: i32, %arg1: i32) -> (i32, i32, i32, i32) {
    %c1_i32 = arith.constant 1 : i32
    %0 = arith.addi %arg1, %c1_i32 : i32
    %c0_i32 = arith.constant 0 : i32
    %c0_i32_0 = arith.constant 0 : i32
    %c0_i32_1 = arith.constant 0 : i32
    return %arg0, %0, %c0_i32, %c0_i32_0 : i32, i32, i32, i32
  }
  func.func @transform_2(%arg0: i32, %arg1: i32) -> (i32, i32, i32, i32) {
    %c2_i32 = arith.constant 2 : i32
    %0 = arith.addi %arg1, %c2_i32 : i32
    %c0_i32 = arith.constant 0 : i32
    %c0_i32_0 = arith.constant 0 : i32
    %c0_i32_1 = arith.constant 0 : i32
    return %arg0, %0, %c0_i32, %c0_i32_0 : i32, i32, i32, i32
  }
  func.func @transform_3(%arg0: i32, %arg1: i32) -> (i32, i32, i32) {
    %c0_i32 = arith.constant 0 : i32
    %c0_i32_0 = arith.constant 0 : i32
    %c0_i32_1 = arith.constant 0 : i32
    %c0_i32_2 = arith.constant 0 : i32
    return %c0_i32, %c0_i32_0, %c0_i32_1 : i32, i32, i32
  }
  func.func @transform_4(%arg0: i32, %arg1: i32) -> (i32, i32) {
    %c0_i32 = arith.constant 0 : i32
    %c0_i32_0 = arith.constant 0 : i32
    %c0_i32_1 = arith.constant 0 : i32
    return %c0_i32, %c0_i32_0 : i32, i32
  }
  func.func @transform_5(%arg0: i32, %arg1: i32) -> (i32, i32, i32, i32) {
    %c1_i32 = arith.constant 1 : i32
    %0 = arith.addi %arg1, %c1_i32 : i32
    %c0_i32 = arith.constant 0 : i32
    %c0_i32_0 = arith.constant 0 : i32
    %c0_i32_1 = arith.constant 0 : i32
    return %arg0, %0, %c0_i32, %c0_i32_0 : i32, i32, i32, i32
  }
  func.func @transform_6(%arg0: i32, %arg1: i32) -> (i32, i32, i32, i32) {
    %c0_i32 = arith.constant 0 : i32
    %c0_i32_0 = arith.constant 0 : i32
    %c0_i32_1 = arith.constant 0 : i32
    return %arg0, %arg1, %c0_i32, %c0_i32_0 : i32, i32, i32, i32
  }
}

</mosaic_0001>

<bundles_post_ra>
// kernel: residual_conv_block.2
= control target key start
LH: loop header
LB: loop body
LE: loop exit
PB: predicated region body
PF: predicated region fallthrough
CT: control target
= control target key end

     0   :  { %s4062_s18 = smov 0   ;;  %s4064_s19 = smov 0   ;;  %s5321_s0 = inlined_call_operand.vmem [shape: f32[2,18,16,342], index: 0, kind: input, shape index: {}, may-alias: {0,1,2}]   ;;  %s5322_s1 = inlined_call_operand.vmem [shape: f32[2,18,16,342], index: 1, kind: input, shape index: {}, may-alias: {0,1,2}]   ;;  %s5323_s2 = inlined_call_operand.vmem [shape: f32[2,18,16,342], index: 2, kind: input, shape index: {}, may-alias: {0,1,2}]   ;;  %s5324_s3 = inlined_call_operand.vmem [shape: f32[27,16,16], index: 3, kind: input, shape index: {}]   ;;  %s5325_s4 = inlined_call_operand.vmem [shape: f32[16,1], index: 4, kind: input, shape index: {}]   ;;  %s5326_s5 = inlined_call_operand.vmem [shape: f32[2,16,16,288], index: 5, kind: output, shape index: {}]  }
   0x1   :  { %s4066_s20 = smov 0   ;;  %s4068_s21 = smov 0  }
   0x2   :  { %s4070_s22 = smov 0  }
   0x3 LB: > { %s24_s23 = sadd.s32 1, %s4013_s20  ;;  %s27_s24 = sadd.s32 1, %s4017_s21  ;;  %s4021_s22 = sphi %s4070_s22, %s15_s22   ;;  %s4017_s21 = sphi %s4068_s21, %s5330_s21   ;;  %s4013_s20 = sphi %s4066_s20, %s5329_s20   ;;  %s4009_s19 = sphi %s4064_s19, %s5328_s19   ;;  %s4005_s18 = sphi %s4062_s18, %s5327_s18  }
   0x4   : > { %p25_p0 = scmp.ge.s32.totalorder %s24_s23, 16  ;;  %p3343_p1 = scmp.ge.s32.totalorder %s4021_s22, 1 }
   0x5   : > { %p247_p2 = scmp.lt.s32.totalorder %s4021_s22, 33 }
   0x6   : > { %s5332_s23 = smov (%p25_p0, %s24_s23), 0  ;;  %s5334_s24 = smov (!%p25_p0, %s27_s24), %s4017_s21 }
   0x7   : > { %p248_p3 = pnand %p3343_p1, %p247_p2  ;;  %p29_p4 = scmp.ge.s32.totalorder %s5334_s24, 2 }
   0x8   : > { %p303_p5 = scmp.lt.s32.totalorder (!%p248_p3), %s4009_s19, 1  ;;  %p305_p6 = scmp.lt.s32.totalorder (!%p248_p3), %s4005_s18, 17 }
   0x9   : > { %s5336_s24 = smov (%p29_p4, %s5334_s24), 0  ;;  %251 = sbr.rel (%p248_p3) target bundleno = 608 (0x260), region = 40 }
   0xa   : > { %s4023_s8 = smov (!%p248_p3), 127   ;;  %s4024_s9 = smov (!%p248_p3), 126  }
   0xb   : > { %s4025_s10 = smov (!%p248_p3), 110   ;;  %s4026_s11 = smov (!%p248_p3), 109  }
   0xc   : > { %s4027_s12 = smov (!%p248_p3), 108   ;;  %s312_s13 = sadd.s32 (!%p248_p3), 1, %s4005_s18 }
   0xd   : > { %p315_p7 = scmp.lt.s32.totalorder (!%p248_p3), %s312_s13, 17  ;;  %s4028_s16 = smov (!%p248_p3), 92  }
   0xe   : > { %s5338_s19 = smov (!%p303_p5, %s4009_s19), 1  ;;  %v4141_v13 = vld [vmem:[%s5324_s3] sm:$0xff]  ;;  %vm383_vm0 = vcmask 130048   ;;  %v4184_v21 = vld [vmem:[%s5324_s3 + $0x8] sm:$0xff]  ;;  %vm372_vm1 = vcmask 1039360   ;;  %v3348_v37 = vld [vmem:[%s5324_s3 + $0x10] sm:$0xff] }
   0xf   : > { %s306_s25 = scalar_select %p305_p6, %s4005_s18, 17  ;;  %vm549_vm2 = vcmask 1031168   ;;  %v4243_v48 = vld [vmem:[%s5324_s3 + $0x18] sm:$0xff]  ;;  %v4262_v56 = vld [vmem:[%s5324_s3 + $0x20] sm:$0xff]  ;;  %vm656_vm3 = vcmask 900096   ;;  %vm870_vm4 = vcmask 883712  }
  0x10   : > { %s4099_s26 = smul.u32 108, %s5338_s19  ;;  %s5340_s13 = smov (!%p315_p7, %s312_s13), 17  ;;  %vm763_vm5 = vcmask 891904   ;;  %vm977_vm6 = vcmask 752640   ;;  %vm1084_vm7 = vcmask 744448   ;;  %vm1191_vm8 = vcmask 736256  }
  0x11   : > { %s3566_s27 = smul.u32 6, %s306_s25  ;;  %s4029_s25 = smov 91   ;;  %vm3197_vm9 = vcmask 261120  }
  0x12   : > { %s3568_s17 = smul.u32 6, %s5340_s13  ;;  %p336_p9 = scmp.lt.s32.totalorder %s4005_s18, 15 }
  0x13   : > { %s309_s28 = sadd.s32 %s4099_s26, %s3566_s27 }
  0x14   : > { %s3344_s29 = sshll.u32 %s309_s28, 3  ;;  %s319_s27 = sadd.s32 %s3568_s17, %s4099_s26 }
  0x15   : > { %s311_s7 = scalar_lea.vmem %s5321_s0, %s3344_s29  ;;  %s3345_s28 = sshll.u32 %s319_s27, 3 }
  0x16   : > { %v346_v0 = vld [vmem:[%s311_s7 + $0x18] sm:$0xff]  ;;  %v4105_v1 = vld [vmem:[%s311_s7 + $0x20] sm:$0xff]  ;;  %v4107_v2 = vld [vmem:[%s311_s7 + $0x10] sm:$0xff]  ;;  %s321_s6 = scalar_lea.vmem %s5322_s1, %s3345_s28  ;;  %s323_s28 = sadd.s32 2, %s4005_s18 }
  0x17   : > { %v3621_v3 = vpack.i.bf16 %v4105_v1, %v346_v0  ;;  %v4110_v4 = vld [vmem:[%s311_s7 + $0x28] sm:$0xff]  ;;  %v343_v5 = vld [vmem:[%s311_s7] sm:$0xff]  ;;  %479 = vmatpush.msra.mxu3 %v346_v0  ;;  %v4158_v14 = vld [vmem:[%s321_s6 + $0x18] sm:$0xff]  ;;  %p326_p8 = scmp.lt.s32.totalorder %s323_s28, 17  ;;  %s5344_s18 = smov (!%p336_p9, %s4005_s18), 15 }
  0x18   : > { %v3631_v6 = vpack.i.bf16 %v4107_v2, %v4110_v4  ;;  %v3641_v7 = vpack.i.bf16 %v343_v5, %v4110_v4  ;;  %v4117_v8 = vld [vmem:[%s311_s7 + $0x8] sm:$0xff]  ;;  %v3651_v11 = vpack.i.bf16 %v4110_v4, %v4105_v1  ;;  %v3661_v12 = vpack.i.bf16 %v343_v5, %v346_v0  ;;  %s4030_s7 = smov 90   ;;  %v4160_v15 = vld [vmem:[%s321_s6 + $0x20] sm:$0xff]  ;;  %v4190_v23 = vld [vmem:[%s321_s6 + $0x10] sm:$0xff] }
  0x19   : > { %3622 = vrot.lane.b32.xlu0 %v3621_v3, %s4023_s8  ;;  %480 = vmatpush.msra.mxu3 %v343_v5  ;;  %v3626_v9 = vpack.i.bf16 %v4117_v8, %v343_v5  ;;  %v3646_v10 = vpack.i.bf16 %v4107_v2, %v4117_v8  ;;  %v4162_v16 = vld [vmem:[%s321_s6] sm:$0xff]  ;;  %v4164_v17 = vld [vmem:[%s321_s6 + $0x28] sm:$0xff]  ;;  %v4168_v18 = vpack.i.bf16 %v4160_v15, %v4158_v14  ;;  %s5342_s28 = smov (!%p326_p8, %s323_s28), 17 }
  0x1a   : > { %3632 = vrot.lane.b32.xlu1 %v3631_v6, %s4023_s8  ;;  %3642 = vrot.lane.b32.xlu2 %v3641_v7, %s4024_s9  ;;  %v3746_v19 = vpack.i.bf16 %v4162_v16, %v4164_v17  ;;  %v4177_v20 = vpack.i.bf16 %v4164_v17, %v4160_v15  ;;  %v4188_v22 = vld [vmem:[%s321_s6 + $0x8] sm:$0xff]  ;;  %v4204_v26 = vpack.i.bf16 %v4190_v23, %v4164_v17  ;;  %s3569_s14 = smul.u32 6, %s5342_s28 }
  0x1b   : > { %3356 = vmatmul.msk.f32.vlgmr.msra.gmra.mxu3 %vm383_vm0, %v4141_v13  ;;  %v4196_v24 = vpack.i.bf16 %v4190_v23, %v4188_v22  ;;  %v4208_v27 = vpack.i.bf16 %v4188_v22, %v4162_v16  ;;  %v4222_v29 = vpack.i.bf16 %v4162_v16, %v4158_v14 }
  0x1c   : > { %s330_s15 = sadd.s32 %s3569_s14, %s4099_s26 }
  0x1d   : > { %s3346_s26 = sshll.u32 %s330_s15, 3 }
  0x1e   : > { %s4401_s13 = scalar_lea.vmem %s5323_s2, %s3346_s26 }
  0x21   : > { %3627 = vrot.lane.b32.xlu0 %v3626_v9, %s4023_s8 }
  0x22   : > { %3637 = vrot.lane.b32.xlu1 %v3621_v3, %s4024_s9  ;;  %3647 = vrot.lane.b32.xlu2 %v3646_v10, %s4024_s9 }
  0x23   : > { %3357 = vmatmul.msk.f32.gmra.mxu3 %vm383_vm0, %v4184_v21 }
  0x29   : > { %3652 = vrot.lane.b32.xlu0 %v3651_v11, %s4025_s10 }
  0x2a   : > { %3657 = vrot.lane.b32.xlu1 %v3646_v10, %s4025_s10  ;;  %3662 = vrot.lane.b32.xlu2 %v3661_v12, %s4025_s10 }
  0x31   : > { %3667 = vrot.lane.b32.xlu0 %v3621_v3, %s4026_s11 }
  0x32   : > { %3672 = vrot.lane.b32.xlu1 %v3626_v9, %s4026_s11  ;;  %3677 = vrot.lane.b32.xlu2 %v3621_v3, %s4027_s12 }
  0x39   : > { %3682 = vrot.lane.b32.xlu0 %v3631_v6, %s4026_s11 }
  0x3a   : > { %3687 = vrot.lane.b32.xlu1 %v3626_v9, %s4027_s12  ;;  %3692 = vrot.lane.b32.xlu2 %v3631_v6, %s4027_s12 }
  0x41   : > { %3697 = vrot.lane.b32.xlu0 %v3621_v3, %s4028_s16 }
  0x42   : > { %3702 = vrot.lane.b32.xlu1 %v3641_v7, %s4028_s16  ;;  %3707 = vrot.lane.b32.xlu2 %v3646_v10, %s4028_s16 }
  0x49   : > { %3712 = vrot.lane.b32.xlu0 %v3651_v11, %s4029_s25  ;;  %v4289_v11 = vld [vmem:[%s5324_s3 + $0x28] sm:$0xff] }
  0x4a   : > { %3717 = vrot.lane.b32.xlu1 %v3646_v10, %s4029_s25  ;;  %3722 = vrot.lane.b32.xlu2 %v3661_v12, %s4029_s25 }
  0x51   : > { %3727 = vrot.lane.b32.xlu0 %v3621_v3, %s4030_s7 }
  0x52   : > { %3732 = vrot.lane.b32.xlu1 %v3626_v9, %s4030_s7  ;;  %3737 = vrot.lane.b32.xlu2 %v3631_v6, %s4030_s7 }
  0x59   : > { %3742 = vrot.lane.b32.xlu0 %v4168_v18, %s4023_s8 }
  0x5a   : > { %3747 = vrot.lane.b32.xlu1 %v3746_v19, %s4023_s8  ;;  %3752 = vrot.lane.b32.xlu2 %v4196_v24, %s4023_s8 }
  0x61   : > { %3757 = vrot.lane.b32.xlu0 %v4177_v20, %s4024_s9 }
  0x62   : > { %3762 = vrot.lane.b32.xlu1 %v4196_v24, %s4024_s9  ;;  %3767 = vrot.lane.b32.xlu2 %v4222_v29, %s4024_s9 }
  0x69   : > { %3772 = vrot.lane.b32.xlu0 %v4168_v18, %s4025_s10 }
  0x6a   : > { %3777 = vrot.lane.b32.xlu1 %v4208_v27, %s4025_s10  ;;  %3782 = vrot.lane.b32.xlu2 %v4168_v18, %s4026_s11 }
  0x71   : > { %3787 = vrot.lane.b32.xlu0 %v4204_v26, %s4025_s10 }
  0x72   : > { %3792 = vrot.lane.b32.xlu1 %v4208_v27, %s4026_s11  ;;  %3797 = vrot.lane.b32.xlu2 %v4204_v26, %s4026_s11 }
  0x74   : > { %v4200_v25 = vpop.permute.xlu2 %3642 }
  0x75   : > { %v3644_v39 = vunpack.i.l.bf16 %v4200_v25  ;;  %v3645_v50 = vunpack.i.h.bf16 %v4200_v25 }
  0x79   : > { %3802 = vrot.lane.b32.xlu0 %v4168_v18, %s4027_s12 }
  0x7a   : > { %3807 = vrot.lane.b32.xlu1 %v3746_v19, %s4027_s12  ;;  %3812 = vrot.lane.b32.xlu2 %v4196_v24, %s4027_s12 }
  0x7c   : > { %v4216_v28 = vpop.permute.xlu2 %3647 }
  0x7d   : > { %v3650_v46 = vunpack.i.h.bf16 %v4216_v28  ;;  %v3649_v47 = vunpack.i.l.bf16 %v4216_v28 }
  0x7f   : > { %v551_v54 = vsel %vm549_vm2, %v3649_v47, %v3650_v46  ;;  %v550_v58 = vsel %vm549_vm2, %v3645_v50, %v3649_v47  ;;  %v4342_v47 = vld [vmem:[%s5324_s3 + $0x38] sm:$0xff] }
  0x81   : > { %3817 = vrot.lane.b32.xlu0 %v4177_v20, %s4028_s16  ;;  %v4312_v20 = vld [vmem:[%s5324_s3 + $0x30] sm:$0xff] }
  0x82   : > { %3822 = vrot.lane.b32.xlu1 %v4196_v24, %s4028_s16  ;;  %3827 = vrot.lane.b32.xlu2 %v4222_v29, %s4028_s16 }
  0x84   : > { %v4230_v38 = vpop.permute.xlu2 %3662 }
  0x85   : > { %v3664_v60 = vunpack.i.l.bf16 %v4230_v38  ;;  %v3665_v0 = vunpack.i.h.bf16 %v4230_v38 }
  0x89   : > { %3832 = vrot.lane.b32.xlu0 %v4168_v18, %s4029_s25 }
  0x8a   : > { %3837 = vrot.lane.b32.xlu1 %v4208_v27, %s4029_s25  ;;  %3842 = vrot.lane.b32.xlu2 %v4168_v18, %s4030_s7 }
  0x8b   : > { %v3623_v30 = vpop.permute.xlu0 %3622 }
  0x8c   : > { %v3625_v31 = vunpack.i.h.bf16 %v3623_v30  ;;  %v3624_v32 = vunpack.i.l.bf16 %v3623_v30  ;;  %v3633_v33 = vpop.permute.xlu1 %3632  ;;  %v4264_v57 = vpop.permute.xlu2 %3677 }
  0x8d   : > { %v3634_v34 = vunpack.i.l.bf16 %v3633_v33  ;;  %v3635_v35 = vunpack.i.h.bf16 %v3633_v33  ;;  %v3680_v3 = vunpack.i.h.bf16 %v4264_v57  ;;  %v3679_v5 = vunpack.i.l.bf16 %v4264_v57 }
  0x8e   : > { %v375_v36 = vsel %vm372_vm1, %v3624_v32, %v3625_v31 }
  0x8f   : > { %450 = vmatpush.msra.mxu2 %v3634_v34  ;;  %404 = vmatpush.msra.mxu0 %v375_v36  ;;  %v376_v52 = vsel %vm372_vm1, %v3625_v31, %v3634_v34  ;;  %v873_v10 = vsel %vm870_vm4, %v3679_v5, %v3680_v3 }
  0x90   : > { %3564 = vmatpush.msra.mxu1 %v375_v36 }
  0x91   : > { %451 = vmatpush.msra.mxu2 %v3635_v35  ;;  %3847 = vrot.lane.b32.xlu0 %v4204_v26, %s4029_s25 }
  0x92   : > { %3354 = vmatmul.msk.f32.vlgmr.msra.gmra.mxu2 %vm383_vm0, %v3348_v37  ;;  %3852 = vrot.lane.b32.xlu1 %v4208_v27, %s4030_s7 }
  0x93   : > { %v3628_v40 = vpop.permute.xlu0 %3627  ;;  %3857 = vrot.lane.b32.xlu2 %v4204_v26, %s4030_s7 }
  0x94   : > { %v3630_v41 = vunpack.i.h.bf16 %v3628_v40  ;;  %v3629_v42 = vunpack.i.l.bf16 %v3628_v40  ;;  %v3638_v43 = vpop.permute.xlu1 %3637  ;;  %v4296_v32 = vpop.permute.xlu2 %3692 }
  0x95   : > { %v3640_v44 = vunpack.i.h.bf16 %v3638_v43  ;;  %v3639_v45 = vunpack.i.l.bf16 %v3638_v43  ;;  %v3694_v34 = vunpack.i.l.bf16 %v4296_v32 }
  0x96   : > { %v373_v49 = vsel %vm372_vm1, %v3629_v42, %v3630_v41  ;;  %v374_v55 = vsel %vm372_vm1, %v3630_v41, %v3635_v35 }
  0x97   : > { %405 = vmatpush.msra.mxu0 %v373_v49  ;;  %3565 = vmatpush.msra.mxu1 %v373_v49  ;;  %v553_v51 = vsel %vm549_vm2, %v3640_v44, %v3644_v39  ;;  %v552_v53 = vsel %vm549_vm2, %v3639_v45, %v3640_v44  ;;  %v874_v43 = vsel %vm870_vm4, %v3680_v3, %v3694_v34 }
  0x98   : > { %3350 = vmatmul.msk.f32.vlgmr.msra.gmra.mxu0 %vm383_vm0, %v3348_v37  ;;  %3351 = vmatmul.msk.f32.vlgmr.msra.gmra.mxu1 %vm383_vm0, %v4243_v48 }
  0x99   : > { %427 = vmatpush.msrb.mxu1 %v376_v52  ;;  %502 = vmatpush.msrb.mxu0 %v4105_v1 }
  0x9a   : > { %3355 = vmatmul.msk.f32.gmra.mxu2 %vm383_vm0, %v4243_v48  ;;  %603 = vmatpush.msrb.mxu3 %v553_v51 }
  0x9b   : > { %428 = vmatpush.msrb.mxu1 %v374_v55  ;;  %503 = vmatpush.msrb.mxu0 %v4117_v8  ;;  %v3653_v59 = vpop.permute.xlu0 %3652 }
  0x9c   : > { %580 = vmatpush.msrb.mxu2 %v552_v53  ;;  %604 = vmatpush.msrb.mxu3 %v551_v54  ;;  %v3655_v61 = vunpack.i.h.bf16 %v3653_v59  ;;  %v3654_v62 = vunpack.i.l.bf16 %v3653_v59  ;;  %v3658_v63 = vpop.permute.xlu1 %3657  ;;  %v3708_v45 = vpop.permute.xlu2 %3707  ;;  %v4364_v59 = vld [vmem:[%s5324_s3 + $0x50] sm:$0xff] }
  0x9d   : > { %626 = vmatpush.msra.mxu0 %v3644_v39  ;;  %3366 = vmatmul.msk.f32.vlgmr.msrb.gmra.mxu3 %vm383_vm0, %v4262_v56  ;;  %v3659_v1 = vunpack.i.l.bf16 %v3658_v63  ;;  %v3660_v6 = vunpack.i.h.bf16 %v3658_v63  ;;  %v3695_v39 = vunpack.i.h.bf16 %v4296_v32  ;;  %v3709_v52 = vunpack.i.l.bf16 %v3708_v45 }
  0x9e   : > { %581 = vmatpush.msrb.mxu2 %v550_v58  ;;  %525 = vmatpush.msra.mxu1 %v4110_v4  ;;  %v660_v7 = vsel %vm656_vm3, %v3654_v62, %v3655_v61  ;;  %v659_v8 = vsel %vm656_vm3, %v3664_v60, %v3654_v62 }
  0x9f   : > { %627 = vmatpush.msra.mxu0 %v3650_v46  ;;  %733 = vmatpush.msra.mxu3 %v3655_v61  ;;  %v658_v9 = vsel %vm656_vm3, %v3659_v1, %v3660_v6  ;;  %v657_v4 = vsel %vm656_vm3, %v3665_v0, %v3659_v1  ;;  %v3378_v61 = vld [vmem:[%s5324_s3 + $0x40] sm:$0xff]  ;;  %v4384_v1 = vld [vmem:[%s5324_s3 + $0x58] sm:$0xff] }
  0xa0   : > { %3352 = vmatmul.msk.f32.vlgmr.msrb.gmra.mxu1 %vm383_vm0, %v3348_v37  ;;  %3358 = vmatmul.msk.f32.vlgmr.msrb.gmra.mxu0 %vm383_vm0, %v4141_v13 }
  0xa1   : > { %526 = vmatpush.msra.mxu1 %v4107_v2  ;;  %710 = vmatpush.msra.mxu2 %v660_v7 }
  0xa2   : > { %3364 = vmatmul.msk.f32.vlgmr.msrb.gmra.mxu2 %vm383_vm0, %v4262_v56  ;;  %734 = vmatpush.msra.mxu3 %v3660_v6  ;;  %v3379_v6 = vld [vmem:[%s5324_s3 + $0x48] sm:$0xff] }
  0xa3   : > { %687 = vmatpush.msrb.mxu1 %v659_v8  ;;  %v3668_v12 = vpop.permute.xlu0 %3667  ;;  %711 = vmatpush.msra.mxu2 %v658_v9  ;;  %v4412_v8 = vld [vmem:[%s5324_s3 + $0x60] sm:$0xff] }
  0xa4   : > { %v3670_v19 = vunpack.i.h.bf16 %v3668_v12  ;;  %v3669_v2 = vunpack.i.l.bf16 %v3668_v12  ;;  %v3673_v25 = vpop.permute.xlu1 %3672  ;;  %901 = vmatpush.msrb.mxu3 %v873_v10  ;;  %v3723_v3 = vpop.permute.xlu2 %3722  ;;  %v4420_v12 = vld [vmem:[%s4401_s13 + $0x28] sm:$0xff] }
  0xa5   : > { %688 = vmatpush.msrb.mxu1 %v657_v4  ;;  %3367 = vmatmul.msk.f32.gmra.mxu3 %vm383_vm0, %v4289_v11  ;;  %v3675_v28 = vunpack.i.h.bf16 %v3673_v25  ;;  %v3674_v30 = vunpack.i.l.bf16 %v3673_v25  ;;  %v3724_v9 = vunpack.i.l.bf16 %v3723_v3 }
  0xa6   : > { %v766_v31 = vsel %vm763_vm5, %v3669_v2, %v3670_v19  ;;  %v3725_v2 = vunpack.i.h.bf16 %v3723_v3 }
  0xa7   : > { %794 = vmatpush.msrb.mxu0 %v766_v31  ;;  %v764_v33 = vsel %vm763_vm5, %v3674_v30, %v3675_v28 }
  0xa8   : > { %3353 = vmatmul.msk.f32.gmra.mxu1 %vm383_vm0, %v4243_v48  ;;  %3359 = vmatmul.msk.f32.gmra.mxu0 %vm383_vm0, %v4184_v21  ;;  %v3710_v48 = vunpack.i.h.bf16 %v3708_v45 }
  0xa9   : > { %795 = vmatpush.msrb.mxu0 %v764_v33 }
  0xaa   : > { %3365 = vmatmul.msk.f32.gmra.mxu2 %vm383_vm0, %v4289_v11  ;;  %v979_v58 = vsel %vm977_vm6, %v3709_v52, %v3710_v48 }
  0xab   : > { %v3683_v35 = vpop.permute.xlu0 %3682 }
  0xac   : > { %v3685_v36 = vunpack.i.h.bf16 %v3683_v35  ;;  %v3684_v37 = vunpack.i.l.bf16 %v3683_v35  ;;  %v3688_v38 = vpop.permute.xlu1 %3687  ;;  %v3738_v30 = vpop.permute.xlu2 %3737  ;;  %v4449_v35 = vld [vmem:[%s4401_s13 + $0x18] sm:$0xff] }
  0xad   : > { %3376 = vmatmul.msk.f32.vlgmr.msra.gmra.mxu3 %vm383_vm0, %v4312_v20  ;;  %v3690_v40 = vunpack.i.h.bf16 %v3688_v38  ;;  %v3689_v41 = vunpack.i.l.bf16 %v3688_v38  ;;  %v3739_v26 = vunpack.i.l.bf16 %v3738_v30  ;;  %v4459_v38 = vld [vmem:[%s4401_s13 + $0x8] sm:$0xff] }
  0xae   : > { %v767_v42 = vsel %vm763_vm5, %v3670_v19, %v3684_v37  ;;  %840 = vmatpush.msrb.mxu2 %v3684_v37  ;;  %v765_v24 = vsel %vm763_vm5, %v3675_v28, %v3685_v36 }
  0xaf   : > { %v871_v44 = vsel %vm870_vm4, %v3689_v41, %v3690_v40  ;;  %v872_v46 = vsel %vm870_vm4, %v3690_v40, %v3695_v39 }
  0xb0   : > { %3360 = vmatmul.msk.f32.vlgmr.msra.gmra.mxu1 %vm383_vm0, %v4141_v13  ;;  %3368 = vmatmul.msk.f32.vlgmr.msra.gmra.mxu0 %vm383_vm0, %v4262_v56 }
  0xb1   : > { %817 = vmatpush.msra.mxu1 %v767_v42  ;;  %924 = vmatpush.msra.mxu0 %v874_v43  ;;  %v3402_v43 = vld [vmem:[%s5324_s3 + $0x70] sm:$0xff] }
  0xb2   : > { %3374 = vmatmul.msk.f32.vlgmr.msra.gmra.mxu2 %vm383_vm0, %v4312_v20  ;;  %902 = vmatpush.msrb.mxu3 %v871_v44 }
  0xb3   : > { %818 = vmatpush.msra.mxu1 %v765_v24  ;;  %841 = vmatpush.msrb.mxu2 %v3685_v36  ;;  %v3698_v13 = vpop.permute.xlu0 %3697 }
  0xb4   : > { %925 = vmatpush.msra.mxu0 %v872_v46  ;;  %v3700_v49 = vunpack.i.h.bf16 %v3698_v13  ;;  %v3699_v50 = vunpack.i.l.bf16 %v3698_v13  ;;  %v3703_v51 = vpop.permute.xlu1 %3702  ;;  %v3753_v44 = vpop.permute.xlu2 %3752 }
  0xb5   : > { %3377 = vmatmul.msk.f32.gmra.mxu3 %vm383_vm0, %v4342_v47  ;;  %v3705_v53 = vunpack.i.h.bf16 %v3703_v51  ;;  %v3704_v54 = vunpack.i.l.bf16 %v3703_v51  ;;  %v3755_v45 = vunpack.i.h.bf16 %v3753_v44  ;;  %v3754_v46 = vunpack.i.l.bf16 %v3753_v44 }
  0xb6   : > { %v980_v55 = vsel %vm977_vm6, %v3699_v50, %v3700_v49 }
  0xb7   : > { %1008 = vmatpush.msra.mxu2 %v980_v55  ;;  %v981_v56 = vsel %vm977_vm6, %v3700_v49, %v3704_v54  ;;  %v978_v57 = vsel %vm977_vm6, %v3705_v53, %v3709_v52  ;;  %v1395_v51 = vsel %vm372_vm1, %v3754_v46, %v3755_v45  ;;  %v3403_v55 = vld [vmem:[%s5324_s3 + $0x78] sm:$0xff] }
  0xb8   : > { %3361 = vmatmul.msk.f32.gmra.mxu1 %vm383_vm0, %v4184_v21  ;;  %3369 = vmatmul.msk.f32.gmra.mxu0 %vm383_vm0, %v4289_v11  ;;  %v4417_v11 = vld [vmem:[%s4401_s13 + $0x20] sm:$0xff] }
  0xb9   : > { %1031 = vmatpush.msra.mxu3 %v981_v56  ;;  %1009 = vmatpush.msra.mxu2 %v978_v57  ;;  %v4424_v19 = vpack.i.bf16 %v4420_v12, %v4417_v11  ;;  %v4453_v36 = vpack.i.bf16 %v4417_v11, %v4449_v35 }
  0xba   : > { %3375 = vmatmul.msk.f32.gmra.mxu2 %vm383_vm0, %v4342_v47 }
  0xbb   : > { %1032 = vmatpush.msra.mxu3 %v979_v58  ;;  %v3713_v27 = vpop.permute.xlu0 %3712  ;;  %3862 = vrot.lane.b32.xlu0 %v4424_v19, %s4023_s8 }
  0xbc   : > { %v3715_v60 = vunpack.i.h.bf16 %v3713_v27  ;;  %v3718_v21 = vpop.permute.xlu1 %3717  ;;  %v3714_v62 = vunpack.i.l.bf16 %v3713_v27  ;;  %v3768_v58 = vpop.permute.xlu2 %3767 }
  0xbd   : > { %3388 = vmatmul.msk.f32.vlgmr.msrb.gmra.mxu3 %vm383_vm0, %v4364_v59  ;;  %v3720_v63 = vunpack.i.h.bf16 %v3718_v21  ;;  %v3719_v0 = vunpack.i.l.bf16 %v3718_v21 }
  0xbe   : > { %1161 = vmatpush.msrb.mxu3 %v3715_v60  ;;  %v1088_v29 = vsel %vm1084_vm7, %v3714_v62, %v3715_v60  ;;  %v1087_v31 = vsel %vm1084_vm7, %v3724_v9, %v3714_v62  ;;  %v3410_v60 = vld [vmem:[%s5324_s3 + $0x80] sm:$0xff] }
  0xbf   : > { %v1086_v5 = vsel %vm1084_vm7, %v3719_v0, %v3720_v63  ;;  %v1085_v33 = vsel %vm1084_vm7, %v3725_v2, %v3719_v0  ;;  %v4540_v0 = vld [vmem:[%s5324_s3 + $0x98] sm:$0xff] }
  0xc0   : > { %3372 = vmatmul.msk.f32.vlgmr.msrb.gmra.mxu1 %vm383_vm0, %v4312_v20  ;;  %3380 = vmatmul.msk.f32.vlgmr.msrb.gmra.mxu0 %vm383_vm0, %v3378_v61 }
  0xc1   : > { %947 = vmatpush.msrb.mxu1 %v3694_v34  ;;  %1054 = vmatpush.msrb.mxu0 %v3704_v54  ;;  %v3740_v34 = vunpack.i.h.bf16 %v3738_v30 }
  0xc2   : > { %3384 = vmatmul.msk.f32.vlgmr.msrb.gmra.mxu2 %vm383_vm0, %v3378_v61  ;;  %1162 = vmatpush.msrb.mxu3 %v3720_v63 }
  0xc3   : > { %948 = vmatpush.msrb.mxu1 %v3695_v39  ;;  %1055 = vmatpush.msrb.mxu0 %v3710_v48  ;;  %v4396_v7 = vpop.permute.xlu0 %3727  ;;  %v4462_v39 = vld [vmem:[%s4401_s13 + $0x10] sm:$0xff]  ;;  %v4486_v48 = vld [vmem:[%s4401_s13] sm:$0xff] }
  0xc4   : > { %1138 = vmatpush.msrb.mxu2 %v1088_v29  ;;  %v4406_v18 = vpop.permute.xlu1 %3732  ;;  %v3730_v4 = vunpack.i.h.bf16 %v4396_v7  ;;  %v3729_v10 = vunpack.i.l.bf16 %v4396_v7  ;;  %3877 = vrot.lane.b32.xlu0 %v4453_v36, %s4024_s9  ;;  %v4466_v40 = vpack.i.bf16 %v4462_v39, %v4459_v38  ;;  %v4479_v24 = vpack.i.bf16 %v4462_v39, %v4420_v12 }
  0xc5   : > { %3389 = vmatmul.msk.f32.gmra.mxu3 %vm383_vm0, %v4384_v1  ;;  %v3735_v25 = vunpack.i.h.bf16 %v4406_v18  ;;  %v3734_v28 = vunpack.i.l.bf16 %v4406_v18  ;;  %v4497_v53 = vpack.i.bf16 %v4459_v38, %v4486_v48  ;;  %v4521_v27 = vpack.i.bf16 %v4486_v48, %v4449_v35  ;;  %v3426_v18 = vld [vmem:[%s5324_s3 + $0xa0] sm:$0xff] }
  0xc6   : > { %1139 = vmatpush.msrb.mxu2 %v1086_v5  ;;  %v1194_v32 = vsel %vm1191_vm8, %v3729_v10, %v3730_v4  ;;  %3867 = vrot.lane.b32.xlu1 %v4466_v40, %s4023_s8  ;;  %v1195_v49 = vsel %vm1191_vm8, %v3730_v4, %v3739_v26  ;;  %v4552_v5 = vpack.i.bf16 %v4486_v48, %v4420_v12  ;;  %v3770_v10 = vunpack.i.h.bf16 %v3768_v58 }
  0xc7   : > { %v1192_v20 = vsel %vm1191_vm8, %v3734_v28, %v3735_v25  ;;  %v1193_v52 = vsel %vm1191_vm8, %v3735_v25, %v3740_v34  ;;  %3872 = vrot.lane.b32.xlu2 %v4521_v27, %s4023_s8 }
  0xc8   : > { %3373 = vmatmul.msk.f32.gmra.mxu1 %vm383_vm0, %v4342_v47  ;;  %3381 = vmatmul.msk.f32.gmra.mxu0 %vm383_vm0, %v3379_v6 }
  0xca   : > { %3385 = vmatmul.msk.f32.gmra.mxu2 %vm383_vm0, %v3379_v6 }
  0xcb   : > { %v3743_v37 = vpop.permute.xlu0 %3742 }
  0xcc   : > { %v3745_v41 = vunpack.i.h.bf16 %v3743_v37  ;;  %v3744_v13 = vunpack.i.l.bf16 %v3743_v37  ;;  %3892 = vrot.lane.b32.xlu0 %v4479_v24, %s4024_s9 }
  0xcd   : > { %3398 = vmatmul.msk.f32.vlgmr.msra.gmra.mxu3 %vm383_vm0, %v4412_v8 }
  0xce   : > { %1312 = vmatpush.msra.mxu3 %v4158_v14  ;;  %v3395_v14 = vld [vmem:[%s5324_s3 + $0x68] sm:$0xff]  ;;  %v1396_v54 = vsel %vm372_vm1, %v3744_v13, %v3745_v41  ;;  %3882 = vrot.lane.b32.xlu1 %v4497_v53, %s4024_s9 }
  0xcf   : > { %3887 = vrot.lane.b32.xlu2 %v4453_v36, %s4025_s10 }
  0xd0   : > { %3382 = vmatmul.msk.f32.vlgmr.msra.gmra.mxu1 %vm383_vm0, %v3378_v61  ;;  %3390 = vmatmul.msk.f32.vlgmr.msra.gmra.mxu0 %vm383_vm0, %v4364_v59 }
  0xd1   : > { %1115 = vmatpush.msra.mxu1 %v1087_v31  ;;  %1222 = vmatpush.msra.mxu0 %v1194_v32 }
  0xd2   : > { %3396 = vmatmul.msk.f32.vlgmr.msra.gmra.mxu2 %vm383_vm0, %v4412_v8  ;;  %1313 = vmatpush.msra.mxu3 %v4162_v16  ;;  %v3748_v16 = vpop.permute.xlu1 %3747 }
  0xd3   : > { %1116 = vmatpush.msra.mxu1 %v1085_v33  ;;  %1223 = vmatpush.msra.mxu0 %v1192_v20  ;;  %v3749_v42 = vunpack.i.l.bf16 %v3748_v16  ;;  %v3750_v50 = vunpack.i.h.bf16 %v3748_v16 }
  0xd4   : > { %1268 = vmatpush.msra.mxu2 %v3739_v26  ;;  %3907 = vrot.lane.b32.xlu0 %v4453_v36, %s4026_s11 }
  0xd5   : > { %3399 = vmatmul.msk.f32.gmra.mxu3 %vm383_vm0, %v3395_v14  ;;  %v1397_v47 = vsel %vm372_vm1, %v3745_v41, %v3749_v42  ;;  %v1394_v56 = vsel %vm372_vm1, %v3750_v50, %v3754_v46 }
  0xd6   : > { %1269 = vmatpush.msra.mxu2 %v3740_v34  ;;  %3897 = vrot.lane.b32.xlu1 %v4497_v53, %s4025_s10 }
  0xd7   : > { %3902 = vrot.lane.b32.xlu2 %v4479_v24, %s4025_s10  ;;  %s3570_s10 = smul.u32 6, %s5344_s18 }
  0xd8   : > { %3383 = vmatmul.msk.f32.gmra.mxu1 %vm383_vm0, %v3379_v6  ;;  %3391 = vmatmul.msk.f32.gmra.mxu0 %vm383_vm0, %v4384_v1  ;;  %v3411_v6 = vld [vmem:[%s5324_s3 + $0x88] sm:$0xff] }
  0xda   : > { %3397 = vmatmul.msk.f32.gmra.mxu2 %vm383_vm0, %v3395_v14 }
  0xdc   : > { %3922 = vrot.lane.b32.xlu0 %v4424_v19, %s4027_s12  ;;  %v3427_v19 = vld [vmem:[%s5324_s3 + $0xa8] sm:$0xff] }
  0xdd   : > { %3408 = vmatmul.msk.f32.vlgmr.msrb.gmra.mxu3 %vm383_vm0, %v3402_v43 }
  0xde   : > { %1447 = vmatpush.msrb.mxu3 %v1397_v47  ;;  %3912 = vrot.lane.b32.xlu1 %v4552_v5, %s4026_s11  ;;  %v3434_v47 = vld [vmem:[%s5324_s3 + $0xb0] sm:$0xff] }
  0xdf   : > { %3917 = vrot.lane.b32.xlu2 %v4466_v40, %s4026_s11 }
  0xe0   : > { %3392 = vmatmul.msk.f32.vlgmr.msrb.gmra.mxu1 %vm383_vm0, %v4364_v59  ;;  %3400 = vmatmul.msk.f32.vlgmr.msrb.gmra.mxu0 %vm383_vm0, %v4412_v8  ;;  %v3763_v59 = vpop.permute.xlu1 %3762  ;;  %v3769_v8 = vunpack.i.l.bf16 %v3768_v58 }
  0xe1   : > { %1245 = vmatpush.msrb.mxu1 %v1195_v49  ;;  %1335 = vmatpush.msrb.mxu0 %v4160_v15  ;;  %v3758_v15 = vpop.permute.xlu0 %3757  ;;  %v3765_v61 = vunpack.i.h.bf16 %v3763_v59  ;;  %v3764_v62 = vunpack.i.l.bf16 %v3763_v59 }
  0xe2   : > { %3406 = vmatmul.msk.f32.vlgmr.msrb.gmra.mxu2 %vm383_vm0, %v3402_v43  ;;  %1448 = vmatpush.msrb.mxu3 %v1395_v51  ;;  %v3760_v57 = vunpack.i.h.bf16 %v3758_v15  ;;  %v3759_v21 = vunpack.i.l.bf16 %v3758_v15 }
  0xe3   : > { %1246 = vmatpush.msrb.mxu1 %v1193_v52  ;;  %1336 = vmatpush.msrb.mxu0 %v4188_v22  ;;  %v4517_v22 = vld [vmem:[%s5324_s3 + $0x90] sm:$0xff]  ;;  %v1500_v37 = vsel %vm549_vm2, %v3770_v10, %v3764_v62 }
  0xe4   : > { %1424 = vmatpush.msrb.mxu2 %v1396_v54  ;;  %v1503_v63 = vsel %vm549_vm2, %v3759_v21, %v3760_v57  ;;  %v1502_v33 = vsel %vm549_vm2, %v3769_v8, %v3759_v21  ;;  %3937 = vrot.lane.b32.xlu0 %v4453_v36, %s4028_s16 }
  0xe5   : > { %3409 = vmatmul.msk.f32.gmra.mxu3 %vm383_vm0, %v3403_v55 }
  0xe6   : > { %1425 = vmatpush.msrb.mxu2 %v1394_v56  ;;  %3927 = vrot.lane.b32.xlu1 %v4466_v40, %s4027_s12  ;;  %v4624_v56 = vpop.f32.mrf.mxu3 }
  0xe7   : > { %3932 = vrot.lane.b32.xlu2 %v4521_v27, %s4027_s12 }
  0xe8   : > { %3393 = vmatmul.msk.f32.gmra.mxu1 %vm383_vm0, %v4384_v1  ;;  %3401 = vmatmul.msk.f32.gmra.mxu0 %vm383_vm0, %v3395_v14  ;;  %v1501_v1 = vsel %vm549_vm2, %v3764_v62, %v3765_v61  ;;  %v4546_v3 = vpop.permute.xlu1 %3777 }
  0xe9   : > { %v4542_v29 = vpop.permute.xlu0 %3772  ;;  %v3780_v28 = vunpack.i.h.bf16 %v4546_v3  ;;  %v3779_v30 = vunpack.i.l.bf16 %v4546_v3 }
  0xea   : > { %3407 = vmatmul.msk.f32.gmra.mxu2 %vm383_vm0, %v3403_v55  ;;  %v3775_v9 = vunpack.i.h.bf16 %v4542_v29  ;;  %v3774_v4 = vunpack.i.l.bf16 %v4542_v29 }
  0xeb   : > { %v1606_v41 = vsel %vm656_vm3, %v3779_v30, %v3780_v28 }
  0xec   : > { %v1608_v20 = vsel %vm656_vm3, %v3774_v4, %v3775_v9  ;;  %3952 = vrot.lane.b32.xlu0 %v4479_v24, %s4028_s16 }
  0xed   : > { %3420 = vmatmul.msk.f32.vlgmr.msra.gmra.mxu3 %vm383_vm0, %v4517_v22 }
  0xee   : > { %1576 = vmatpush.msra.mxu3 %v3760_v57  ;;  %3942 = vrot.lane.b32.xlu1 %v4497_v53, %s4028_s16  ;;  %v485_v3 = vpop.f32.mrf.mxu3 }
  0xef   : > { %3947 = vrot.lane.b32.xlu2 %v4453_v36, %s4029_s25 }
  0xf0   : > { %3404 = vmatmul.msk.f32.vlgmr.msra.gmra.mxu1 %vm383_vm0, %v3402_v43  ;;  %3412 = vmatmul.msk.f32.vlgmr.msra.gmra.mxu0 %vm383_vm0, %v3410_v60  ;;  %v3793_v2 = vpop.permute.xlu1 %3792 }
  0xf1   : > { %1470 = vmatpush.msra.mxu0 %v3749_v42  ;;  %1358 = vmatpush.msra.mxu1 %v4164_v17  ;;  %v4548_v17 = vpop.permute.xlu2 %3782  ;;  %v3795_v31 = vunpack.i.h.bf16 %v3793_v2  ;;  %v3794_v32 = vunpack.i.l.bf16 %v3793_v2  ;;  %v3788_v26 = vpop.permute.xlu0 %3787 }
  0xf2   : > { %3416 = vmatmul.msk.f32.vlgmr.msra.gmra.mxu2 %vm383_vm0, %v3410_v60  ;;  %1577 = vmatpush.msra.mxu3 %v3765_v61  ;;  %v3784_v7 = vunpack.i.l.bf16 %v4548_v17  ;;  %v3789_v34 = vunpack.i.l.bf16 %v3788_v26  ;;  %v3790_v42 = vunpack.i.h.bf16 %v3788_v26 }
  0xf3   : > { %1471 = vmatpush.msra.mxu0 %v3755_v45  ;;  %1359 = vmatpush.msra.mxu1 %v4190_v23  ;;  %v3785_v23 = vunpack.i.h.bf16 %v4548_v17  ;;  %v1712_v14 = vsel %vm763_vm5, %v3794_v32, %v3795_v31 }
  0xf4   : > { %1553 = vmatpush.msra.mxu2 %v1503_v63  ;;  %v1609_v15 = vsel %vm656_vm3, %v3775_v9, %v3789_v34  ;;  %v1607_v59 = vsel %vm656_vm3, %v3780_v28, %v3790_v42  ;;  %v4681_v9 = vld [vmem:[%s5324_s3 + $0xc0] sm:$0xff]  ;;  %3967 = vrot.lane.b32.xlu0 %v4453_v36, %s4030_s7 }
  0xf5   : > { %3421 = vmatmul.msk.f32.gmra.mxu3 %vm383_vm0, %v4540_v0  ;;  %v1714_v25 = vsel %vm763_vm5, %v3784_v7, %v3785_v23  ;;  %v4745_v36 = vld [vmem:[%s5324_s3 + $0xe0] sm:$0xff] }
  0xf6   : > { %1554 = vmatpush.msra.mxu2 %v1501_v1  ;;  %3957 = vrot.lane.b32.xlu1 %v4497_v53, %s4029_s25  ;;  %v4705_v53 = vld [vmem:[%s5324_s3 + $0xd8] sm:$0xff] }
  0xf7   : > { %3962 = vrot.lane.b32.xlu2 %v4479_v24, %s4029_s25  ;;  %s3571_s25 = smul.u32 96, %s5338_s19 }
  0xf8   : > { %3405 = vmatmul.msk.f32.gmra.mxu1 %vm383_vm0, %v3403_v55  ;;  %3413 = vmatmul.msk.f32.gmra.mxu0 %vm383_vm0, %v3411_v6  ;;  %v4600_v44 = vpop.permute.xlu1 %3807 }
  0xf9   : > { %v4592_v16 = vpop.permute.xlu2 %3797  ;;  %v3803_v43 = vpop.permute.xlu0 %3802  ;;  %v3809_v46 = vunpack.i.l.bf16 %v4600_v44  ;;  %v3810_v58 = vunpack.i.h.bf16 %v4600_v44  ;;  %s340_s29 = sadd.s32 %s3571_s25, %s3570_s10 }
  0xfa   : > { %3417 = vmatmul.msk.f32.gmra.mxu2 %vm383_vm0, %v3411_v6  ;;  %v3805_v45 = vunpack.i.h.bf16 %v3803_v43  ;;  %v3799_v13 = vunpack.i.l.bf16 %v4592_v16  ;;  %v3800_v51 = vunpack.i.h.bf16 %v4592_v16  ;;  %v3804_v52 = vunpack.i.l.bf16 %v3803_v43  ;;  %s3347_s19 = sshll.u32 %s340_s29, 3 }
  0xfb   : > { %s5292_s6 = scalar_lea.vmem %s5326_s5, %s3347_s19 }
  0xfc   : > { %v1821_v50 = vsel %vm870_vm4, %v3805_v45, %v3809_v46  ;;  %v1715_v57 = vsel %vm763_vm5, %v3785_v23, %v3799_v13  ;;  %v1820_v21 = vsel %vm870_vm4, %v3804_v52, %v3805_v45  ;;  %v4667_v23 = vld [vmem:[%s5324_s3 + $0xd0] sm:$0xff] }
  0xfd   : > { %3430 = vmatmul.msk.f32.vlgmr.msrb.gmra.mxu3 %vm383_vm0, %v3426_v18 }
  0xfe   : > { %1742 = vmatpush.msrb.mxu3 %v1714_v25  ;;  %3972 = vrot.lane.b32.xlu1 %v4552_v5, %s4030_s7 }
  0xff   : > { %3977 = vrot.lane.b32.xlu2 %v4466_v40, %s4030_s7 }
 0x100   : > { %3414 = vmatmul.msk.f32.vlgmr.msrb.gmra.mxu1 %vm383_vm0, %v3410_v60  ;;  %3422 = vmatmul.msk.f32.vlgmr.msrb.gmra.mxu0 %vm383_vm0, %v4517_v22  ;;  %v1713_v60 = vsel %vm763_vm5, %v3795_v31, %v3800_v51 }
 0x101   : > { %1530 = vmatpush.msrb.mxu1 %v1502_v33  ;;  %1636 = vmatpush.msrb.mxu0 %v1608_v20  ;;  %v4615_v49 = vpop.permute.xlu2 %3812  ;;  %v4659_v17 = vpop.permute.xlu0 %3817 }
 0x102   : > { %3428 = vmatmul.msk.f32.vlgmr.msrb.gmra.mxu2 %vm383_vm0, %v3426_v18  ;;  %1743 = vmatpush.msrb.mxu3 %v1712_v14  ;;  %v3815_v54 = vunpack.i.h.bf16 %v4615_v49  ;;  %v3814_v55 = vunpack.i.l.bf16 %v4615_v49  ;;  %v3820_v7 = vunpack.i.h.bf16 %v4659_v17  ;;  %v3819_v4 = vunpack.i.l.bf16 %v4659_v17  ;;  %v4723_v14 = vld [vmem:[%s5324_s3 + $0xc8] sm:$0xff] }
 0x103   : > { %1531 = vmatpush.msrb.mxu1 %v1500_v37  ;;  %1637 = vmatpush.msrb.mxu0 %v1606_v41 }
 0x104   : > { %1682 = vmatpush.msrb.mxu2 %v3789_v34  ;;  %v1819_v61 = vsel %vm870_vm4, %v3814_v55, %v3815_v54  ;;  %v1818_v62 = vsel %vm870_vm4, %v3810_v58, %v3814_v55  ;;  %v1927_v27 = vsel %vm977_vm6, %v3819_v4, %v3820_v7 }
 0x105   : > { %3431 = vmatmul.msk.f32.gmra.mxu3 %vm383_vm0, %v3427_v19 }
 0x106   : > { %1683 = vmatpush.msrb.mxu2 %v3790_v42 }
 0x108   : > { %3415 = vmatmul.msk.f32.gmra.mxu1 %vm383_vm0, %v3411_v6  ;;  %3423 = vmatmul.msk.f32.gmra.mxu0 %vm383_vm0, %v4540_v0  ;;  %v4661_v6 = vpop.permute.xlu1 %3822 }
 0x109   : > { %v3825_v2 = vunpack.i.h.bf16 %v4661_v6  ;;  %v3824_v25 = vunpack.i.l.bf16 %v4661_v6  ;;  %v4707_v31 = vpop.permute.xlu0 %3832 }
 0x10a   : > { %3429 = vmatmul.msk.f32.gmra.mxu2 %vm383_vm0, %v3427_v19  ;;  %v3835_v5 = vunpack.i.h.bf16 %v4707_v31  ;;  %v3834_v43 = vunpack.i.l.bf16 %v4707_v31 }
 0x10b   : > { %v1925_v32 = vsel %vm977_vm6, %v3824_v25, %v3825_v2 }
 0x10c   : > { %v2032_v58 = vsel %vm1084_vm7, %v3834_v43, %v3835_v5 }
 0x10d   : > { %3440 = vmatmul.msk.f32.vlgmr.msra.gmra.mxu3 %vm383_vm0, %v3434_v47 }
 0x10e   : > { %1871 = vmatpush.msra.mxu3 %v1821_v50 }
 0x110   : > { %3424 = vmatmul.msk.f32.vlgmr.msra.gmra.mxu1 %vm383_vm0, %v4517_v22  ;;  %3432 = vmatmul.msk.f32.vlgmr.msra.gmra.mxu0 %vm383_vm0, %v3426_v18  ;;  %v3435_v22 = vld [vmem:[%s5324_s3 + $0xb8] sm:$0xff]  ;;  %v4670_v18 = vpop.permute.xlu2 %3827  ;;  %v4698_v30 = vpop.permute.xlu1 %3837 }
 0x111   : > { %1659 = vmatpush.msra.mxu1 %v1609_v15  ;;  %1765 = vmatpush.msra.mxu0 %v1715_v57  ;;  %v3829_v42 = vunpack.i.l.bf16 %v4670_v18  ;;  %v4756_v49 = vpop.permute.xlu0 %3847  ;;  %v3840_v50 = vunpack.i.h.bf16 %v4698_v30 }
 0x112   : > { %3438 = vmatmul.msk.f32.vlgmr.msra.gmra.mxu2 %vm383_vm0, %v3434_v47  ;;  %1872 = vmatpush.msra.mxu3 %v1819_v61 }
 0x113   : > { %1660 = vmatpush.msra.mxu1 %v1607_v59  ;;  %1766 = vmatpush.msra.mxu0 %v1713_v60  ;;  %v1926_v57 = vsel %vm977_vm6, %v3829_v42, %v3819_v4 }
 0x114   : > { %1848 = vmatpush.msra.mxu2 %v1820_v21 }
 0x115   : > { %v4647_v63 = vpop.f32.mrf.mxu2  ;;  %v4649_v29 = vpop.f32.mrf.mxu0  ;;  %3441 = vmatmul.msk.f32.gmra.mxu3 %vm383_vm0, %v3435_v22 }
 0x116   : > { %v410_v1 = vpop.f32.mrf.mxu1  ;;  %1849 = vmatpush.msra.mxu2 %v1818_v62 }
 0x117   : > { %v486_v44 = vadd.f32 %v485_v3, %v410_v1  ;;  %v4789_v1 = vld [vmem:[%s5324_s3 + $0xe8] sm:$0xff]  ;;  %v3850_v3 = vunpack.i.h.bf16 %v4756_v49 }
 0x118   : > { %3425 = vmatmul.msk.f32.gmra.mxu1 %vm383_vm0, %v4540_v0  ;;  %3433 = vmatmul.msk.f32.gmra.mxu0 %vm383_vm0, %v3427_v19  ;;  %v4712_v26 = vpop.permute.xlu2 %3842  ;;  %v4738_v19 = vpop.permute.xlu1 %3852 }
 0x119   : > { %v3845_v37 = vunpack.i.h.bf16 %v4712_v26  ;;  %v3844_v16 = vunpack.i.l.bf16 %v4712_v26  ;;  %v3855_v45 = vunpack.i.h.bf16 %v4738_v19  ;;  %v2031_v31 = vsel %vm1084_vm7, %v3840_v50, %v3850_v3 }
 0x11a   : > { %3439 = vmatmul.msk.f32.gmra.mxu2 %vm383_vm0, %v3435_v22 }
 0x11d   : > { %v4672_v8 = vpop.f32.mrf.mxu2  ;;  %v4674_v0 = vpop.f32.mrf.mxu0  ;;  %3452 = vmatmul.msk.f32.vlgmr.msrb.gmra.mxu3 %vm383_vm0, %v4667_v23 }
 0x11e   : > { %v430_v10 = vpop.f32.mrf.mxu1  ;;  %2000 = vmatpush.msrb.mxu3 %v3820_v7 }
 0x11f   : > { %v506_v21 = vadd.f32 %v4674_v0, %v430_v10 }
 0x120   : > { %v4690_v28 = vpop.f32.mrf.mxu3  ;;  %3436 = vmatmul.msk.f32.vlgmr.msrb.gmra.mxu1 %vm383_vm0, %v3434_v47  ;;  %3444 = vmatmul.msk.f32.vlgmr.msrb.gmra.mxu0 %vm383_vm0, %v4681_v9  ;;  %v2138_v47 = vsel %vm1191_vm8, %v3844_v16, %v3845_v37  ;;  %v4798_v10 = vpop.permute.xlu2 %3857 }
 0x121   : > { %1788 = vmatpush.msrb.mxu1 %v3799_v13  ;;  %1894 = vmatpush.msrb.mxu0 %v3809_v46  ;;  %v3854_v46 = vunpack.i.l.bf16 %v4738_v19  ;;  %v3830_v13 = vunpack.i.h.bf16 %v4670_v18  ;;  %v636_v6 = vadd.f32 %v4690_v28, %v506_v21 }
 0x122   : > { %3448 = vmatmul.msk.f32.vlgmr.msrb.gmra.mxu2 %vm383_vm0, %v4681_v9  ;;  %2001 = vmatpush.msrb.mxu3 %v3825_v2 }
 0x123   : > { %1789 = vmatpush.msrb.mxu1 %v3800_v51  ;;  %1895 = vmatpush.msrb.mxu0 %v3815_v54  ;;  %v3839_v51 = vunpack.i.l.bf16 %v4698_v30  ;;  %v2136_v60 = vsel %vm1191_vm8, %v3854_v46, %v3855_v45  ;;  %v1924_v62 = vsel %vm977_vm6, %v3830_v13, %v3824_v25 }
 0x124   : > { %1977 = vmatpush.msrb.mxu2 %v1927_v27  ;;  %v3466_v27 = vld [vmem:[%s5324_s3 + $0xf0] sm:$0xff] }
 0x125   : > { %v4714_v33 = vpop.f32.mrf.mxu2  ;;  %v4716_v20 = vpop.f32.mrf.mxu0  ;;  %3453 = vmatmul.msk.f32.gmra.mxu3 %vm383_vm0, %v4705_v53  ;;  %v2030_v24 = vsel %vm1084_vm7, %v3839_v51, %v3840_v50 }
 0x126   : > { %v433_v34 = vpop.f32.mrf.mxu1  ;;  %1978 = vmatpush.msrb.mxu2 %v1925_v32  ;;  %v483_v32 = vadd.f32 %v4624_v56, %v4649_v29 }
 0x127   : > { %v509_v2 = vadd.f32 %v4716_v20, %v433_v34  ;;  %v3860_v34 = vunpack.i.h.bf16 %v4798_v10 }
 0x128   : > { %v4733_v41 = vpop.f32.mrf.mxu3  ;;  %3437 = vmatmul.msk.f32.gmra.mxu1 %vm383_vm0, %v3435_v22  ;;  %3445 = vmatmul.msk.f32.gmra.mxu0 %vm383_vm0, %v4723_v14  ;;  %v3849_v22 = vunpack.i.l.bf16 %v4756_v49  ;;  %v635_v16 = vadd.f32 %v4714_v33, %v483_v32  ;;  %v4870_v13 = vpop.permute.xlu2 %3872 }
 0x129   : > { %v2137_v26 = vsel %vm1191_vm8, %v3855_v45, %v3860_v34  ;;  %v4867_v45 = vld [vmem:[%s5324_s3 + $0x110] sm:$0xff] }
 0x12a   : > { %3449 = vmatmul.msk.f32.gmra.mxu2 %vm383_vm0, %v4723_v14 }
 0x12d   : > { %v586_v52 = vpop.f32.mrf.mxu2  ;;  %3462 = vmatmul.msk.f32.vlgmr.msra.gmra.mxu3 %vm383_vm0, %v4745_v36  ;;  %v629_v54 = vpop.f32.mrf.mxu0 }
 0x12e   : > { %v4762_v55 = vadd.f32 %v586_v52, %v486_v44  ;;  %v528_v15 = vpop.f32.mrf.mxu1  ;;  %2166 = vmatpush.msra.mxu3 %v2138_v47  ;;  %v2033_v47 = vsel %vm1084_vm7, %v3835_v5, %v3849_v22  ;;  %v4856_v5 = vpop.permute.xlu0 %3862  ;;  %v4879_v52 = vld [vmem:[%s5324_s3 + $0x100] sm:$0xff] }
 0x12f   : > { %v529_v59 = vadd.f32 %v528_v15, %v4647_v63 }
 0x130   : > { %3446 = vmatmul.msk.f32.vlgmr.msra.gmra.mxu1 %vm383_vm0, %v4681_v9  ;;  %v736_v61 = vpop.f32.mrf.mxu3  ;;  %3454 = vmatmul.msk.f32.vlgmr.msra.gmra.mxu0 %vm383_vm0, %v4667_v23 }
 0x131   : > { %v637_v63 = vadd.f32 %v629_v54, %v529_v59  ;;  %1954 = vmatpush.msra.mxu1 %v1926_v57  ;;  %2060 = vmatpush.msra.mxu0 %v2032_v58  ;;  %v3864_v54 = vunpack.i.l.bf16 %v4856_v5 }
 0x132   : > { %3460 = vmatmul.msk.f32.vlgmr.msra.gmra.mxu2 %vm383_vm0, %v4745_v36  ;;  %2167 = vmatpush.msra.mxu3 %v2136_v60 }
 0x133   : > { %v744_v17 = vadd.f32 %v736_v61, %v637_v63  ;;  %1955 = vmatpush.msra.mxu1 %v1924_v62  ;;  %2061 = vmatpush.msra.mxu0 %v2030_v24  ;;  %v4909_v63 = vpop.permute.xlu2 %3887 }
 0x134   : > { %2106 = vmatpush.msra.mxu2 %v3849_v22  ;;  %v4899_v22 = vld [vmem:[%s5324_s3 + $0x118] sm:$0xff] }
 0x135   : > { %v713_v7 = vpop.f32.mrf.mxu2  ;;  %3463 = vmatmul.msk.f32.gmra.mxu3 %vm383_vm0, %v4789_v1  ;;  %v632_v18 = vpop.f32.mrf.mxu0 }
 0x136   : > { %v4795_v0 = vadd.f32 %v713_v7, %v636_v6  ;;  %v531_v9 = vpop.f32.mrf.mxu1  ;;  %2107 = vmatpush.msra.mxu2 %v3850_v3  ;;  %v4901_v62 = vpop.permute.xlu0 %3877 }
 0x137   : > { %v532_v4 = vadd.f32 %v531_v9, %v4672_v8  ;;  %v3859_v8 = vunpack.i.l.bf16 %v4798_v10  ;;  %v3889_v9 = vunpack.i.l.bf16 %v4909_v63 }
 0x138   : > { %3447 = vmatmul.msk.f32.gmra.mxu1 %vm383_vm0, %v4723_v14  ;;  %v739_v25 = vpop.f32.mrf.mxu3  ;;  %3455 = vmatmul.msk.f32.gmra.mxu0 %vm383_vm0, %v4705_v53  ;;  %v639_v14 = vadd.f32 %v4733_v41, %v509_v2  ;;  %v4872_v50 = vpop.permute.xlu1 %3867  ;;  %v4930_v2 = vld [vmem:[%s5324_s3 + $0x120] sm:$0xff] }
 0x139   : > { %v640_v28 = vadd.f32 %v632_v18, %v532_v4  ;;  %v2139_v56 = vsel %vm1191_vm8, %v3845_v37, %v3859_v8  ;;  %v3870_v57 = vunpack.i.h.bf16 %v4872_v50  ;;  %v3869_v59 = vunpack.i.l.bf16 %v4872_v50 }
 0x13a   : > { %3461 = vmatmul.msk.f32.gmra.mxu2 %vm383_vm0, %v4789_v1 }
 0x13b   : > { %v747_v20 = vadd.f32 %v739_v25, %v640_v28  ;;  %v3874_v25 = vunpack.i.l.bf16 %v4870_v13  ;;  %v3880_v28 = vunpack.i.h.bf16 %v4901_v62 }
 0x13d   : > { %v716_v42 = vpop.f32.mrf.mxu2  ;;  %3472 = vmatmul.msk.f32.vlgmr.msrb.gmra.mxu3 %vm383_vm0, %v3466_v27  ;;  %v797_v43 = vpop.f32.mrf.mxu0 }
 0x13e   : > { %v4817_v44 = vadd.f32 %v716_v42, %v639_v14  ;;  %v690_v46 = vpop.f32.mrf.mxu1  ;;  %2279 = vmatpush.msrb.mxu3 %v4417_v11  ;;  %v4844_v11 = vld [vmem:[%s5324_s3 + $0xf8] sm:$0xff]  ;;  %v4939_v14 = vpop.permute.xlu0 %3892 }
 0x13f   : > { %v742_v29 = vadd.f32 %v690_v46, %v635_v16 }
 0x140   : > { %3456 = vmatmul.msk.f32.vlgmr.msrb.gmra.mxu1 %vm383_vm0, %v4667_v23  ;;  %v904_v33 = vpop.f32.mrf.mxu3  ;;  %3464 = vmatmul.msk.f32.vlgmr.msrb.gmra.mxu0 %vm383_vm0, %v4745_v36  ;;  %v4918_v18 = vpop.permute.xlu1 %3882 }
 0x141   : > { %v849_v37 = vadd.f32 %v797_v43, %v742_v29  ;;  %2083 = vmatpush.msrb.mxu1 %v2033_v47  ;;  %2189 = vmatpush.msrb.mxu0 %v2139_v56  ;;  %v3884_v16 = vunpack.i.l.bf16 %v4918_v18  ;;  %v2340_v47 = vsel %vm372_vm1, %v3874_v25, %v3864_v54 }
 0x142   : > { %3470 = vmatmul.msk.f32.vlgmr.msrb.gmra.mxu2 %vm383_vm0, %v3466_v27  ;;  %2280 = vmatpush.msrb.mxu3 %v4459_v38 }
 0x143   : > { %v956_v23 = vadd.f32 %v904_v33, %v849_v37  ;;  %2084 = vmatpush.msrb.mxu1 %v2031_v31  ;;  %2190 = vmatpush.msrb.mxu0 %v2137_v26 }
 0x144   : > { %2256 = vmatpush.msrb.mxu2 %v4449_v35 }
 0x145   : > { %v843_v30 = vpop.f32.mrf.mxu2  ;;  %3473 = vmatmul.msk.f32.gmra.mxu3 %vm383_vm0, %v4844_v11  ;;  %v800_v41 = vpop.f32.mrf.mxu0 }
 0x146   : > { %v4852_v19 = vadd.f32 %v843_v30, %v744_v17  ;;  %v693_v36 = vpop.f32.mrf.mxu1  ;;  %2257 = vmatpush.msrb.mxu2 %v4486_v48  ;;  %v3865_v48 = vunpack.i.h.bf16 %v4856_v5  ;;  %v3475_v17 = vld [vmem:[%s5324_s3 + $0x108] sm:$0xff] }
 0x147   : > { %v745_v38 = vadd.f32 %v693_v36, %v4762_v55  ;;  %v4971_v36 = vld [vmem:[%s5324_s3 + $0x128] sm:$0xff] }
 0x148   : > { %3457 = vmatmul.msk.f32.gmra.mxu1 %vm383_vm0, %v4705_v53  ;;  %v907_v35 = vpop.f32.mrf.mxu3  ;;  %3465 = vmatmul.msk.f32.gmra.mxu0 %vm383_vm0, %v4789_v1  ;;  %v2341_v61 = vsel %vm372_vm1, %v3864_v54, %v3865_v48  ;;  %v4951_v29 = vpop.permute.xlu1 %3897 }
 0x149   : > { %v852_v40 = vadd.f32 %v800_v41, %v745_v38  ;;  %v3900_v31 = vunpack.i.h.bf16 %v4951_v29  ;;  %v3899_v26 = vunpack.i.l.bf16 %v4951_v29  ;;  %v3895_v38 = vunpack.i.h.bf16 %v4939_v14 }
 0x14a   : > { %3471 = vmatmul.msk.f32.gmra.mxu2 %vm383_vm0, %v4844_v11 }
 0x14b   : > { %v959_v49 = vadd.f32 %v907_v35, %v852_v40  ;;  %v4974_v35 = vpop.permute.xlu2 %3902 }
 0x14d   : > { %v846_v53 = vpop.f32.mrf.mxu2  ;;  %3484 = vmatmul.msk.f32.vlgmr.msra.gmra.mxu3 %vm383_vm0, %v4867_v45  ;;  %v927_v51 = vpop.f32.mrf.mxu0 }
 0x14e   : > { %v4882_v55 = vadd.f32 %v846_v53, %v747_v20  ;;  %v820_v15 = vpop.f32.mrf.mxu1  ;;  %2414 = vmatpush.msra.mxu3 %v3865_v48  ;;  %v3875_v20 = vunpack.i.h.bf16 %v4870_v13 }
 0x14f   : > { %v850_v58 = vadd.f32 %v820_v15, %v4795_v0  ;;  %v3890_v0 = vunpack.i.h.bf16 %v4909_v63 }
 0x150   : > { %3468 = vmatmul.msk.f32.vlgmr.msra.gmra.mxu1 %vm383_vm0, %v3466_v27  ;;  %v1034_v60 = vpop.f32.mrf.mxu3  ;;  %3476 = vmatmul.msk.f32.vlgmr.msra.gmra.mxu0 %vm383_vm0, %v4879_v52  ;;  %v3879_v27 = vunpack.i.l.bf16 %v4901_v62  ;;  %v4985_v15 = vpop.permute.xlu1 %3912 }
 0x151   : > { %v957_v21 = vadd.f32 %v927_v51, %v850_v58  ;;  %2212 = vmatpush.msra.mxu1 %v3859_v8  ;;  %2302 = vmatpush.msra.mxu0 %v4420_v12  ;;  %v2339_v12 = vsel %vm372_vm1, %v3869_v59, %v3870_v57  ;;  %v2552_v32 = vsel %vm656_vm3, %v3889_v9, %v3890_v0  ;;  %v3908_v51 = vpop.permute.xlu0 %3907  ;;  %v3914_v58 = vunpack.i.l.bf16 %v4985_v15 }
 0x152   : > { %3480 = vmatmul.msk.f32.vlgmr.msra.gmra.mxu2 %vm383_vm0, %v4879_v52  ;;  %2415 = vmatpush.msra.mxu3 %v3870_v57  ;;  %v2446_v56 = vsel %vm549_vm2, %v3879_v27, %v3880_v28  ;;  %v3910_v54 = vunpack.i.h.bf16 %v3908_v51  ;;  %v4992_v57 = vld [vmem:[%s5324_s3 + $0x130] sm:$0xff]  ;;  %v3915_v9 = vunpack.i.h.bf16 %v4985_v15 }
 0x153   : > { %v4903_v24 = vadd.f32 %v1034_v60, %v957_v21  ;;  %2213 = vmatpush.msra.mxu1 %v3860_v34  ;;  %2303 = vmatpush.msra.mxu0 %v4462_v39  ;;  %v3885_v34 = vunpack.i.h.bf16 %v4918_v18  ;;  %v3905_v60 = vunpack.i.h.bf16 %v4974_v35  ;;  %v5034_v18 = vld [vmem:[%s5324_s3 + $0x138] sm:$0xff] }
 0x154   : > { %2391 = vmatpush.msra.mxu2 %v2341_v61  ;;  %v2659_v21 = vsel %vm763_vm5, %v3910_v54, %v3914_v58 }
 0x155   : > { %v1011_v1 = vpop.f32.mrf.mxu2  ;;  %3485 = vmatmul.msk.f32.gmra.mxu3 %vm383_vm0, %v4899_v22  ;;  %v930_v3 = vpop.f32.mrf.mxu0  ;;  %v2444_v30 = vsel %vm549_vm2, %v3884_v16, %v3885_v34  ;;  %v2445_v62 = vsel %vm549_vm2, %v3885_v34, %v3895_v38  ;;  %v2551_v63 = vsel %vm656_vm3, %v3900_v31, %v3905_v60 }
 0x156   : > { %v4916_v6 = vadd.f32 %v1011_v1, %v956_v23  ;;  %v823_v7 = vpop.f32.mrf.mxu1  ;;  %2392 = vmatpush.msra.mxu2 %v2339_v12  ;;  %v2338_v23 = vsel %vm372_vm1, %v3875_v20, %v3869_v59  ;;  %v3909_v12 = vunpack.i.l.bf16 %v3908_v51  ;;  %v3507_v51 = vld [vmem:[%s5324_s3 + $0x148] sm:$0xff] }
 0x157   : > { %v853_v39 = vadd.f32 %v823_v7, %v4817_v44 }
 0x158   : > { %3469 = vmatmul.msk.f32.gmra.mxu1 %vm383_vm0, %v4844_v11  ;;  %v1037_v4 = vpop.f32.mrf.mxu3  ;;  %3477 = vmatmul.msk.f32.gmra.mxu0 %vm383_vm0, %v3475_v17  ;;  %v3894_v11 = vunpack.i.l.bf16 %v4939_v14  ;;  %v5059_v29 = vpop.permute.xlu1 %3927 }
 0x159   : > { %v960_v10 = vadd.f32 %v930_v3, %v853_v39  ;;  %v5043_v16 = vpop.permute.xlu0 %3922 }
 0x15a   : > { %3481 = vmatmul.msk.f32.gmra.mxu2 %vm383_vm0, %v3475_v17 }
 0x15b   : > { %v1067_v8 = vadd.f32 %v1037_v4, %v960_v10  ;;  %v5014_v4 = vpop.permute.xlu2 %3917 }
 0x15d   : > { %v1014_v42 = vpop.f32.mrf.mxu2  ;;  %3494 = vmatmul.msk.f32.vlgmr.msrb.gmra.mxu3 %vm383_vm0, %v4930_v2  ;;  %v1057_v43 = vpop.f32.mrf.mxu0 }
 0x15e   : > { %v4945_v44 = vadd.f32 %v1014_v42, %v959_v49  ;;  %v950_v46 = vpop.f32.mrf.mxu1  ;;  %2580 = vmatpush.msrb.mxu3 %v2552_v32 }
 0x15f   : > { %v958_v33 = vadd.f32 %v950_v46, %v4852_v19  ;;  %v2550_v19 = vsel %vm656_vm3, %v3899_v26, %v3900_v31  ;;  %v5054_v46 = vld [vmem:[%s5324_s3 + $0x150] sm:$0xff]  ;;  %v3506_v31 = vld [vmem:[%s5324_s3 + $0x140] sm:$0xff]  ;;  %v3924_v26 = vunpack.i.l.bf16 %v5043_v16 }
 0x160   : > { %3478 = vmatmul.msk.f32.vlgmr.msrb.gmra.mxu1 %vm383_vm0, %v4879_v52  ;;  %v1164_v37 = vpop.f32.mrf.mxu3  ;;  %3486 = vmatmul.msk.f32.vlgmr.msrb.gmra.mxu0 %vm383_vm0, %v4867_v45 }
 0x161   : > { %v1065_v41 = vadd.f32 %v1057_v43, %v958_v33  ;;  %2368 = vmatpush.msrb.mxu1 %v2340_v47  ;;  %2474 = vmatpush.msrb.mxu0 %v2446_v56 }
 0x162   : > { %3492 = vmatmul.msk.f32.vlgmr.msrb.gmra.mxu2 %vm383_vm0, %v4930_v2  ;;  %2581 = vmatpush.msrb.mxu3 %v2550_v19 }
 0x163   : > { %v1172_v5 = vadd.f32 %v1164_v37, %v1065_v41  ;;  %2369 = vmatpush.msrb.mxu1 %v2338_v23  ;;  %2475 = vmatpush.msrb.mxu0 %v2444_v30  ;;  %v5057_v47 = vpop.permute.xlu2 %3932  ;;  %v3930_v23 = vunpack.i.h.bf16 %v5059_v29  ;;  %v3929_v41 = vunpack.i.l.bf16 %v5059_v29 }
 0x164   : > { %2520 = vmatpush.msrb.mxu2 %v3894_v11 }
 0x165   : > { %v1141_v40 = vpop.f32.mrf.mxu2  ;;  %3495 = vmatmul.msk.f32.gmra.mxu3 %vm383_vm0, %v4971_v36  ;;  %v1060_v48 = vpop.f32.mrf.mxu0 }
 0x166   : > { %v4979_v13 = vadd.f32 %v1141_v40, %v4903_v24  ;;  %v953_v49 = vpop.f32.mrf.mxu1  ;;  %2521 = vmatpush.msrb.mxu2 %v3895_v38  ;;  %v5086_v40 = vpop.permute.xlu0 %3937 }
 0x167   : > { %v961_v50 = vadd.f32 %v953_v49, %v4882_v55  ;;  %v3904_v55 = vunpack.i.l.bf16 %v4974_v35 }
 0x168   : > { %3479 = vmatmul.msk.f32.gmra.mxu1 %vm383_vm0, %v3475_v17  ;;  %v1167_v53 = vpop.f32.mrf.mxu3  ;;  %3487 = vmatmul.msk.f32.gmra.mxu0 %vm383_vm0, %v4899_v22  ;;  %v2447_v17 = vsel %vm549_vm2, %v3880_v28, %v3894_v11 }
 0x169   : > { %v1068_v52 = vadd.f32 %v1060_v48, %v961_v50  ;;  %v2553_v7 = vsel %vm656_vm3, %v3890_v0, %v3904_v55  ;;  %v3919_v0 = vunpack.i.l.bf16 %v5014_v4 }
 0x16a   : > { %3493 = vmatmul.msk.f32.gmra.mxu2 %vm383_vm0, %v4971_v36 }
 0x16b   : > { %v1175_v59 = vadd.f32 %v1167_v53, %v1068_v52  ;;  %v2656_v27 = vsel %vm763_vm5, %v3915_v9, %v3919_v0  ;;  %v5093_v49 = vpop.permute.xlu2 %3947 }
 0x16c   : > { %v3950_v15 = vunpack.i.h.bf16 %v5093_v49 }
 0x16d   : > { %v1144_v61 = vpop.f32.mrf.mxu2  ;;  %3504 = vmatmul.msk.f32.vlgmr.msra.gmra.mxu3 %vm383_vm0, %v4992_v57  ;;  %v1225_v24 = vpop.f32.mrf.mxu0 }
 0x16e   : > { %v5002_v1 = vadd.f32 %v1144_v61, %v1067_v8  ;;  %v1118_v3 = vpop.f32.mrf.mxu1  ;;  %2709 = vmatpush.msra.mxu3 %v2659_v21  ;;  %v3934_v21 = vunpack.i.l.bf16 %v5057_v47  ;;  %v3940_v61 = vunpack.i.h.bf16 %v5086_v40 }
 0x16f   : > { %v1170_v39 = vadd.f32 %v1118_v3, %v4916_v6  ;;  %v3920_v6 = vunpack.i.h.bf16 %v5014_v4  ;;  %v3935_v3 = vunpack.i.h.bf16 %v5057_v47 }
 0x170   : > { %3488 = vmatmul.msk.f32.vlgmr.msra.gmra.mxu1 %vm383_vm0, %v4867_v45  ;;  %v1315_v10 = vpop.f32.mrf.mxu3  ;;  %3496 = vmatmul.msk.f32.vlgmr.msra.gmra.mxu0 %vm383_vm0, %v4930_v2  ;;  %v2658_v45 = vsel %vm763_vm5, %v3909_v12, %v3910_v54 }
 0x171   : > { %v1277_v25 = vadd.f32 %v1225_v24, %v1170_v39  ;;  %2497 = vmatpush.msra.mxu1 %v2447_v17  ;;  %2603 = vmatpush.msra.mxu0 %v2553_v7  ;;  %v2657_v2 = vsel %vm763_vm5, %v3919_v0, %v3920_v6  ;;  %v3939_v24 = vunpack.i.l.bf16 %v5086_v40  ;;  %v5123_v17 = vpop.permute.xlu0 %3952 }
 0x172   : > { %3502 = vmatmul.msk.f32.vlgmr.msra.gmra.mxu2 %vm383_vm0, %v4992_v57  ;;  %2710 = vmatpush.msra.mxu3 %v2657_v2 }
 0x173   : > { %v1367_v28 = vadd.f32 %v1315_v10, %v1277_v25  ;;  %2498 = vmatpush.msra.mxu1 %v2445_v62  ;;  %2604 = vmatpush.msra.mxu0 %v2551_v63  ;;  %v2764_v63 = vsel %vm870_vm4, %v3934_v21, %v3924_v26 }
 0x174   : > { %2686 = vmatpush.msra.mxu2 %v2658_v45  ;;  %v3954_v45 = vunpack.i.l.bf16 %v5123_v17 }
 0x175   : > { %v1271_v8 = vpop.f32.mrf.mxu2  ;;  %3505 = vmatmul.msk.f32.gmra.mxu3 %vm383_vm0, %v5034_v18  ;;  %v1228_v32 = vpop.f32.mrf.mxu0 }
 0x176   : > { %v5040_v20 = vadd.f32 %v1271_v8, %v1172_v5  ;;  %v1121_v14 = vpop.f32.mrf.mxu1  ;;  %2687 = vmatpush.msra.mxu2 %v2656_v27  ;;  %v5084_v5 = vld [vmem:[%s5324_s3 + $0x158] sm:$0xff] }
 0x177   : > { %v1173_v34 = vadd.f32 %v1121_v14, %v4945_v44  ;;  %v3925_v44 = vunpack.i.h.bf16 %v5043_v16  ;;  %v3955_v14 = vunpack.i.h.bf16 %v5123_v17 }
 0x178   : > { %3489 = vmatmul.msk.f32.gmra.mxu1 %vm383_vm0, %v4899_v22  ;;  %v1318_v42 = vpop.f32.mrf.mxu3  ;;  %3497 = vmatmul.msk.f32.gmra.mxu0 %vm383_vm0, %v4971_v36 }
 0x179   : > { %v1280_v43 = vadd.f32 %v1228_v32, %v1173_v34  ;;  %v2765_v38 = vsel %vm870_vm4, %v3924_v26, %v3925_v44 }
 0x17a   : > { %3503 = vmatmul.msk.f32.gmra.mxu2 %vm383_vm0, %v5034_v18 }
 0x17b   : > { %v1370_v56 = vadd.f32 %v1318_v42, %v1280_v43  ;;  %v5155_v42 = vpop.permute.xlu2 %3962 }
 0x17d   : > { %v1274_v22 = vpop.f32.mrf.mxu2  ;;  %3516 = vmatmul.msk.f32.vlgmr.msrb.gmra.mxu3 %vm383_vm0, %v5054_v46  ;;  %v1338_v33 = vpop.f32.mrf.mxu0 }
 0x17e   : > { %v5067_v37 = vadd.f32 %v1274_v22, %v1175_v59  ;;  %v1248_v11 = vpop.f32.mrf.mxu1  ;;  %2838 = vmatpush.msrb.mxu3 %v3925_v44 }
 0x17f   : > { %v1278_v30 = vadd.f32 %v1248_v11, %v4979_v13  ;;  %v2763_v13 = vsel %vm870_vm4, %v3929_v41, %v3930_v23 }
 0x180   : > { %3500 = vmatmul.msk.f32.vlgmr.msrb.gmra.mxu1 %vm383_vm0, %v4992_v57  ;;  %v1450_v19 = vpop.f32.mrf.mxu3  ;;  %3508 = vmatmul.msk.f32.vlgmr.msrb.gmra.mxu0 %vm383_vm0, %v3506_v31  ;;  %v3949_v57 = vunpack.i.l.bf16 %v5093_v49 }
 0x181   : > { %v1368_v36 = vadd.f32 %v1338_v33, %v1278_v30  ;;  %2626 = vmatpush.msrb.mxu1 %v3904_v55  ;;  %2732 = vmatpush.msrb.mxu0 %v3914_v58  ;;  %v5108_v58 = vpop.permute.xlu1 %3942  ;;  %v3968_v33 = vpop.permute.xlu0 %3967 }
 0x182   : > { %3512 = vmatmul.msk.f32.vlgmr.msrb.gmra.mxu2 %vm383_vm0, %v3506_v31  ;;  %2839 = vmatpush.msrb.mxu3 %v3930_v23  ;;  %v3945_v7 = vunpack.i.h.bf16 %v5108_v58  ;;  %v3944_v39 = vunpack.i.l.bf16 %v5108_v58  ;;  %v3970_v26 = vunpack.i.h.bf16 %v3968_v33  ;;  %v3530_v23 = vld [vmem:[%s5324_s3 + $0x170] sm:$0xff] }
 0x183   : > { %v5088_v48 = vadd.f32 %v1450_v19, %v1368_v36  ;;  %2627 = vmatpush.msrb.mxu1 %v3905_v60  ;;  %2733 = vmatpush.msrb.mxu0 %v3920_v6  ;;  %v5114_v60 = vld [vmem:[%s5324_s3 + $0x160] sm:$0xff]  ;;  %v2870_v6 = vsel %vm977_vm6, %v3939_v24, %v3940_v61  ;;  %v3965_v19 = vunpack.i.h.bf16 %v5155_v42 }
 0x184   : > { %2815 = vmatpush.msrb.mxu2 %v2765_v38  ;;  %v2869_v40 = vsel %vm977_vm6, %v3945_v7, %v3955_v14 }
 0x185   : > { %v1427_v50 = vpop.f32.mrf.mxu2  ;;  %3517 = vmatmul.msk.f32.gmra.mxu3 %vm383_vm0, %v5084_v5  ;;  %v1341_v53 = vpop.f32.mrf.mxu0 }
 0x186   : > { %v5100_v52 = vadd.f32 %v1427_v50, %v1367_v28  ;;  %v1251_v54 = vpop.f32.mrf.mxu1  ;;  %2816 = vmatpush.msrb.mxu2 %v2763_v13  ;;  %v2868_v28 = vsel %vm977_vm6, %v3944_v39, %v3945_v7  ;;  %v3969_v13 = vunpack.i.l.bf16 %v3968_v33 }
 0x187   : > { %v1281_v35 = vadd.f32 %v1251_v54, %v5002_v1  ;;  %v2976_v1 = vsel %vm1084_vm7, %v3949_v57, %v3950_v15 }
 0x188   : > { %3501 = vmatmul.msk.f32.gmra.mxu1 %vm383_vm0, %v5034_v18  ;;  %v1453_v55 = vpop.f32.mrf.mxu3  ;;  %3509 = vmatmul.msk.f32.gmra.mxu0 %vm383_vm0, %v3507_v51  ;;  %v2762_v18 = vsel %vm870_vm4, %v3935_v3, %v3929_v41 }
 0x189   : > { %v1371_v59 = vadd.f32 %v1341_v53, %v1281_v35  ;;  %v3958_v2 = vpop.permute.xlu1 %3957  ;;  %v3978_v35 = vpop.permute.xlu2 %3977 }
 0x18a   : > { %3513 = vmatmul.msk.f32.gmra.mxu2 %vm383_vm0, %v3507_v51  ;;  %v3960_v8 = vunpack.i.h.bf16 %v3958_v2  ;;  %v3959_v32 = vunpack.i.l.bf16 %v3958_v2  ;;  %v3979_v21 = vunpack.i.l.bf16 %v3978_v35  ;;  %v3171_v2 = vld [vmem:[%s5325_s4] sm:$0xff] }
 0x18b   : > { %v1483_v12 = vadd.f32 %v1453_v55, %v1371_v59  ;;  %v3980_v59 = vunpack.i.h.bf16 %v3978_v35 }
 0x18c   : > { %v2974_v16 = vsel %vm1084_vm7, %v3959_v32, %v3960_v8  ;;  %v2975_v49 = vsel %vm1084_vm7, %v3960_v8, %v3965_v19 }
 0x18d   : > { %v1430_v9 = vpop.f32.mrf.mxu2  ;;  %3526 = vmatmul.msk.f32.vlgmr.msra.gmra.mxu3 %vm383_vm0, %v5114_v60  ;;  %v1473_v4 = vpop.f32.mrf.mxu0 }
 0x18e   : > { %v5129_v10 = vadd.f32 %v1430_v9, %v1370_v56  ;;  %v1361_v62 = vpop.f32.mrf.mxu1  ;;  %3004 = vmatpush.msra.mxu3 %v2976_v1 }
 0x18f   : > { %v1369_v0 = vadd.f32 %v1361_v62, %v5040_v20  ;;  %v5149_v20 = vld [vmem:[%s5324_s3 + $0x168] sm:$0xff] }
 0x190   : > { %3510 = vmatmul.msk.f32.vlgmr.msra.gmra.mxu1 %vm383_vm0, %v3506_v31  ;;  %v1579_v25 = vpop.f32.mrf.mxu3  ;;  %3518 = vmatmul.msk.f32.vlgmr.msra.gmra.mxu0 %vm383_vm0, %v5054_v46 }
 0x191   : > { %v1481_v27 = vadd.f32 %v1473_v4, %v1369_v0  ;;  %2792 = vmatpush.msra.mxu1 %v2764_v63  ;;  %2898 = vmatpush.msra.mxu0 %v2870_v6  ;;  %v5166_v11 = vpop.permute.xlu1 %3972  ;;  %v5216_v4 = vld [vmem:[%s5324_s3 + $0x190] sm:$0xff] }
 0x192   : > { %3524 = vmatmul.msk.f32.vlgmr.msra.gmra.mxu2 %vm383_vm0, %v5114_v60  ;;  %3005 = vmatpush.msra.mxu3 %v2974_v16  ;;  %v3974_v30 = vunpack.i.l.bf16 %v5166_v11  ;;  %v3975_v55 = vunpack.i.h.bf16 %v5166_v11 }
 0x193   : > { %v5152_v34 = vadd.f32 %v1579_v25, %v1481_v27  ;;  %2793 = vmatpush.msra.mxu1 %v2762_v18  ;;  %2899 = vmatpush.msra.mxu0 %v2868_v28  ;;  %v5233_v28 = vld [vmem:[%s5324_s3 + $0x198] sm:$0xff]  ;;  %v4031_v27 = vmov 0  }
 0x194   : > { %2944 = vmatpush.msra.mxu2 %v3954_v45  ;;  %v3083_v36 = vsel %vm1191_vm8, %v3970_v26, %v3974_v30  ;;  %3981 = vset.pattern.permute.xlu0 %v4031_v27 }
 0x195   : > { %v1556_v43 = vpop.f32.mrf.mxu2  ;;  %3527 = vmatmul.msk.f32.gmra.mxu3 %vm383_vm0, %v5149_v20  ;;  %v1476_v44 = vpop.f32.mrf.mxu0  ;;  %3175 = vperm.xlu0 %3981, %v3171_v2  }
 0x196   : > { %v5160_v47 = vadd.f32 %v1556_v43, %v5088_v48  ;;  %v1364_v56 = vpop.f32.mrf.mxu1  ;;  %2945 = vmatpush.msra.mxu2 %v3955_v14  ;;  %3982 = vset.pattern.permute.xlu1 %v4031_v27  ;;  %v3539_v14 = vld [vmem:[%s5324_s3 + $0x188] sm:$0xff] }
 0x197   : > { %v1372_v29 = vadd.f32 %v1364_v56, %v5067_v37  ;;  %v3964_v37 = vunpack.i.l.bf16 %v5155_v42  ;;  %v3554_v56 = vld [vmem:[%s5324_s3 + $0x1a0] sm:$0xff] }
 0x198   : > { %3511 = vmatmul.msk.f32.gmra.mxu1 %vm383_vm0, %v3507_v51  ;;  %v1582_v22 = vpop.f32.mrf.mxu3  ;;  %3519 = vmatmul.msk.f32.gmra.mxu0 %vm383_vm0, %v5084_v5  ;;  %v2871_v51 = vsel %vm977_vm6, %v3940_v61, %v3954_v45  ;;  %v3081_v61 = vsel %vm1191_vm8, %v3979_v21, %v3980_v59 }
 0x199   : > { %v1484_v31 = vadd.f32 %v1476_v44, %v1372_v29  ;;  %v2977_v54 = vsel %vm1084_vm7, %v3950_v15, %v3964_v37  ;;  %v3082_v15 = vsel %vm1191_vm8, %v3969_v13, %v3970_v26 }
 0x19a   : > { %3525 = vmatmul.msk.f32.gmra.mxu2 %vm383_vm0, %v5149_v20 }
 0x19b   : > { %v1590_v41 = vadd.f32 %v1582_v22, %v1484_v31 }
 0x19d   : > { %v1559_v38 = vpop.f32.mrf.mxu2  ;;  %3536 = vmatmul.msk.f32.vlgmr.msrb.gmra.mxu3 %vm383_vm0, %v3530_v23  ;;  %v1639_v48 = vpop.f32.mrf.mxu0 }
 0x19e   : > { %v5178_v50 = vadd.f32 %v1559_v38, %v1483_v12  ;;  %v1533_v53 = vpop.f32.mrf.mxu1  ;;  %3133 = vmatpush.msrb.mxu3 %v3083_v36 }
 0x19f   : > { %v1585_v57 = vadd.f32 %v1533_v53, %v5100_v52 }
 0x1a0   : > { %3520 = vmatmul.msk.f32.vlgmr.msrb.gmra.mxu1 %vm383_vm0, %v5054_v46  ;;  %v1745_v24 = vpop.f32.mrf.mxu3  ;;  %3528 = vmatmul.msk.f32.vlgmr.msrb.gmra.mxu0 %vm383_vm0, %v5114_v60  ;;  %v3531_v46 = vld [vmem:[%s5324_s3 + $0x178] sm:$0xff]  ;;  %v3080_v60 = vsel %vm1191_vm8, %v3975_v55, %v3979_v21 }
 0x1a1   : > { %v1691_v52 = vadd.f32 %v1639_v48, %v1585_v57  ;;  %2921 = vmatpush.msrb.mxu1 %v2871_v51  ;;  %3027 = vmatpush.msrb.mxu0 %v2977_v54 }
 0x1a2   : > { %3534 = vmatmul.msk.f32.vlgmr.msrb.gmra.mxu2 %vm383_vm0, %v3530_v23  ;;  %3134 = vmatpush.msrb.mxu3 %v3081_v61 }
 0x1a3   : > { %v1797_v58 = vadd.f32 %v1745_v24, %v1691_v52  ;;  %2922 = vmatpush.msrb.mxu1 %v2869_v40  ;;  %3028 = vmatpush.msrb.mxu0 %v2975_v49 }
 0x1a4   : > { %3110 = vmatpush.msrb.mxu2 %v3082_v15 }
 0x1a5   : > { %v1685_v12 = vpop.f32.mrf.mxu2  ;;  %3537 = vmatmul.msk.f32.gmra.mxu3 %vm383_vm0, %v3531_v46  ;;  %v1642_v1 = vpop.f32.mrf.mxu0 }
 0x1a6   : > { %v1693_v3 = vadd.f32 %v1685_v12, %v5152_v34  ;;  %v1536_v17 = vpop.f32.mrf.mxu1  ;;  %3111 = vmatpush.msrb.mxu2 %v3080_v60 }
 0x1a7   : > { %v1588_v7 = vadd.f32 %v1536_v17, %v5129_v10 }
 0x1a8   : > { %3521 = vmatmul.msk.f32.gmra.mxu1 %vm383_vm0, %v5084_v5  ;;  %v1748_v39 = vpop.f32.mrf.mxu3  ;;  %3529 = vmatmul.msk.f32.gmra.mxu0 %vm383_vm0, %v5149_v20  ;;  %v3538_v5 = vld [vmem:[%s5324_s3 + $0x180] sm:$0xff] }
 0x1a9   : > { %v1694_v9 = vadd.f32 %v1642_v1, %v1588_v7 }
 0x1aa   : > { %3535 = vmatmul.msk.f32.gmra.mxu2 %vm383_vm0, %v3531_v46 }
 0x1ab   : > { %v1800_v62 = vadd.f32 %v1748_v39, %v1694_v9 }
 0x1ad   : > { %v1688_v63 = vpop.f32.mrf.mxu2  ;;  %3548 = vmatmul.msk.f32.vlgmr.msra.gmra.mxu3 %vm383_vm0, %v5216_v4  ;;  %v1768_v10 = vpop.f32.mrf.mxu0 }
 0x1ae   : > { %v1696_v6 = vadd.f32 %v1688_v63, %v1590_v41  ;;  %v1662_v0 = vpop.f32.mrf.mxu1 }
 0x1af   : > { %v1692_v25 = vadd.f32 %v1662_v0, %v5160_v47  ;;  %v3172_v47 = vld [vmem:[%s5325_s4 + $0x8] sm:$0xff] }
 0x1b0   : > { %3532 = vmatmul.msk.f32.vlgmr.msra.gmra.mxu1 %vm383_vm0, %v3530_v23  ;;  %v1874_v45 = vpop.f32.mrf.mxu3  ;;  %3540 = vmatmul.msk.f32.vlgmr.msra.gmra.mxu0 %vm383_vm0, %v3538_v5 }
 0x1b1   : > { %v1798_v18 = vadd.f32 %v1768_v10, %v1692_v25  ;;  %3050 = vmatpush.msra.mxu1 %v3964_v37  ;;  %3156 = vmatpush.msra.mxu0 %v3974_v30  ;;  %v3555_v30 = vld [vmem:[%s5324_s3 + $0x1a8] sm:$0xff] }
 0x1b2   : > { %3544 = vmatmul.msk.f32.vlgmr.msra.gmra.mxu2 %vm383_vm0, %v3538_v5  ;;  %3180 = vperm.xlu1 %3982, %v3172_v47  }
 0x1b3   : > { %v1904_v8 = vadd.f32 %v1874_v45, %v1798_v18  ;;  %3051 = vmatpush.msra.mxu1 %v3965_v19  ;;  %3157 = vmatpush.msra.mxu0 %v3980_v59 }
 0x1b5   : > { %v1851_v32 = vpop.f32.mrf.mxu2  ;;  %3549 = vmatmul.msk.f32.gmra.mxu3 %vm383_vm0, %v5233_v28  ;;  %v1771_v20 = vpop.f32.mrf.mxu0 }
 0x1b6   : > { %v1903_v34 = vadd.f32 %v1851_v32, %v1797_v58  ;;  %v1665_v16 = vpop.f32.mrf.mxu1 }
 0x1b7   : > { %v1695_v43 = vadd.f32 %v1665_v16, %v5178_v50 }
 0x1b8   : > { %3533 = vmatmul.msk.f32.gmra.mxu1 %vm383_vm0, %v3531_v46  ;;  %v1877_v42 = vpop.f32.mrf.mxu3  ;;  %3541 = vmatmul.msk.f32.gmra.mxu0 %vm383_vm0, %v3539_v14 }
 0x1b9   : > { %v1801_v44 = vadd.f32 %v1771_v20, %v1695_v43 }
 0x1ba   : > { %3545 = vmatmul.msk.f32.gmra.mxu2 %vm383_vm0, %v3539_v14 }
 0x1bb   : > { %v1907_v29 = vadd.f32 %v1877_v42, %v1801_v44 }
 0x1bd   : > { %v1854_v22 = vpop.f32.mrf.mxu2  ;;  %3558 = vmatmul.msk.f32.vlgmr.msrb.gmra.mxu3 %vm383_vm0, %v3554_v56  ;;  %v1897_v33 = vpop.f32.mrf.mxu0 }
 0x1be   : > { %v1906_v31 = vadd.f32 %v1854_v22, %v1800_v62  ;;  %v1791_v26 = vpop.f32.mrf.mxu1 }
 0x1bf   : > { %v1799_v11 = vadd.f32 %v1791_v26, %v1693_v3 }
 0x1c0   : > { %3542 = vmatmul.msk.f32.vlgmr.msrb.gmra.mxu1 %vm383_vm0, %v3538_v5  ;;  %v2003_v23 = vpop.f32.mrf.mxu3  ;;  %3550 = vmatmul.msk.f32.vlgmr.msrb.gmra.mxu0 %vm383_vm0, %v5216_v4 }
 0x1c1   : > { %v1905_v37 = vadd.f32 %v1897_v33, %v1799_v11 }
 0x1c2   : > { %3556 = vmatmul.msk.f32.vlgmr.msrb.gmra.mxu2 %vm383_vm0, %v3554_v56 }
 0x1c3   : > { %v2011_v41 = vadd.f32 %v2003_v23, %v1905_v37 }
 0x1c5   : > { %v1980_v19 = vpop.f32.mrf.mxu2  ;;  %3559 = vmatmul.msk.f32.gmra.mxu3 %vm383_vm0, %v3555_v30  ;;  %v1900_v36 = vpop.f32.mrf.mxu0 }
 0x1c6   : > { %v2010_v38 = vadd.f32 %v1980_v19, %v1904_v8  ;;  %v1794_v48 = vpop.f32.mrf.mxu1 }
 0x1c7   : > { %v1802_v13 = vadd.f32 %v1794_v48, %v1696_v6 }
 0x1c8   : > { %3543 = vmatmul.msk.f32.gmra.mxu1 %vm383_vm0, %v3539_v14  ;;  %v2006_v50 = vpop.f32.mrf.mxu3  ;;  %3551 = vmatmul.msk.f32.gmra.mxu0 %vm383_vm0, %v5233_v28 }
 0x1c9   : > { %v1908_v53 = vadd.f32 %v1900_v36, %v1802_v13 }
 0x1ca   : > { %3557 = vmatmul.msk.f32.gmra.mxu2 %vm383_vm0, %v3555_v30 }
 0x1cb   : > { %v2014_v51 = vadd.f32 %v2006_v50, %v1908_v53 }
 0x1cd   : > { %v1983_v54 = vpop.f32.mrf.mxu2  ;;  %v2063_v35 = vpop.f32.mrf.mxu0 }
 0x1ce   : > { %v2013_v57 = vadd.f32 %v1983_v54, %v1907_v29  ;;  %v1957_v55 = vpop.f32.mrf.mxu1 }
 0x1cf   : > { %v2009_v59 = vadd.f32 %v1957_v55, %v1903_v34 }
 0x1d0   : > { %3552 = vmatmul.msk.f32.vlgmr.msra.gmra.mxu1 %vm383_vm0, %v5216_v4  ;;  %v2169_v21 = vpop.f32.mrf.mxu3  ;;  %3560 = vmatmul.msk.f32.vlgmr.msra.gmra.mxu0 %vm383_vm0, %v3554_v56 }
 0x1d1   : > { %v2115_v24 = vadd.f32 %v2063_v35, %v2009_v59 }
 0x1d3   : > { %v2221_v40 = vadd.f32 %v2169_v21, %v2115_v24 }
 0x1d5   : > { %v2109_v49 = vpop.f32.mrf.mxu2  ;;  %v2066_v52 = vpop.f32.mrf.mxu0 }
 0x1d6   : > { %v2117_v15 = vadd.f32 %v2109_v49, %v2011_v41  ;;  %v1960_v61 = vpop.f32.mrf.mxu1 }
 0x1d7   : > { %v2012_v46 = vadd.f32 %v1960_v61, %v1906_v31 }
 0x1d8   : > { %3553 = vmatmul.msk.f32.gmra.mxu1 %vm383_vm0, %v5233_v28  ;;  %v2172_v58 = vpop.f32.mrf.mxu3  ;;  %3561 = vmatmul.msk.f32.gmra.mxu0 %vm383_vm0, %v3555_v30 }
 0x1d9   : > { %v2118_v60 = vadd.f32 %v2066_v52, %v2012_v46 }
 0x1db   : > { %v2224_v12 = vadd.f32 %v2172_v58, %v2118_v60 }
 0x1dd   : > { %v2112_v1 = vpop.f32.mrf.mxu2  ;;  %v2192_v3 = vpop.f32.mrf.mxu0 }
 0x1de   : > { %v2120_v17 = vadd.f32 %v2112_v1, %v2014_v51  ;;  %v2086_v7 = vpop.f32.mrf.mxu1 }
 0x1df   : > { %v2116_v39 = vadd.f32 %v2086_v7, %v2010_v38 }
 0x1e0   : > { %v2282_v9 = vpop.f32.mrf.mxu3 }
 0x1e1   : > { %v2222_v4 = vadd.f32 %v2192_v3, %v2116_v39 }
 0x1e3   : > { %v2312_v62 = vadd.f32 %v2282_v9, %v2222_v4 }
 0x1e5   : > { %v2259_v63 = vpop.f32.mrf.mxu2  ;;  %v2195_v10 = vpop.f32.mrf.mxu0 }
 0x1e6   : > { %v2311_v5 = vadd.f32 %v2259_v63, %v2221_v40  ;;  %v2089_v6 = vpop.f32.mrf.mxu1 }
 0x1e7   : > { %v2119_v0 = vadd.f32 %v2089_v6, %v2013_v57 }
 0x1e8   : > { %v2285_v25 = vpop.f32.mrf.mxu3 }
 0x1e9   : > { %v2225_v45 = vadd.f32 %v2195_v10, %v2119_v0 }
 0x1eb   : > { %v2315_v18 = vadd.f32 %v2285_v25, %v2225_v45 }
 0x1ed   : > { %v2262_v2 = vpop.f32.mrf.mxu2  ;;  %v2305_v28 = vpop.f32.mrf.mxu0 }
 0x1ee   : > { %v2314_v27 = vadd.f32 %v2262_v2, %v2224_v12  ;;  %v2215_v8 = vpop.f32.mrf.mxu1 }
 0x1ef   : > { %v2223_v32 = vadd.f32 %v2215_v8, %v2117_v15 }
 0x1f0   : > { %v2417_v20 = vpop.f32.mrf.mxu3 }
 0x1f1   : > { %v2313_v14 = vadd.f32 %v2305_v28, %v2223_v32 }
 0x1f3   : > { %v5271_v34 = vadd.f32 %v2417_v20, %v2313_v14 }
 0x1f5   : > { %v2394_v16 = vpop.f32.mrf.mxu2  ;;  %v2308_v43 = vpop.f32.mrf.mxu0 }
 0x1f6   : > { %v2218_v42 = vpop.f32.mrf.mxu1  ;;  %v2424_v46 = vadd.f32 %v2394_v16, %v2312_v62 }
 0x1f7   : > { %v2226_v44 = vadd.f32 %v2218_v42, %v2120_v17 }
 0x1f8   : > { %v2420_v47 = vpop.f32.mrf.mxu3 }
 0x1f9   : > { %v2316_v56 = vadd.f32 %v2308_v43, %v2226_v44 }
 0x1fb   : > { %v5273_v29 = vadd.f32 %v2420_v47, %v2316_v56 }
 0x1fd   : > { %v2397_v22 = vpop.f32.mrf.mxu2  ;;  %v2477_v33 = vpop.f32.mrf.mxu0 }
 0x1fe   : > { %v2371_v31 = vpop.f32.mrf.mxu1  ;;  %v2427_v4 = vadd.f32 %v2397_v22, %v2315_v18 }
 0x1ff   : > { %v2423_v15 = vadd.f32 %v2371_v31, %v2311_v5 }
 0x200   : > { %v2583_v26 = vpop.f32.mrf.mxu3 }
 0x201   : > { %v2529_v60 = vadd.f32 %v2477_v33, %v2423_v15 }
 0x203   : > { %v2635_v7 = vadd.f32 %v2583_v26, %v2529_v60 }
 0x205   : > { %v2523_v11 = vpop.f32.mrf.mxu2  ;;  %v2480_v23 = vpop.f32.mrf.mxu0 }
 0x206   : > { %v2374_v37 = vpop.f32.mrf.mxu1 }
 0x207   : > { %v2426_v39 = vadd.f32 %v2374_v37, %v2314_v27  ;;  %v2531_v27 = vadd.f32 %v2523_v11, %v5271_v34  ;;  %v3176_v43 = vpop.permute.xlu0 %3175 }
 0x208   : > { %v2586_v30 = vpop.f32.mrf.mxu3 }
 0x209   : > { %v2532_v5 = vadd.f32 %v2480_v23, %v2426_v39 }
 0x20b   : > { %v2638_v32 = vadd.f32 %v2586_v30, %v2532_v5 }
 0x20d   : > { %v5275_v41 = vpop.f32.mrf.mxu2  ;;  %v2606_v19 = vpop.f32.mrf.mxu0 }
 0x20e   : > { %v2500_v36 = vpop.f32.mrf.mxu1 }
 0x20f   : > { %v2530_v58 = vadd.f32 %v2500_v36, %v2424_v46 }
 0x210   : > { %v2712_v38 = vpop.f32.mrf.mxu3 }
 0x211   : > { %v2636_v17 = vadd.f32 %v2606_v19, %v2530_v58 }
 0x213   : > { %v2742_v10 = vadd.f32 %v2712_v38, %v2636_v17 }
 0x215   : > { %v2689_v48 = vpop.f32.mrf.mxu2  ;;  %v2609_v13 = vpop.f32.mrf.mxu0 }
 0x216   : > { %v2503_v50 = vpop.f32.mrf.mxu1  ;;  %v2741_v63 = vadd.f32 %v2689_v48, %v2635_v7 }
 0x217   : > { %v2533_v6 = vadd.f32 %v2503_v50, %v2427_v4 }
 0x218   : > { %v2715_v53 = vpop.f32.mrf.mxu3 }
 0x219   : > { %v2639_v28 = vadd.f32 %v2609_v13, %v2533_v6  ;;  %v2534_v13 = vadd.f32 %v5275_v41, %v5273_v29 }
 0x21b   : > { %v2745_v42 = vadd.f32 %v2715_v53, %v2639_v28 }
 0x21d   : > { %v2692_v51 = vpop.f32.mrf.mxu2  ;;  %v2735_v54 = vpop.f32.mrf.mxu0 }
 0x21e   : > { %v2629_v35 = vpop.f32.mrf.mxu1  ;;  %v2744_v16 = vadd.f32 %v2692_v51, %v2638_v32 }
 0x21f   : > { %v2637_v44 = vadd.f32 %v2629_v35, %v2531_v27 }
 0x220   : > { %v5277_v57 = vpop.f32.mrf.mxu3 }
 0x221   : > { %v2743_v37 = vadd.f32 %v2735_v54, %v2637_v44 }
 0x223   : > { %v2849_v35 = vadd.f32 %v5277_v57, %v2743_v37 }
 0x224   : > { %v3181_v51 = vpop.permute.xlu1 %3180 }
 0x225   : > { %v2818_v55 = vpop.f32.mrf.mxu2  ;;  %v5279_v59 = vpop.f32.mrf.mxu0 }
 0x226   : > { %v5281_v21 = vpop.f32.mrf.mxu1  ;;  %v2848_v62 = vadd.f32 %v2818_v55, %v2742_v10 }
 0x227   : > { %v2640_v55 = vadd.f32 %v5281_v21, %v2534_v13 }
 0x228   : > { %v5283_v24 = vpop.f32.mrf.mxu3 }
 0x229   : > { %v2746_v29 = vadd.f32 %v5279_v59, %v2640_v55 }
 0x22d   : > { %v2821_v40 = vpop.f32.mrf.mxu2  ;;  %v2901_v49 = vpop.f32.mrf.mxu0 }
 0x22e   : > { %v2795_v52 = vpop.f32.mrf.mxu1  ;;  %v2851_v33 = vadd.f32 %v2821_v40, %v2745_v42 }
 0x22f   : > { %v2847_v0 = vadd.f32 %v2795_v52, %v2741_v63 }
 0x230   : > { %v3007_v61 = vpop.f32.mrf.mxu3 }
 0x231   : > { %v2953_v20 = vadd.f32 %v2901_v49, %v2847_v0 }
 0x233   : > { %v3059_v56 = vadd.f32 %v3007_v61, %v2953_v20 }
 0x235   : > { %v2947_v12 = vpop.f32.mrf.mxu2  ;;  %v2904_v1 = vpop.f32.mrf.mxu0 }
 0x236   : > { %v2798_v3 = vpop.f32.mrf.mxu1  ;;  %v2955_v54 = vadd.f32 %v2947_v12, %v2849_v35 }
 0x237   : > { %v2850_v22 = vadd.f32 %v2798_v3, %v2744_v16  ;;  %v2852_v3 = vadd.f32 %v5283_v24, %v2746_v29 }
 0x238   : > { %v3010_v9 = vpop.f32.mrf.mxu3 }
 0x239   : > { %v2956_v36 = vadd.f32 %v2904_v1, %v2850_v22 }
 0x23b   : > { %v3062_v49 = vadd.f32 %v3010_v9, %v2956_v36 }
 0x23d   : > { %v2950_v25 = vpop.f32.mrf.mxu2  ;;  %v3030_v45 = vpop.f32.mrf.mxu0 }
 0x23e   : > { %v2924_v2 = vpop.f32.mrf.mxu1  ;;  %v2958_v12 = vadd.f32 %v2950_v25, %v2852_v3 }
 0x23f   : > { %v2954_v8 = vadd.f32 %v2924_v2, %v2848_v62 }
 0x240   : > { %v3136_v14 = vpop.f32.mrf.mxu3 }
 0x241   : > { %v3060_v18 = vadd.f32 %v3030_v45, %v2954_v8 }
 0x243   : > { %v3166_v47 = vadd.f32 %v3136_v14, %v3060_v18 }
 0x245   : > { %v3184_v31 = vadd.f32 %v3176_v43, %v3166_v47  ;;  %v3113_v26 = vpop.f32.mrf.mxu2  ;;  %v3033_v23 = vpop.f32.mrf.mxu0 }
 0x246   : > { %v3165_v34 = vadd.f32 %v3113_v26, %v3059_v56  ;;  %v2927_v11 = vpop.f32.mrf.mxu1 }
 0x247   : > { %v3190_v30 = vmax.f32 %v3184_v31, 0.0  ;;  %v2957_v19 = vadd.f32 %v2927_v11, %v2851_v33 }
 0x248   : > { %v3183_v38 = vadd.f32 %v3176_v43, %v3165_v34  ;;  %v3139_v48 = vpop.f32.mrf.mxu3 }
 0x249   : > { %3196 = vst [vmem:[%s5292_s6 + $0x8] sm:$0xff] %v3190_v30  ;;  %v3063_v50 = vadd.f32 %v3033_v23, %v2957_v19 }
 0x24a   : > { %v3189_v53 = vmax.f32 %v3183_v38, 0.0 }
 0x24b   : > { %v3169_v40 = vadd.f32 %v3139_v48, %v3063_v50 }
 0x24c   : > { %3195 = vst [vmem:[%s5292_s6] sm:$0xff] %v3189_v53 }
 0x24d   : > { %v3187_v52 = vadd.f32 %v3181_v51, %v3169_v40  ;;  %v3116_v15 = vpop.f32.mrf.mxu2  ;;  %v3159_v61 = vpop.f32.mrf.mxu0 }
 0x24e   : > { %v3168_v46 = vadd.f32 %v3116_v15, %v3062_v49  ;;  %v3053_v58 = vpop.f32.mrf.mxu1 }
 0x24f   : > { %v3193_v41 = vmax.f32 %v3187_v52, 0.0  ;;  %v3061_v60 = vadd.f32 %v3053_v58, %v2955_v54 }
 0x250   : > { %v3186_v1 = vadd.f32 %v3181_v51, %v3168_v46 }
 0x251   : > { %3200 = vst [vmem:[%s5292_s6 + $0x20] sm:$0xff] %v3193_v41  ;;  %v3167_v57 = vadd.f32 %v3159_v61, %v3061_v60 }
 0x252   : > { %v3192_v21 = vmax.f32 %v3186_v1, 0.0 }
 0x253   : > { %v3185_v17 = vadd.f32 %v3176_v43, %v3167_v57 }
 0x254   : > { %3199 = vst [vmem:[%s5292_s6 + $0x18] sm:$0xff] %v3192_v21 }
 0x255   : > { %v3191_v7 = vmax.f32 %v3185_v17, 0.0  ;;  %v3162_v9 = vpop.f32.mrf.mxu0 }
 0x256   : > { %v3056_v39 = vpop.f32.mrf.mxu1 }
 0x257   : > { %3198 = vst.msk [vmem:[%s5292_s6 + $0x10] sm:$0xff] %vm3197_vm9, %v3191_v7  ;;  %v3064_v4 = vadd.f32 %v3056_v39, %v2958_v12 }
 0x259   : > { %v3170_v63 = vadd.f32 %v3162_v9, %v3064_v4 }
 0x25b   : > { %v3188_v59 = vadd.f32 %v3181_v51, %v3170_v63 }
 0x25d   : > { %v3194_v10 = vmax.f32 %v3188_v59, 0.0 }
 0x25f   : > { %3201 = vst.msk [vmem:[%s5292_s6 + $0x28] sm:$0xff] %vm3197_vm9, %v3194_v10 }
 0x260 PF: > { %s15_s22 = sadd.s32 1, %s4021_s22   ;;  %s5327_s18 = smov %s4013_s20 }
 0x261   : > { %p12_p10 = scmp.ge.s32.totalorder %s15_s22, 34   ;;  %s5328_s19 = smov %s4017_s21 }
 0x262   : > { %s5329_s20 = smov %s5332_s23  ;;  %s5330_s21 = smov %s5336_s24 }
 0x263   :  { %14 = sbr.rel (!%p12_p10) target bundleno = 3 (0x3), region = 102 }

// kernel: residual_conv_block.3
= control target key start
LH: loop header
LB: loop body
LE: loop exit
PB: predicated region body
PF: predicated region fallthrough
CT: control target
= control target key end

     0   :  { %s4197_s21 = smov 0   ;;  %s4199_s22 = smov 0   ;;  %s5519_s0 = inlined_call_operand.vmem [shape: f32[2,18,16,342], index: 0, kind: input, shape index: {}, may-alias: {0,1,2}]   ;;  %s5520_s1 = inlined_call_operand.vmem [shape: f32[2,18,16,342], index: 1, kind: input, shape index: {}, may-alias: {0,1,2}]   ;;  %s5521_s2 = inlined_call_operand.vmem [shape: f32[2,18,16,342], index: 2, kind: input, shape index: {}, may-alias: {0,1,2}]   ;;  %s5522_s3 = inlined_call_operand.vmem [shape: f32[27,16,16], index: 3, kind: input, shape index: {}]   ;;  %s5523_s4 = inlined_call_operand.vmem [shape: f32[16,1], index: 4, kind: input, shape index: {}]   ;;  %s5524_s5 = inlined_call_operand.vmem [shape: f32[2,18,16,342], index: 5, kind: input, shape index: {}]   ;;  %s5525_s6 = inlined_call_operand.vmem [shape: f32[2,16,16,288], index: 6, kind: output, shape index: {}]  }
   0x1   :  { %s4201_s23 = smov 0   ;;  %s4203_s24 = smov 0  }
   0x2   :  { %s4205_s25 = smov 0  }
   0x3 LB: > { %s25_s26 = sadd.s32 1, %s4143_s23  ;;  %s28_s27 = sadd.s32 1, %s4147_s24  ;;  %s4151_s25 = sphi %s4205_s25, %s16_s25   ;;  %s4147_s24 = sphi %s4203_s24, %s5529_s24   ;;  %s4143_s23 = sphi %s4201_s23, %s5528_s23   ;;  %s4139_s22 = sphi %s4199_s22, %s5527_s22   ;;  %s4135_s21 = sphi %s4197_s21, %s5526_s21  }
   0x4   : > { %p26_p0 = scmp.ge.s32.totalorder %s25_s26, 16  ;;  %p3472_p1 = scmp.ge.s32.totalorder %s4151_s25, 1 }
   0x5   : > { %p292_p2 = scmp.lt.s32.totalorder %s4151_s25, 33 }
   0x6   : > { %s5531_s26 = smov (%p26_p0, %s25_s26), 0  ;;  %s5533_s27 = smov (!%p26_p0, %s28_s27), %s4147_s24 }
   0x7   : > { %p293_p3 = pnand %p3472_p1, %p292_p2  ;;  %p30_p4 = scmp.ge.s32.totalorder %s5533_s27, 2 }
   0x8   : > { %p360_p5 = scmp.lt.s32.totalorder (!%p293_p3), %s4139_s22, 1  ;;  %p362_p6 = scmp.lt.s32.totalorder (!%p293_p3), %s4135_s21, 17 }
   0x9   : > { %s5535_s27 = smov (%p30_p4, %s5533_s27), 0  ;;  %296 = sbr.rel (%p293_p3) target bundleno = 610 (0x262), region = 44 }
   0xa   : > { %s4153_s12 = smov (!%p293_p3), 127   ;;  %s4154_s13 = smov (!%p293_p3), 126  }
   0xb   : > { %s4155_s14 = smov (!%p293_p3), 110   ;;  %s4156_s15 = smov (!%p293_p3), 109  }
   0xc   : > { %s4157_s16 = smov (!%p293_p3), 108   ;;  %s369_s17 = sadd.s32 (!%p293_p3), 1, %s4135_s21 }
   0xd   : > { %p372_p7 = scmp.lt.s32.totalorder (!%p293_p3), %s369_s17, 17  ;;  %s4158_s20 = smov (!%p293_p3), 92  }
   0xe   : > { %s5537_s22 = smov (!%p360_p5, %s4139_s22), 1  ;;  %v4276_v13 = vld [vmem:[%s5522_s3] sm:$0xff]  ;;  %vm451_vm0 = vcmask 130048   ;;  %s4160_s18 = smov 90   ;;  %v4324_v21 = vld [vmem:[%s5522_s3 + $0x8] sm:$0xff]  ;;  %vm440_vm1 = vcmask 1039360  }
   0xf   : > { %s363_s28 = scalar_select %p362_p6, %s4135_s21, 17  ;;  %v3478_v37 = vld [vmem:[%s5522_s3 + $0x10] sm:$0xff]  ;;  %vm617_vm2 = vcmask 1031168   ;;  %v4383_v48 = vld [vmem:[%s5522_s3 + $0x18] sm:$0xff]  ;;  %v4402_v56 = vld [vmem:[%s5522_s3 + $0x20] sm:$0xff]  ;;  %vm724_vm3 = vcmask 900096  }
  0x10   : > { %s4234_s29 = smul.u32 108, %s5537_s22  ;;  %s5539_s17 = smov (!%p372_p7, %s369_s17), 17  ;;  %vm938_vm4 = vcmask 883712   ;;  %vm831_vm5 = vcmask 891904   ;;  %vm1045_vm6 = vcmask 752640   ;;  %vm1152_vm7 = vcmask 744448  }
  0x11   : > { %s3696_s30 = smul.u32 6, %s363_s28  ;;  %vm1259_vm8 = vcmask 736256   ;;  %p404_p9 = scmp.lt.s32.totalorder %s4135_s21, 15  ;;  %vm3305_vm9 = vcmask 261120  }
  0x12   : > { %s3698_s28 = smul.u32 6, %s5539_s17 }
  0x13   : > { %s366_s7 = sadd.s32 %s4234_s29, %s3696_s30  ;;  %s4159_s30 = smov 91  }
  0x14   : > { %s3473_s8 = sshll.u32 %s366_s7, 3  ;;  %s4285_s7 = sadd.s32 %s3698_s28, %s4234_s29 }
  0x15   : > { %s368_s11 = scalar_lea.vmem %s5519_s0, %s3473_s8  ;;  %s3474_s8 = sshll.u32 %s4285_s7, 3 }
  0x16   : > { %v414_v0 = vld [vmem:[%s368_s11 + $0x18] sm:$0xff]  ;;  %v4240_v1 = vld [vmem:[%s368_s11 + $0x20] sm:$0xff]  ;;  %v4242_v2 = vld [vmem:[%s368_s11 + $0x10] sm:$0xff]  ;;  %s380_s28 = sadd.s32 2, %s4135_s21  ;;  %s5543_s21 = smov (!%p404_p9, %s4135_s21), 15 }
  0x17   : > { %v3751_v3 = vpack.i.bf16 %v4240_v1, %v414_v0  ;;  %v4245_v4 = vld [vmem:[%s368_s11 + $0x28] sm:$0xff]  ;;  %v411_v5 = vld [vmem:[%s368_s11] sm:$0xff]  ;;  %547 = vmatpush.msra.mxu3 %v414_v0  ;;  %p383_p8 = scmp.lt.s32.totalorder %s380_s28, 17  ;;  %s3700_s17 = smul.u32 6, %s5543_s21 }
  0x18   : > { %v3761_v6 = vpack.i.bf16 %v4242_v2, %v4245_v4  ;;  %v3771_v7 = vpack.i.bf16 %v411_v5, %v4245_v4  ;;  %v4252_v8 = vld [vmem:[%s368_s11 + $0x8] sm:$0xff]  ;;  %v3781_v11 = vpack.i.bf16 %v4245_v4, %v4240_v1  ;;  %v3791_v12 = vpack.i.bf16 %v411_v5, %v414_v0  ;;  %s378_s11 = scalar_lea.vmem %s5520_s1, %s3474_s8 }
  0x19   : > { %3752 = vrot.lane.b32.xlu0 %v3751_v3, %s4153_s12  ;;  %548 = vmatpush.msra.mxu3 %v411_v5  ;;  %v3756_v9 = vpack.i.bf16 %v4252_v8, %v411_v5  ;;  %v3776_v10 = vpack.i.bf16 %v4242_v2, %v4252_v8  ;;  %v4298_v14 = vld [vmem:[%s378_s11 + $0x18] sm:$0xff]  ;;  %v4300_v15 = vld [vmem:[%s378_s11 + $0x20] sm:$0xff]  ;;  %v4304_v17 = vld [vmem:[%s378_s11 + $0x28] sm:$0xff]  ;;  %s5541_s28 = smov (!%p383_p8, %s380_s28), 17 }
  0x1a   : > { %3762 = vrot.lane.b32.xlu1 %v3761_v6, %s4153_s12  ;;  %3772 = vrot.lane.b32.xlu2 %v3771_v7, %s4154_s13  ;;  %v4302_v16 = vld [vmem:[%s378_s11] sm:$0xff]  ;;  %v4308_v18 = vpack.i.bf16 %v4300_v15, %v4298_v14  ;;  %v4317_v20 = vpack.i.bf16 %v4304_v17, %v4300_v15  ;;  %v4328_v22 = vld [vmem:[%s378_s11 + $0x8] sm:$0xff]  ;;  %s3699_s19 = smul.u32 6, %s5541_s28 }
  0x1b   : > { %3486 = vmatmul.msk.f32.vlgmr.msra.gmra.mxu3 %vm451_vm0, %v4276_v13  ;;  %v3876_v19 = vpack.i.bf16 %v4302_v16, %v4304_v17  ;;  %v4330_v23 = vld [vmem:[%s378_s11 + $0x10] sm:$0xff]  ;;  %v4348_v27 = vpack.i.bf16 %v4328_v22, %v4302_v16  ;;  %v4362_v29 = vpack.i.bf16 %v4302_v16, %v4298_v14 }
  0x1c   : > { %v4336_v24 = vpack.i.bf16 %v4330_v23, %v4328_v22  ;;  %v4344_v26 = vpack.i.bf16 %v4330_v23, %v4304_v17  ;;  %s387_s9 = sadd.s32 %s3699_s19, %s4234_s29 }
  0x1d   : > { %s3475_s29 = sshll.u32 %s387_s9, 3 }
  0x1e   : > { %s4541_s28 = scalar_lea.vmem %s5521_s2, %s3475_s29 }
  0x21   : > { %3757 = vrot.lane.b32.xlu0 %v3756_v9, %s4153_s12 }
  0x22   : > { %3767 = vrot.lane.b32.xlu1 %v3751_v3, %s4154_s13  ;;  %3777 = vrot.lane.b32.xlu2 %v3776_v10, %s4154_s13 }
  0x23   : > { %3487 = vmatmul.msk.f32.gmra.mxu3 %vm451_vm0, %v4324_v21 }
  0x29   : > { %3782 = vrot.lane.b32.xlu0 %v3781_v11, %s4155_s14 }
  0x2a   : > { %3787 = vrot.lane.b32.xlu1 %v3776_v10, %s4155_s14  ;;  %3792 = vrot.lane.b32.xlu2 %v3791_v12, %s4155_s14 }
  0x31   : > { %3797 = vrot.lane.b32.xlu0 %v3751_v3, %s4156_s15 }
  0x32   : > { %3802 = vrot.lane.b32.xlu1 %v3756_v9, %s4156_s15  ;;  %3807 = vrot.lane.b32.xlu2 %v3751_v3, %s4157_s16 }
  0x39   : > { %3812 = vrot.lane.b32.xlu0 %v3761_v6, %s4156_s15 }
  0x3a   : > { %3817 = vrot.lane.b32.xlu1 %v3756_v9, %s4157_s16  ;;  %3822 = vrot.lane.b32.xlu2 %v3761_v6, %s4157_s16 }
  0x41   : > { %3827 = vrot.lane.b32.xlu0 %v3751_v3, %s4158_s20 }
  0x42   : > { %3832 = vrot.lane.b32.xlu1 %v3771_v7, %s4158_s20  ;;  %3837 = vrot.lane.b32.xlu2 %v3776_v10, %s4158_s20 }
  0x49   : > { %3842 = vrot.lane.b32.xlu0 %v3781_v11, %s4159_s30  ;;  %v4429_v11 = vld [vmem:[%s5522_s3 + $0x28] sm:$0xff] }
  0x4a   : > { %3847 = vrot.lane.b32.xlu1 %v3776_v10, %s4159_s30  ;;  %3852 = vrot.lane.b32.xlu2 %v3791_v12, %s4159_s30 }
  0x51   : > { %3857 = vrot.lane.b32.xlu0 %v3751_v3, %s4160_s18 }
  0x52   : > { %3862 = vrot.lane.b32.xlu1 %v3756_v9, %s4160_s18  ;;  %3867 = vrot.lane.b32.xlu2 %v3761_v6, %s4160_s18 }
  0x59   : > { %3872 = vrot.lane.b32.xlu0 %v4308_v18, %s4153_s12 }
  0x5a   : > { %3877 = vrot.lane.b32.xlu1 %v3876_v19, %s4153_s12  ;;  %3882 = vrot.lane.b32.xlu2 %v4336_v24, %s4153_s12 }
  0x61   : > { %3887 = vrot.lane.b32.xlu0 %v4317_v20, %s4154_s13 }
  0x62   : > { %3892 = vrot.lane.b32.xlu1 %v4336_v24, %s4154_s13  ;;  %3897 = vrot.lane.b32.xlu2 %v4362_v29, %s4154_s13 }
  0x69   : > { %3902 = vrot.lane.b32.xlu0 %v4308_v18, %s4155_s14 }
  0x6a   : > { %3907 = vrot.lane.b32.xlu1 %v4348_v27, %s4155_s14  ;;  %3912 = vrot.lane.b32.xlu2 %v4308_v18, %s4156_s15 }
  0x71   : > { %3917 = vrot.lane.b32.xlu0 %v4344_v26, %s4155_s14 }
  0x72   : > { %3922 = vrot.lane.b32.xlu1 %v4348_v27, %s4156_s15  ;;  %3927 = vrot.lane.b32.xlu2 %v4344_v26, %s4156_s15 }
  0x74   : > { %v4340_v25 = vpop.permute.xlu2 %3772 }
  0x75   : > { %v3774_v39 = vunpack.i.l.bf16 %v4340_v25  ;;  %v3775_v50 = vunpack.i.h.bf16 %v4340_v25 }
  0x79   : > { %3932 = vrot.lane.b32.xlu0 %v4308_v18, %s4157_s16 }
  0x7a   : > { %3937 = vrot.lane.b32.xlu1 %v3876_v19, %s4157_s16  ;;  %3942 = vrot.lane.b32.xlu2 %v4336_v24, %s4157_s16 }
  0x7c   : > { %v4356_v28 = vpop.permute.xlu2 %3777 }
  0x7d   : > { %v3780_v46 = vunpack.i.h.bf16 %v4356_v28  ;;  %v3779_v47 = vunpack.i.l.bf16 %v4356_v28 }
  0x7f   : > { %v619_v54 = vsel %vm617_vm2, %v3779_v47, %v3780_v46  ;;  %v618_v58 = vsel %vm617_vm2, %v3775_v50, %v3779_v47  ;;  %v4482_v47 = vld [vmem:[%s5522_s3 + $0x38] sm:$0xff] }
  0x81   : > { %3947 = vrot.lane.b32.xlu0 %v4317_v20, %s4158_s20  ;;  %v4452_v20 = vld [vmem:[%s5522_s3 + $0x30] sm:$0xff] }
  0x82   : > { %3952 = vrot.lane.b32.xlu1 %v4336_v24, %s4158_s20  ;;  %3957 = vrot.lane.b32.xlu2 %v4362_v29, %s4158_s20 }
  0x84   : > { %v4370_v38 = vpop.permute.xlu2 %3792 }
  0x85   : > { %v3794_v60 = vunpack.i.l.bf16 %v4370_v38  ;;  %v3795_v0 = vunpack.i.h.bf16 %v4370_v38 }
  0x89   : > { %3962 = vrot.lane.b32.xlu0 %v4308_v18, %s4159_s30 }
  0x8a   : > { %3967 = vrot.lane.b32.xlu1 %v4348_v27, %s4159_s30  ;;  %3972 = vrot.lane.b32.xlu2 %v4308_v18, %s4160_s18 }
  0x8b   : > { %v3753_v30 = vpop.permute.xlu0 %3752 }
  0x8c   : > { %v3755_v31 = vunpack.i.h.bf16 %v3753_v30  ;;  %v3754_v32 = vunpack.i.l.bf16 %v3753_v30  ;;  %v3763_v33 = vpop.permute.xlu1 %3762  ;;  %v4404_v57 = vpop.permute.xlu2 %3807 }
  0x8d   : > { %v3764_v34 = vunpack.i.l.bf16 %v3763_v33  ;;  %v3765_v35 = vunpack.i.h.bf16 %v3763_v33  ;;  %v3810_v3 = vunpack.i.h.bf16 %v4404_v57  ;;  %v3809_v5 = vunpack.i.l.bf16 %v4404_v57 }
  0x8e   : > { %v443_v36 = vsel %vm440_vm1, %v3754_v32, %v3755_v31 }
  0x8f   : > { %518 = vmatpush.msra.mxu2 %v3764_v34  ;;  %472 = vmatpush.msra.mxu0 %v443_v36  ;;  %v444_v52 = vsel %vm440_vm1, %v3755_v31, %v3764_v34  ;;  %v941_v10 = vsel %vm938_vm4, %v3809_v5, %v3810_v3 }
  0x90   : > { %3694 = vmatpush.msra.mxu1 %v443_v36 }
  0x91   : > { %519 = vmatpush.msra.mxu2 %v3765_v35  ;;  %3977 = vrot.lane.b32.xlu0 %v4344_v26, %s4159_s30 }
  0x92   : > { %3484 = vmatmul.msk.f32.vlgmr.msra.gmra.mxu2 %vm451_vm0, %v3478_v37  ;;  %3982 = vrot.lane.b32.xlu1 %v4348_v27, %s4160_s18 }
  0x93   : > { %v3758_v40 = vpop.permute.xlu0 %3757  ;;  %3987 = vrot.lane.b32.xlu2 %v4344_v26, %s4160_s18 }
  0x94   : > { %v3760_v41 = vunpack.i.h.bf16 %v3758_v40  ;;  %v3759_v42 = vunpack.i.l.bf16 %v3758_v40  ;;  %v3768_v43 = vpop.permute.xlu1 %3767  ;;  %v4436_v32 = vpop.permute.xlu2 %3822 }
  0x95   : > { %v3770_v44 = vunpack.i.h.bf16 %v3768_v43  ;;  %v3769_v45 = vunpack.i.l.bf16 %v3768_v43  ;;  %v3824_v34 = vunpack.i.l.bf16 %v4436_v32 }
  0x96   : > { %v441_v49 = vsel %vm440_vm1, %v3759_v42, %v3760_v41  ;;  %v442_v55 = vsel %vm440_vm1, %v3760_v41, %v3765_v35 }
  0x97   : > { %473 = vmatpush.msra.mxu0 %v441_v49  ;;  %3695 = vmatpush.msra.mxu1 %v441_v49  ;;  %v621_v51 = vsel %vm617_vm2, %v3770_v44, %v3774_v39  ;;  %v620_v53 = vsel %vm617_vm2, %v3769_v45, %v3770_v44  ;;  %v942_v43 = vsel %vm938_vm4, %v3810_v3, %v3824_v34 }
  0x98   : > { %3480 = vmatmul.msk.f32.vlgmr.msra.gmra.mxu0 %vm451_vm0, %v3478_v37  ;;  %3481 = vmatmul.msk.f32.vlgmr.msra.gmra.mxu1 %vm451_vm0, %v4383_v48 }
  0x99   : > { %495 = vmatpush.msrb.mxu1 %v444_v52  ;;  %570 = vmatpush.msrb.mxu0 %v4240_v1 }
  0x9a   : > { %3485 = vmatmul.msk.f32.gmra.mxu2 %vm451_vm0, %v4383_v48  ;;  %671 = vmatpush.msrb.mxu3 %v621_v51 }
  0x9b   : > { %496 = vmatpush.msrb.mxu1 %v442_v55  ;;  %571 = vmatpush.msrb.mxu0 %v4252_v8  ;;  %v3783_v59 = vpop.permute.xlu0 %3782 }
  0x9c   : > { %648 = vmatpush.msrb.mxu2 %v620_v53  ;;  %672 = vmatpush.msrb.mxu3 %v619_v54  ;;  %v3785_v61 = vunpack.i.h.bf16 %v3783_v59  ;;  %v3784_v62 = vunpack.i.l.bf16 %v3783_v59  ;;  %v3788_v63 = vpop.permute.xlu1 %3787  ;;  %v3838_v45 = vpop.permute.xlu2 %3837  ;;  %v4504_v59 = vld [vmem:[%s5522_s3 + $0x50] sm:$0xff] }
  0x9d   : > { %694 = vmatpush.msra.mxu0 %v3774_v39  ;;  %3496 = vmatmul.msk.f32.vlgmr.msrb.gmra.mxu3 %vm451_vm0, %v4402_v56  ;;  %v3789_v1 = vunpack.i.l.bf16 %v3788_v63  ;;  %v3790_v6 = vunpack.i.h.bf16 %v3788_v63  ;;  %v3825_v39 = vunpack.i.h.bf16 %v4436_v32  ;;  %v3839_v52 = vunpack.i.l.bf16 %v3838_v45 }
  0x9e   : > { %649 = vmatpush.msrb.mxu2 %v618_v58  ;;  %593 = vmatpush.msra.mxu1 %v4245_v4  ;;  %v728_v7 = vsel %vm724_vm3, %v3784_v62, %v3785_v61  ;;  %v727_v8 = vsel %vm724_vm3, %v3794_v60, %v3784_v62 }
  0x9f   : > { %695 = vmatpush.msra.mxu0 %v3780_v46  ;;  %801 = vmatpush.msra.mxu3 %v3785_v61  ;;  %v726_v9 = vsel %vm724_vm3, %v3789_v1, %v3790_v6  ;;  %v725_v4 = vsel %vm724_vm3, %v3795_v0, %v3789_v1  ;;  %v3508_v61 = vld [vmem:[%s5522_s3 + $0x40] sm:$0xff]  ;;  %v4524_v1 = vld [vmem:[%s5522_s3 + $0x58] sm:$0xff] }
  0xa0   : > { %3482 = vmatmul.msk.f32.vlgmr.msrb.gmra.mxu1 %vm451_vm0, %v3478_v37  ;;  %3488 = vmatmul.msk.f32.vlgmr.msrb.gmra.mxu0 %vm451_vm0, %v4276_v13 }
  0xa1   : > { %594 = vmatpush.msra.mxu1 %v4242_v2  ;;  %778 = vmatpush.msra.mxu2 %v728_v7 }
  0xa2   : > { %3494 = vmatmul.msk.f32.vlgmr.msrb.gmra.mxu2 %vm451_vm0, %v4402_v56  ;;  %802 = vmatpush.msra.mxu3 %v3790_v6  ;;  %v3509_v6 = vld [vmem:[%s5522_s3 + $0x48] sm:$0xff] }
  0xa3   : > { %755 = vmatpush.msrb.mxu1 %v727_v8  ;;  %v3798_v12 = vpop.permute.xlu0 %3797  ;;  %779 = vmatpush.msra.mxu2 %v726_v9  ;;  %v4552_v8 = vld [vmem:[%s5522_s3 + $0x60] sm:$0xff] }
  0xa4   : > { %v3800_v19 = vunpack.i.h.bf16 %v3798_v12  ;;  %v3799_v2 = vunpack.i.l.bf16 %v3798_v12  ;;  %v3803_v25 = vpop.permute.xlu1 %3802  ;;  %969 = vmatpush.msrb.mxu3 %v941_v10  ;;  %v3853_v3 = vpop.permute.xlu2 %3852  ;;  %v4560_v12 = vld [vmem:[%s4541_s28 + $0x28] sm:$0xff] }
  0xa5   : > { %756 = vmatpush.msrb.mxu1 %v725_v4  ;;  %3497 = vmatmul.msk.f32.gmra.mxu3 %vm451_vm0, %v4429_v11  ;;  %v3805_v28 = vunpack.i.h.bf16 %v3803_v25  ;;  %v3804_v30 = vunpack.i.l.bf16 %v3803_v25  ;;  %v3854_v9 = vunpack.i.l.bf16 %v3853_v3 }
  0xa6   : > { %v834_v31 = vsel %vm831_vm5, %v3799_v2, %v3800_v19  ;;  %v3855_v2 = vunpack.i.h.bf16 %v3853_v3 }
  0xa7   : > { %862 = vmatpush.msrb.mxu0 %v834_v31  ;;  %v832_v33 = vsel %vm831_vm5, %v3804_v30, %v3805_v28 }
  0xa8   : > { %3483 = vmatmul.msk.f32.gmra.mxu1 %vm451_vm0, %v4383_v48  ;;  %3489 = vmatmul.msk.f32.gmra.mxu0 %vm451_vm0, %v4324_v21  ;;  %v3840_v48 = vunpack.i.h.bf16 %v3838_v45 }
  0xa9   : > { %863 = vmatpush.msrb.mxu0 %v832_v33 }
  0xaa   : > { %3495 = vmatmul.msk.f32.gmra.mxu2 %vm451_vm0, %v4429_v11  ;;  %v1047_v58 = vsel %vm1045_vm6, %v3839_v52, %v3840_v48 }
  0xab   : > { %v3813_v35 = vpop.permute.xlu0 %3812 }
  0xac   : > { %v3815_v36 = vunpack.i.h.bf16 %v3813_v35  ;;  %v3814_v37 = vunpack.i.l.bf16 %v3813_v35  ;;  %v3818_v38 = vpop.permute.xlu1 %3817  ;;  %v3868_v30 = vpop.permute.xlu2 %3867  ;;  %v4589_v35 = vld [vmem:[%s4541_s28 + $0x18] sm:$0xff] }
  0xad   : > { %3506 = vmatmul.msk.f32.vlgmr.msra.gmra.mxu3 %vm451_vm0, %v4452_v20  ;;  %v3820_v40 = vunpack.i.h.bf16 %v3818_v38  ;;  %v3819_v41 = vunpack.i.l.bf16 %v3818_v38  ;;  %v3869_v26 = vunpack.i.l.bf16 %v3868_v30  ;;  %v4599_v38 = vld [vmem:[%s4541_s28 + $0x8] sm:$0xff] }
  0xae   : > { %v835_v42 = vsel %vm831_vm5, %v3800_v19, %v3814_v37  ;;  %908 = vmatpush.msrb.mxu2 %v3814_v37  ;;  %v833_v24 = vsel %vm831_vm5, %v3805_v28, %v3815_v36 }
  0xaf   : > { %v939_v44 = vsel %vm938_vm4, %v3819_v41, %v3820_v40  ;;  %v940_v46 = vsel %vm938_vm4, %v3820_v40, %v3825_v39 }
  0xb0   : > { %3490 = vmatmul.msk.f32.vlgmr.msra.gmra.mxu1 %vm451_vm0, %v4276_v13  ;;  %3498 = vmatmul.msk.f32.vlgmr.msra.gmra.mxu0 %vm451_vm0, %v4402_v56 }
  0xb1   : > { %885 = vmatpush.msra.mxu1 %v835_v42  ;;  %992 = vmatpush.msra.mxu0 %v942_v43  ;;  %v3532_v43 = vld [vmem:[%s5522_s3 + $0x70] sm:$0xff] }
  0xb2   : > { %3504 = vmatmul.msk.f32.vlgmr.msra.gmra.mxu2 %vm451_vm0, %v4452_v20  ;;  %970 = vmatpush.msrb.mxu3 %v939_v44 }
  0xb3   : > { %886 = vmatpush.msra.mxu1 %v833_v24  ;;  %909 = vmatpush.msrb.mxu2 %v3815_v36  ;;  %v3828_v13 = vpop.permute.xlu0 %3827 }
  0xb4   : > { %993 = vmatpush.msra.mxu0 %v940_v46  ;;  %v3830_v49 = vunpack.i.h.bf16 %v3828_v13  ;;  %v3829_v50 = vunpack.i.l.bf16 %v3828_v13  ;;  %v3833_v51 = vpop.permute.xlu1 %3832  ;;  %v3883_v44 = vpop.permute.xlu2 %3882 }
  0xb5   : > { %3507 = vmatmul.msk.f32.gmra.mxu3 %vm451_vm0, %v4482_v47  ;;  %v3835_v53 = vunpack.i.h.bf16 %v3833_v51  ;;  %v3834_v54 = vunpack.i.l.bf16 %v3833_v51  ;;  %v3885_v45 = vunpack.i.h.bf16 %v3883_v44  ;;  %v3884_v46 = vunpack.i.l.bf16 %v3883_v44 }
  0xb6   : > { %v1048_v55 = vsel %vm1045_vm6, %v3829_v50, %v3830_v49 }
  0xb7   : > { %1076 = vmatpush.msra.mxu2 %v1048_v55  ;;  %v1049_v56 = vsel %vm1045_vm6, %v3830_v49, %v3834_v54  ;;  %v1046_v57 = vsel %vm1045_vm6, %v3835_v53, %v3839_v52  ;;  %v1463_v51 = vsel %vm440_vm1, %v3884_v46, %v3885_v45  ;;  %v3533_v55 = vld [vmem:[%s5522_s3 + $0x78] sm:$0xff] }
  0xb8   : > { %3491 = vmatmul.msk.f32.gmra.mxu1 %vm451_vm0, %v4324_v21  ;;  %3499 = vmatmul.msk.f32.gmra.mxu0 %vm451_vm0, %v4429_v11  ;;  %v4557_v11 = vld [vmem:[%s4541_s28 + $0x20] sm:$0xff] }
  0xb9   : > { %1099 = vmatpush.msra.mxu3 %v1049_v56  ;;  %1077 = vmatpush.msra.mxu2 %v1046_v57  ;;  %v4564_v19 = vpack.i.bf16 %v4560_v12, %v4557_v11  ;;  %v4593_v36 = vpack.i.bf16 %v4557_v11, %v4589_v35 }
  0xba   : > { %3505 = vmatmul.msk.f32.gmra.mxu2 %vm451_vm0, %v4482_v47 }
  0xbb   : > { %1100 = vmatpush.msra.mxu3 %v1047_v58  ;;  %v3843_v27 = vpop.permute.xlu0 %3842  ;;  %3992 = vrot.lane.b32.xlu0 %v4564_v19, %s4153_s12 }
  0xbc   : > { %v3845_v60 = vunpack.i.h.bf16 %v3843_v27  ;;  %v3848_v21 = vpop.permute.xlu1 %3847  ;;  %v3844_v62 = vunpack.i.l.bf16 %v3843_v27  ;;  %v3898_v58 = vpop.permute.xlu2 %3897 }
  0xbd   : > { %3518 = vmatmul.msk.f32.vlgmr.msrb.gmra.mxu3 %vm451_vm0, %v4504_v59  ;;  %v3850_v63 = vunpack.i.h.bf16 %v3848_v21  ;;  %v3849_v0 = vunpack.i.l.bf16 %v3848_v21 }
  0xbe   : > { %1229 = vmatpush.msrb.mxu3 %v3845_v60  ;;  %v1156_v29 = vsel %vm1152_vm7, %v3844_v62, %v3845_v60  ;;  %v1155_v31 = vsel %vm1152_vm7, %v3854_v9, %v3844_v62  ;;  %v3540_v60 = vld [vmem:[%s5522_s3 + $0x80] sm:$0xff] }
  0xbf   : > { %v1154_v5 = vsel %vm1152_vm7, %v3849_v0, %v3850_v63  ;;  %v1153_v33 = vsel %vm1152_vm7, %v3855_v2, %v3849_v0  ;;  %v4680_v0 = vld [vmem:[%s5522_s3 + $0x98] sm:$0xff] }
  0xc0   : > { %3502 = vmatmul.msk.f32.vlgmr.msrb.gmra.mxu1 %vm451_vm0, %v4452_v20  ;;  %3510 = vmatmul.msk.f32.vlgmr.msrb.gmra.mxu0 %vm451_vm0, %v3508_v61 }
  0xc1   : > { %1015 = vmatpush.msrb.mxu1 %v3824_v34  ;;  %1122 = vmatpush.msrb.mxu0 %v3834_v54  ;;  %v3870_v34 = vunpack.i.h.bf16 %v3868_v30 }
  0xc2   : > { %3514 = vmatmul.msk.f32.vlgmr.msrb.gmra.mxu2 %vm451_vm0, %v3508_v61  ;;  %1230 = vmatpush.msrb.mxu3 %v3850_v63 }
  0xc3   : > { %1016 = vmatpush.msrb.mxu1 %v3825_v39  ;;  %1123 = vmatpush.msrb.mxu0 %v3840_v48  ;;  %v4536_v7 = vpop.permute.xlu0 %3857  ;;  %v4602_v39 = vld [vmem:[%s4541_s28 + $0x10] sm:$0xff]  ;;  %v4626_v48 = vld [vmem:[%s4541_s28] sm:$0xff]  ;;  %s5384_s28 = scalar_lea.vmem %s5524_s5, %s3474_s8 }
  0xc4   : > { %1206 = vmatpush.msrb.mxu2 %v1156_v29  ;;  %v4546_v18 = vpop.permute.xlu1 %3862  ;;  %v3860_v4 = vunpack.i.h.bf16 %v4536_v7  ;;  %v3859_v10 = vunpack.i.l.bf16 %v4536_v7  ;;  %4007 = vrot.lane.b32.xlu0 %v4593_v36, %s4154_s13  ;;  %v4606_v40 = vpack.i.bf16 %v4602_v39, %v4599_v38  ;;  %v4619_v24 = vpack.i.bf16 %v4602_v39, %v4560_v12 }
  0xc5   : > { %3519 = vmatmul.msk.f32.gmra.mxu3 %vm451_vm0, %v4524_v1  ;;  %v3865_v25 = vunpack.i.h.bf16 %v4546_v18  ;;  %v3864_v28 = vunpack.i.l.bf16 %v4546_v18  ;;  %v4637_v53 = vpack.i.bf16 %v4599_v38, %v4626_v48  ;;  %v4661_v27 = vpack.i.bf16 %v4626_v48, %v4589_v35  ;;  %v3556_v18 = vld [vmem:[%s5522_s3 + $0xa0] sm:$0xff] }
  0xc6   : > { %1207 = vmatpush.msrb.mxu2 %v1154_v5  ;;  %v1262_v32 = vsel %vm1259_vm8, %v3859_v10, %v3860_v4  ;;  %3997 = vrot.lane.b32.xlu1 %v4606_v40, %s4153_s12  ;;  %v1263_v49 = vsel %vm1259_vm8, %v3860_v4, %v3869_v26  ;;  %v4692_v5 = vpack.i.bf16 %v4626_v48, %v4560_v12  ;;  %v3900_v10 = vunpack.i.h.bf16 %v3898_v58 }
  0xc7   : > { %v1260_v20 = vsel %vm1259_vm8, %v3864_v28, %v3865_v25  ;;  %v1261_v52 = vsel %vm1259_vm8, %v3865_v25, %v3870_v34  ;;  %4002 = vrot.lane.b32.xlu2 %v4661_v27, %s4153_s12 }
  0xc8   : > { %3503 = vmatmul.msk.f32.gmra.mxu1 %vm451_vm0, %v4482_v47  ;;  %3511 = vmatmul.msk.f32.gmra.mxu0 %vm451_vm0, %v3509_v6 }
  0xca   : > { %3515 = vmatmul.msk.f32.gmra.mxu2 %vm451_vm0, %v3509_v6 }
  0xcb   : > { %v3873_v37 = vpop.permute.xlu0 %3872 }
  0xcc   : > { %v3875_v41 = vunpack.i.h.bf16 %v3873_v37  ;;  %v3874_v13 = vunpack.i.l.bf16 %v3873_v37  ;;  %4022 = vrot.lane.b32.xlu0 %v4619_v24, %s4154_s13 }
  0xcd   : > { %3528 = vmatmul.msk.f32.vlgmr.msra.gmra.mxu3 %vm451_vm0, %v4552_v8 }
  0xce   : > { %1380 = vmatpush.msra.mxu3 %v4298_v14  ;;  %v3525_v14 = vld [vmem:[%s5522_s3 + $0x68] sm:$0xff]  ;;  %v1464_v54 = vsel %vm440_vm1, %v3874_v13, %v3875_v41  ;;  %4012 = vrot.lane.b32.xlu1 %v4637_v53, %s4154_s13 }
  0xcf   : > { %4017 = vrot.lane.b32.xlu2 %v4593_v36, %s4155_s14 }
  0xd0   : > { %3512 = vmatmul.msk.f32.vlgmr.msra.gmra.mxu1 %vm451_vm0, %v3508_v61  ;;  %3520 = vmatmul.msk.f32.vlgmr.msra.gmra.mxu0 %vm451_vm0, %v4504_v59 }
  0xd1   : > { %1183 = vmatpush.msra.mxu1 %v1155_v31  ;;  %1290 = vmatpush.msra.mxu0 %v1262_v32 }
  0xd2   : > { %3526 = vmatmul.msk.f32.vlgmr.msra.gmra.mxu2 %vm451_vm0, %v4552_v8  ;;  %1381 = vmatpush.msra.mxu3 %v4302_v16  ;;  %v3878_v16 = vpop.permute.xlu1 %3877 }
  0xd3   : > { %1184 = vmatpush.msra.mxu1 %v1153_v33  ;;  %1291 = vmatpush.msra.mxu0 %v1260_v20  ;;  %v3879_v42 = vunpack.i.l.bf16 %v3878_v16  ;;  %v3880_v50 = vunpack.i.h.bf16 %v3878_v16 }
  0xd4   : > { %1336 = vmatpush.msra.mxu2 %v3869_v26  ;;  %4037 = vrot.lane.b32.xlu0 %v4593_v36, %s4156_s15 }
  0xd5   : > { %3529 = vmatmul.msk.f32.gmra.mxu3 %vm451_vm0, %v3525_v14  ;;  %v1465_v47 = vsel %vm440_vm1, %v3875_v41, %v3879_v42  ;;  %v1462_v56 = vsel %vm440_vm1, %v3880_v50, %v3884_v46 }
  0xd6   : > { %1337 = vmatpush.msra.mxu2 %v3870_v34  ;;  %4027 = vrot.lane.b32.xlu1 %v4637_v53, %s4155_s14 }
  0xd7   : > { %4032 = vrot.lane.b32.xlu2 %v4619_v24, %s4155_s14 }
  0xd8   : > { %3513 = vmatmul.msk.f32.gmra.mxu1 %vm451_vm0, %v3509_v6  ;;  %3521 = vmatmul.msk.f32.gmra.mxu0 %vm451_vm0, %v4524_v1  ;;  %v3541_v6 = vld [vmem:[%s5522_s3 + $0x88] sm:$0xff] }
  0xda   : > { %3527 = vmatmul.msk.f32.gmra.mxu2 %vm451_vm0, %v3525_v14 }
  0xdc   : > { %4052 = vrot.lane.b32.xlu0 %v4564_v19, %s4157_s16  ;;  %v3557_v19 = vld [vmem:[%s5522_s3 + $0xa8] sm:$0xff] }
  0xdd   : > { %3538 = vmatmul.msk.f32.vlgmr.msrb.gmra.mxu3 %vm451_vm0, %v3532_v43 }
  0xde   : > { %1515 = vmatpush.msrb.mxu3 %v1465_v47  ;;  %4042 = vrot.lane.b32.xlu1 %v4692_v5, %s4156_s15  ;;  %v3564_v47 = vld [vmem:[%s5522_s3 + $0xb0] sm:$0xff] }
  0xdf   : > { %4047 = vrot.lane.b32.xlu2 %v4606_v40, %s4156_s15 }
  0xe0   : > { %3522 = vmatmul.msk.f32.vlgmr.msrb.gmra.mxu1 %vm451_vm0, %v4504_v59  ;;  %3530 = vmatmul.msk.f32.vlgmr.msrb.gmra.mxu0 %vm451_vm0, %v4552_v8  ;;  %v3893_v59 = vpop.permute.xlu1 %3892  ;;  %v3899_v8 = vunpack.i.l.bf16 %v3898_v58 }
  0xe1   : > { %1313 = vmatpush.msrb.mxu1 %v1263_v49  ;;  %1403 = vmatpush.msrb.mxu0 %v4300_v15  ;;  %v3888_v15 = vpop.permute.xlu0 %3887  ;;  %v3895_v61 = vunpack.i.h.bf16 %v3893_v59  ;;  %v3894_v62 = vunpack.i.l.bf16 %v3893_v59 }
  0xe2   : > { %3536 = vmatmul.msk.f32.vlgmr.msrb.gmra.mxu2 %vm451_vm0, %v3532_v43  ;;  %1516 = vmatpush.msrb.mxu3 %v1463_v51  ;;  %v3890_v57 = vunpack.i.h.bf16 %v3888_v15  ;;  %v3889_v21 = vunpack.i.l.bf16 %v3888_v15 }
  0xe3   : > { %1314 = vmatpush.msrb.mxu1 %v1261_v52  ;;  %1404 = vmatpush.msrb.mxu0 %v4328_v22  ;;  %v4657_v22 = vld [vmem:[%s5522_s3 + $0x90] sm:$0xff]  ;;  %v1568_v37 = vsel %vm617_vm2, %v3900_v10, %v3894_v62 }
  0xe4   : > { %1492 = vmatpush.msrb.mxu2 %v1464_v54  ;;  %v1571_v63 = vsel %vm617_vm2, %v3889_v21, %v3890_v57  ;;  %v1570_v33 = vsel %vm617_vm2, %v3899_v8, %v3889_v21  ;;  %4067 = vrot.lane.b32.xlu0 %v4593_v36, %s4158_s20 }
  0xe5   : > { %3539 = vmatmul.msk.f32.gmra.mxu3 %vm451_vm0, %v3533_v55 }
  0xe6   : > { %1493 = vmatpush.msrb.mxu2 %v1462_v56  ;;  %4057 = vrot.lane.b32.xlu1 %v4606_v40, %s4157_s16  ;;  %v4764_v56 = vpop.f32.mrf.mxu3 }
  0xe7   : > { %4062 = vrot.lane.b32.xlu2 %v4661_v27, %s4157_s16 }
  0xe8   : > { %3523 = vmatmul.msk.f32.gmra.mxu1 %vm451_vm0, %v4524_v1  ;;  %3531 = vmatmul.msk.f32.gmra.mxu0 %vm451_vm0, %v3525_v14  ;;  %v1569_v1 = vsel %vm617_vm2, %v3894_v62, %v3895_v61  ;;  %v4686_v3 = vpop.permute.xlu1 %3907 }
  0xe9   : > { %v4682_v29 = vpop.permute.xlu0 %3902  ;;  %v3910_v28 = vunpack.i.h.bf16 %v4686_v3  ;;  %v3909_v30 = vunpack.i.l.bf16 %v4686_v3 }
  0xea   : > { %3537 = vmatmul.msk.f32.gmra.mxu2 %vm451_vm0, %v3533_v55  ;;  %v3905_v9 = vunpack.i.h.bf16 %v4682_v29  ;;  %v3904_v4 = vunpack.i.l.bf16 %v4682_v29 }
  0xeb   : > { %v1674_v41 = vsel %vm724_vm3, %v3909_v30, %v3910_v28 }
  0xec   : > { %v1676_v20 = vsel %vm724_vm3, %v3904_v4, %v3905_v9  ;;  %4082 = vrot.lane.b32.xlu0 %v4619_v24, %s4158_s20 }
  0xed   : > { %3550 = vmatmul.msk.f32.vlgmr.msra.gmra.mxu3 %vm451_vm0, %v4657_v22 }
  0xee   : > { %1644 = vmatpush.msra.mxu3 %v3890_v57  ;;  %4072 = vrot.lane.b32.xlu1 %v4637_v53, %s4158_s20  ;;  %v553_v3 = vpop.f32.mrf.mxu3 }
  0xef   : > { %4077 = vrot.lane.b32.xlu2 %v4593_v36, %s4159_s30 }
  0xf0   : > { %3534 = vmatmul.msk.f32.vlgmr.msra.gmra.mxu1 %vm451_vm0, %v3532_v43  ;;  %3542 = vmatmul.msk.f32.vlgmr.msra.gmra.mxu0 %vm451_vm0, %v3540_v60  ;;  %v3923_v2 = vpop.permute.xlu1 %3922 }
  0xf1   : > { %1538 = vmatpush.msra.mxu0 %v3879_v42  ;;  %1426 = vmatpush.msra.mxu1 %v4304_v17  ;;  %v4688_v17 = vpop.permute.xlu2 %3912  ;;  %v3925_v31 = vunpack.i.h.bf16 %v3923_v2  ;;  %v3924_v32 = vunpack.i.l.bf16 %v3923_v2  ;;  %v3918_v26 = vpop.permute.xlu0 %3917 }
  0xf2   : > { %3546 = vmatmul.msk.f32.vlgmr.msra.gmra.mxu2 %vm451_vm0, %v3540_v60  ;;  %1645 = vmatpush.msra.mxu3 %v3895_v61  ;;  %v3914_v7 = vunpack.i.l.bf16 %v4688_v17  ;;  %v3919_v34 = vunpack.i.l.bf16 %v3918_v26  ;;  %v3920_v42 = vunpack.i.h.bf16 %v3918_v26 }
  0xf3   : > { %1539 = vmatpush.msra.mxu0 %v3885_v45  ;;  %1427 = vmatpush.msra.mxu1 %v4330_v23  ;;  %v3915_v23 = vunpack.i.h.bf16 %v4688_v17  ;;  %v1780_v14 = vsel %vm831_vm5, %v3924_v32, %v3925_v31 }
  0xf4   : > { %1621 = vmatpush.msra.mxu2 %v1571_v63  ;;  %v1677_v15 = vsel %vm724_vm3, %v3905_v9, %v3919_v34  ;;  %v1675_v59 = vsel %vm724_vm3, %v3910_v28, %v3920_v42  ;;  %v4821_v9 = vld [vmem:[%s5522_s3 + $0xc0] sm:$0xff]  ;;  %4097 = vrot.lane.b32.xlu0 %v4593_v36, %s4160_s18 }
  0xf5   : > { %3551 = vmatmul.msk.f32.gmra.mxu3 %vm451_vm0, %v4680_v0  ;;  %v1782_v25 = vsel %vm831_vm5, %v3914_v7, %v3915_v23  ;;  %v4885_v36 = vld [vmem:[%s5522_s3 + $0xe0] sm:$0xff] }
  0xf6   : > { %1622 = vmatpush.msra.mxu2 %v1569_v1  ;;  %4087 = vrot.lane.b32.xlu1 %v4637_v53, %s4159_s30  ;;  %v4845_v53 = vld [vmem:[%s5522_s3 + $0xd8] sm:$0xff] }
  0xf7   : > { %4092 = vrot.lane.b32.xlu2 %v4619_v24, %s4159_s30 }
  0xf8   : > { %3535 = vmatmul.msk.f32.gmra.mxu1 %vm451_vm0, %v3533_v55  ;;  %3543 = vmatmul.msk.f32.gmra.mxu0 %vm451_vm0, %v3541_v6  ;;  %v4740_v44 = vpop.permute.xlu1 %3937 }
  0xf9   : > { %v4732_v16 = vpop.permute.xlu2 %3927  ;;  %v3933_v43 = vpop.permute.xlu0 %3932  ;;  %v3939_v46 = vunpack.i.l.bf16 %v4740_v44  ;;  %v3940_v58 = vunpack.i.h.bf16 %v4740_v44 }
  0xfa   : > { %3547 = vmatmul.msk.f32.gmra.mxu2 %vm451_vm0, %v3541_v6  ;;  %v3935_v45 = vunpack.i.h.bf16 %v3933_v43  ;;  %v3929_v13 = vunpack.i.l.bf16 %v4732_v16  ;;  %v3930_v51 = vunpack.i.h.bf16 %v4732_v16  ;;  %v3934_v52 = vunpack.i.l.bf16 %v3933_v43 }
  0xfc   : > { %v1889_v50 = vsel %vm938_vm4, %v3935_v45, %v3939_v46  ;;  %v1783_v57 = vsel %vm831_vm5, %v3915_v23, %v3929_v13  ;;  %v1888_v21 = vsel %vm938_vm4, %v3934_v52, %v3935_v45  ;;  %v4807_v23 = vld [vmem:[%s5522_s3 + $0xd0] sm:$0xff] }
  0xfd   : > { %3560 = vmatmul.msk.f32.vlgmr.msrb.gmra.mxu3 %vm451_vm0, %v3556_v18 }
  0xfe   : > { %1810 = vmatpush.msrb.mxu3 %v1782_v25  ;;  %4102 = vrot.lane.b32.xlu1 %v4692_v5, %s4160_s18 }
  0xff   : > { %4107 = vrot.lane.b32.xlu2 %v4606_v40, %s4160_s18 }
 0x100   : > { %3544 = vmatmul.msk.f32.vlgmr.msrb.gmra.mxu1 %vm451_vm0, %v3540_v60  ;;  %3552 = vmatmul.msk.f32.vlgmr.msrb.gmra.mxu0 %vm451_vm0, %v4657_v22  ;;  %v1781_v60 = vsel %vm831_vm5, %v3925_v31, %v3930_v51 }
 0x101   : > { %1598 = vmatpush.msrb.mxu1 %v1570_v33  ;;  %1704 = vmatpush.msrb.mxu0 %v1676_v20  ;;  %v4755_v49 = vpop.permute.xlu2 %3942  ;;  %v4799_v17 = vpop.permute.xlu0 %3947 }
 0x102   : > { %3558 = vmatmul.msk.f32.vlgmr.msrb.gmra.mxu2 %vm451_vm0, %v3556_v18  ;;  %1811 = vmatpush.msrb.mxu3 %v1780_v14  ;;  %v3945_v54 = vunpack.i.h.bf16 %v4755_v49  ;;  %v3944_v55 = vunpack.i.l.bf16 %v4755_v49  ;;  %v3950_v7 = vunpack.i.h.bf16 %v4799_v17  ;;  %v3949_v4 = vunpack.i.l.bf16 %v4799_v17  ;;  %v4863_v14 = vld [vmem:[%s5522_s3 + $0xc8] sm:$0xff] }
 0x103   : > { %1599 = vmatpush.msrb.mxu1 %v1568_v37  ;;  %1705 = vmatpush.msrb.mxu0 %v1674_v41 }
 0x104   : > { %1750 = vmatpush.msrb.mxu2 %v3919_v34  ;;  %v1887_v61 = vsel %vm938_vm4, %v3944_v55, %v3945_v54  ;;  %v1886_v62 = vsel %vm938_vm4, %v3940_v58, %v3944_v55  ;;  %v1995_v27 = vsel %vm1045_vm6, %v3949_v4, %v3950_v7 }
 0x105   : > { %3561 = vmatmul.msk.f32.gmra.mxu3 %vm451_vm0, %v3557_v19 }
 0x106   : > { %1751 = vmatpush.msrb.mxu2 %v3920_v42 }
 0x108   : > { %3545 = vmatmul.msk.f32.gmra.mxu1 %vm451_vm0, %v3541_v6  ;;  %3553 = vmatmul.msk.f32.gmra.mxu0 %vm451_vm0, %v4680_v0  ;;  %v4801_v6 = vpop.permute.xlu1 %3952 }
 0x109   : > { %v3955_v2 = vunpack.i.h.bf16 %v4801_v6  ;;  %v3954_v25 = vunpack.i.l.bf16 %v4801_v6  ;;  %v4847_v31 = vpop.permute.xlu0 %3962 }
 0x10a   : > { %3559 = vmatmul.msk.f32.gmra.mxu2 %vm451_vm0, %v3557_v19  ;;  %v3965_v5 = vunpack.i.h.bf16 %v4847_v31  ;;  %v3964_v43 = vunpack.i.l.bf16 %v4847_v31 }
 0x10b   : > { %v1993_v32 = vsel %vm1045_vm6, %v3954_v25, %v3955_v2 }
 0x10c   : > { %v2100_v58 = vsel %vm1152_vm7, %v3964_v43, %v3965_v5 }
 0x10d   : > { %3570 = vmatmul.msk.f32.vlgmr.msra.gmra.mxu3 %vm451_vm0, %v3564_v47 }
 0x10e   : > { %1939 = vmatpush.msra.mxu3 %v1889_v50 }
 0x110   : > { %3554 = vmatmul.msk.f32.vlgmr.msra.gmra.mxu1 %vm451_vm0, %v4657_v22  ;;  %3562 = vmatmul.msk.f32.vlgmr.msra.gmra.mxu0 %vm451_vm0, %v3556_v18  ;;  %v3565_v22 = vld [vmem:[%s5522_s3 + $0xb8] sm:$0xff]  ;;  %v4810_v18 = vpop.permute.xlu2 %3957  ;;  %v4838_v30 = vpop.permute.xlu1 %3967 }
 0x111   : > { %1727 = vmatpush.msra.mxu1 %v1677_v15  ;;  %1833 = vmatpush.msra.mxu0 %v1783_v57  ;;  %v3959_v42 = vunpack.i.l.bf16 %v4810_v18  ;;  %v4896_v49 = vpop.permute.xlu0 %3977  ;;  %v3970_v50 = vunpack.i.h.bf16 %v4838_v30 }
 0x112   : > { %3568 = vmatmul.msk.f32.vlgmr.msra.gmra.mxu2 %vm451_vm0, %v3564_v47  ;;  %1940 = vmatpush.msra.mxu3 %v1887_v61 }
 0x113   : > { %1728 = vmatpush.msra.mxu1 %v1675_v59  ;;  %1834 = vmatpush.msra.mxu0 %v1781_v60  ;;  %v1994_v57 = vsel %vm1045_vm6, %v3959_v42, %v3949_v4 }
 0x114   : > { %1916 = vmatpush.msra.mxu2 %v1888_v21 }
 0x115   : > { %v4787_v63 = vpop.f32.mrf.mxu2  ;;  %v4789_v29 = vpop.f32.mrf.mxu0  ;;  %3571 = vmatmul.msk.f32.gmra.mxu3 %vm451_vm0, %v3565_v22 }
 0x116   : > { %v478_v1 = vpop.f32.mrf.mxu1  ;;  %1917 = vmatpush.msra.mxu2 %v1886_v62 }
 0x117   : > { %v554_v44 = vadd.f32 %v553_v3, %v478_v1  ;;  %v4929_v1 = vld [vmem:[%s5522_s3 + $0xe8] sm:$0xff]  ;;  %v3980_v3 = vunpack.i.h.bf16 %v4896_v49 }
 0x118   : > { %3555 = vmatmul.msk.f32.gmra.mxu1 %vm451_vm0, %v4680_v0  ;;  %3563 = vmatmul.msk.f32.gmra.mxu0 %vm451_vm0, %v3557_v19  ;;  %v4852_v26 = vpop.permute.xlu2 %3972  ;;  %v4878_v19 = vpop.permute.xlu1 %3982 }
 0x119   : > { %v3975_v37 = vunpack.i.h.bf16 %v4852_v26  ;;  %v3974_v16 = vunpack.i.l.bf16 %v4852_v26  ;;  %v3985_v45 = vunpack.i.h.bf16 %v4878_v19  ;;  %v2099_v31 = vsel %vm1152_vm7, %v3970_v50, %v3980_v3 }
 0x11a   : > { %3569 = vmatmul.msk.f32.gmra.mxu2 %vm451_vm0, %v3565_v22 }
 0x11d   : > { %v4812_v8 = vpop.f32.mrf.mxu2  ;;  %v4814_v0 = vpop.f32.mrf.mxu0  ;;  %3582 = vmatmul.msk.f32.vlgmr.msrb.gmra.mxu3 %vm451_vm0, %v4807_v23 }
 0x11e   : > { %v498_v10 = vpop.f32.mrf.mxu1  ;;  %2068 = vmatpush.msrb.mxu3 %v3950_v7 }
 0x11f   : > { %v574_v21 = vadd.f32 %v4814_v0, %v498_v10 }
 0x120   : > { %v4830_v28 = vpop.f32.mrf.mxu3  ;;  %3566 = vmatmul.msk.f32.vlgmr.msrb.gmra.mxu1 %vm451_vm0, %v3564_v47  ;;  %3574 = vmatmul.msk.f32.vlgmr.msrb.gmra.mxu0 %vm451_vm0, %v4821_v9  ;;  %v2206_v47 = vsel %vm1259_vm8, %v3974_v16, %v3975_v37  ;;  %v4938_v10 = vpop.permute.xlu2 %3987 }
 0x121   : > { %1856 = vmatpush.msrb.mxu1 %v3929_v13  ;;  %1962 = vmatpush.msrb.mxu0 %v3939_v46  ;;  %v3984_v46 = vunpack.i.l.bf16 %v4878_v19  ;;  %v3960_v13 = vunpack.i.h.bf16 %v4810_v18  ;;  %v704_v6 = vadd.f32 %v4830_v28, %v574_v21 }
 0x122   : > { %3578 = vmatmul.msk.f32.vlgmr.msrb.gmra.mxu2 %vm451_vm0, %v4821_v9  ;;  %2069 = vmatpush.msrb.mxu3 %v3955_v2 }
 0x123   : > { %1857 = vmatpush.msrb.mxu1 %v3930_v51  ;;  %1963 = vmatpush.msrb.mxu0 %v3945_v54  ;;  %v3969_v51 = vunpack.i.l.bf16 %v4838_v30  ;;  %v2204_v60 = vsel %vm1259_vm8, %v3984_v46, %v3985_v45  ;;  %v1992_v62 = vsel %vm1045_vm6, %v3960_v13, %v3954_v25 }
 0x124   : > { %2045 = vmatpush.msrb.mxu2 %v1995_v27  ;;  %v3596_v27 = vld [vmem:[%s5522_s3 + $0xf0] sm:$0xff] }
 0x125   : > { %v4854_v33 = vpop.f32.mrf.mxu2  ;;  %v4856_v20 = vpop.f32.mrf.mxu0  ;;  %3583 = vmatmul.msk.f32.gmra.mxu3 %vm451_vm0, %v4845_v53  ;;  %v2098_v24 = vsel %vm1152_vm7, %v3969_v51, %v3970_v50 }
 0x126   : > { %v501_v34 = vpop.f32.mrf.mxu1  ;;  %2046 = vmatpush.msrb.mxu2 %v1993_v32  ;;  %v551_v32 = vadd.f32 %v4764_v56, %v4789_v29 }
 0x127   : > { %v577_v2 = vadd.f32 %v4856_v20, %v501_v34  ;;  %v3990_v34 = vunpack.i.h.bf16 %v4938_v10 }
 0x128   : > { %v4873_v41 = vpop.f32.mrf.mxu3  ;;  %3567 = vmatmul.msk.f32.gmra.mxu1 %vm451_vm0, %v3565_v22  ;;  %3575 = vmatmul.msk.f32.gmra.mxu0 %vm451_vm0, %v4863_v14  ;;  %v3979_v22 = vunpack.i.l.bf16 %v4896_v49  ;;  %v703_v16 = vadd.f32 %v4854_v33, %v551_v32  ;;  %v5010_v13 = vpop.permute.xlu2 %4002 }
 0x129   : > { %v2205_v26 = vsel %vm1259_vm8, %v3985_v45, %v3990_v34  ;;  %v5007_v45 = vld [vmem:[%s5522_s3 + $0x110] sm:$0xff] }
 0x12a   : > { %3579 = vmatmul.msk.f32.gmra.mxu2 %vm451_vm0, %v4863_v14 }
 0x12d   : > { %v654_v52 = vpop.f32.mrf.mxu2  ;;  %3592 = vmatmul.msk.f32.vlgmr.msra.gmra.mxu3 %vm451_vm0, %v4885_v36  ;;  %v697_v54 = vpop.f32.mrf.mxu0 }
 0x12e   : > { %v4902_v55 = vadd.f32 %v654_v52, %v554_v44  ;;  %v596_v15 = vpop.f32.mrf.mxu1  ;;  %2234 = vmatpush.msra.mxu3 %v2206_v47  ;;  %v2101_v47 = vsel %vm1152_vm7, %v3965_v5, %v3979_v22  ;;  %v4996_v5 = vpop.permute.xlu0 %3992  ;;  %v5019_v52 = vld [vmem:[%s5522_s3 + $0x100] sm:$0xff] }
 0x12f   : > { %v597_v59 = vadd.f32 %v596_v15, %v4787_v63 }
 0x130   : > { %3576 = vmatmul.msk.f32.vlgmr.msra.gmra.mxu1 %vm451_vm0, %v4821_v9  ;;  %v804_v61 = vpop.f32.mrf.mxu3  ;;  %3584 = vmatmul.msk.f32.vlgmr.msra.gmra.mxu0 %vm451_vm0, %v4807_v23 }
 0x131   : > { %v705_v63 = vadd.f32 %v697_v54, %v597_v59  ;;  %2022 = vmatpush.msra.mxu1 %v1994_v57  ;;  %2128 = vmatpush.msra.mxu0 %v2100_v58  ;;  %v3994_v54 = vunpack.i.l.bf16 %v4996_v5 }
 0x132   : > { %3590 = vmatmul.msk.f32.vlgmr.msra.gmra.mxu2 %vm451_vm0, %v4885_v36  ;;  %2235 = vmatpush.msra.mxu3 %v2204_v60 }
 0x133   : > { %v812_v17 = vadd.f32 %v804_v61, %v705_v63  ;;  %2023 = vmatpush.msra.mxu1 %v1992_v62  ;;  %2129 = vmatpush.msra.mxu0 %v2098_v24  ;;  %v5049_v63 = vpop.permute.xlu2 %4017 }
 0x134   : > { %2174 = vmatpush.msra.mxu2 %v3979_v22  ;;  %v5039_v22 = vld [vmem:[%s5522_s3 + $0x118] sm:$0xff] }
 0x135   : > { %v781_v7 = vpop.f32.mrf.mxu2  ;;  %3593 = vmatmul.msk.f32.gmra.mxu3 %vm451_vm0, %v4929_v1  ;;  %v700_v18 = vpop.f32.mrf.mxu0 }
 0x136   : > { %v4935_v0 = vadd.f32 %v781_v7, %v704_v6  ;;  %v599_v9 = vpop.f32.mrf.mxu1  ;;  %2175 = vmatpush.msra.mxu2 %v3980_v3  ;;  %v5041_v62 = vpop.permute.xlu0 %4007 }
 0x137   : > { %v600_v4 = vadd.f32 %v599_v9, %v4812_v8  ;;  %v3989_v8 = vunpack.i.l.bf16 %v4938_v10  ;;  %v4019_v9 = vunpack.i.l.bf16 %v5049_v63 }
 0x138   : > { %3577 = vmatmul.msk.f32.gmra.mxu1 %vm451_vm0, %v4863_v14  ;;  %v807_v25 = vpop.f32.mrf.mxu3  ;;  %3585 = vmatmul.msk.f32.gmra.mxu0 %vm451_vm0, %v4845_v53  ;;  %v707_v14 = vadd.f32 %v4873_v41, %v577_v2  ;;  %v5012_v50 = vpop.permute.xlu1 %3997  ;;  %v5070_v2 = vld [vmem:[%s5522_s3 + $0x120] sm:$0xff] }
 0x139   : > { %v708_v28 = vadd.f32 %v700_v18, %v600_v4  ;;  %v2207_v56 = vsel %vm1259_vm8, %v3975_v37, %v3989_v8  ;;  %v4000_v57 = vunpack.i.h.bf16 %v5012_v50  ;;  %v3999_v59 = vunpack.i.l.bf16 %v5012_v50 }
 0x13a   : > { %3591 = vmatmul.msk.f32.gmra.mxu2 %vm451_vm0, %v4929_v1 }
 0x13b   : > { %v815_v20 = vadd.f32 %v807_v25, %v708_v28  ;;  %v4004_v25 = vunpack.i.l.bf16 %v5010_v13  ;;  %v4010_v28 = vunpack.i.h.bf16 %v5041_v62 }
 0x13d   : > { %v784_v42 = vpop.f32.mrf.mxu2  ;;  %3602 = vmatmul.msk.f32.vlgmr.msrb.gmra.mxu3 %vm451_vm0, %v3596_v27  ;;  %v865_v43 = vpop.f32.mrf.mxu0 }
 0x13e   : > { %v4957_v44 = vadd.f32 %v784_v42, %v707_v14  ;;  %v758_v46 = vpop.f32.mrf.mxu1  ;;  %2347 = vmatpush.msrb.mxu3 %v4557_v11  ;;  %v4984_v11 = vld [vmem:[%s5522_s3 + $0xf8] sm:$0xff]  ;;  %v5079_v14 = vpop.permute.xlu0 %4022 }
 0x13f   : > { %v810_v29 = vadd.f32 %v758_v46, %v703_v16 }
 0x140   : > { %3586 = vmatmul.msk.f32.vlgmr.msrb.gmra.mxu1 %vm451_vm0, %v4807_v23  ;;  %v972_v33 = vpop.f32.mrf.mxu3  ;;  %3594 = vmatmul.msk.f32.vlgmr.msrb.gmra.mxu0 %vm451_vm0, %v4885_v36  ;;  %v5058_v18 = vpop.permute.xlu1 %4012 }
 0x141   : > { %v917_v37 = vadd.f32 %v865_v43, %v810_v29  ;;  %2151 = vmatpush.msrb.mxu1 %v2101_v47  ;;  %2257 = vmatpush.msrb.mxu0 %v2207_v56  ;;  %v4014_v16 = vunpack.i.l.bf16 %v5058_v18  ;;  %v2408_v47 = vsel %vm440_vm1, %v4004_v25, %v3994_v54 }
 0x142   : > { %3600 = vmatmul.msk.f32.vlgmr.msrb.gmra.mxu2 %vm451_vm0, %v3596_v27  ;;  %2348 = vmatpush.msrb.mxu3 %v4599_v38 }
 0x143   : > { %v1024_v23 = vadd.f32 %v972_v33, %v917_v37  ;;  %2152 = vmatpush.msrb.mxu1 %v2099_v31  ;;  %2258 = vmatpush.msrb.mxu0 %v2205_v26 }
 0x144   : > { %2324 = vmatpush.msrb.mxu2 %v4589_v35 }
 0x145   : > { %v911_v30 = vpop.f32.mrf.mxu2  ;;  %3603 = vmatmul.msk.f32.gmra.mxu3 %vm451_vm0, %v4984_v11  ;;  %v868_v41 = vpop.f32.mrf.mxu0 }
 0x146   : > { %v4992_v19 = vadd.f32 %v911_v30, %v812_v17  ;;  %v761_v36 = vpop.f32.mrf.mxu1  ;;  %2325 = vmatpush.msrb.mxu2 %v4626_v48  ;;  %v3995_v48 = vunpack.i.h.bf16 %v4996_v5  ;;  %v3605_v17 = vld [vmem:[%s5522_s3 + $0x108] sm:$0xff] }
 0x147   : > { %v813_v38 = vadd.f32 %v761_v36, %v4902_v55  ;;  %v5111_v36 = vld [vmem:[%s5522_s3 + $0x128] sm:$0xff] }
 0x148   : > { %3587 = vmatmul.msk.f32.gmra.mxu1 %vm451_vm0, %v4845_v53  ;;  %v975_v35 = vpop.f32.mrf.mxu3  ;;  %3595 = vmatmul.msk.f32.gmra.mxu0 %vm451_vm0, %v4929_v1  ;;  %v2409_v61 = vsel %vm440_vm1, %v3994_v54, %v3995_v48  ;;  %v5091_v29 = vpop.permute.xlu1 %4027 }
 0x149   : > { %v920_v40 = vadd.f32 %v868_v41, %v813_v38  ;;  %v4030_v31 = vunpack.i.h.bf16 %v5091_v29  ;;  %v4029_v26 = vunpack.i.l.bf16 %v5091_v29  ;;  %v4025_v38 = vunpack.i.h.bf16 %v5079_v14 }
 0x14a   : > { %3601 = vmatmul.msk.f32.gmra.mxu2 %vm451_vm0, %v4984_v11 }
 0x14b   : > { %v1027_v49 = vadd.f32 %v975_v35, %v920_v40  ;;  %v5114_v35 = vpop.permute.xlu2 %4032 }
 0x14d   : > { %v914_v53 = vpop.f32.mrf.mxu2  ;;  %3614 = vmatmul.msk.f32.vlgmr.msra.gmra.mxu3 %vm451_vm0, %v5007_v45  ;;  %v995_v51 = vpop.f32.mrf.mxu0 }
 0x14e   : > { %v5022_v55 = vadd.f32 %v914_v53, %v815_v20  ;;  %v888_v15 = vpop.f32.mrf.mxu1  ;;  %2482 = vmatpush.msra.mxu3 %v3995_v48  ;;  %v4005_v20 = vunpack.i.h.bf16 %v5010_v13 }
 0x14f   : > { %v918_v58 = vadd.f32 %v888_v15, %v4935_v0  ;;  %v4020_v0 = vunpack.i.h.bf16 %v5049_v63 }
 0x150   : > { %3598 = vmatmul.msk.f32.vlgmr.msra.gmra.mxu1 %vm451_vm0, %v3596_v27  ;;  %v1102_v60 = vpop.f32.mrf.mxu3  ;;  %3606 = vmatmul.msk.f32.vlgmr.msra.gmra.mxu0 %vm451_vm0, %v5019_v52  ;;  %v4009_v27 = vunpack.i.l.bf16 %v5041_v62  ;;  %v5125_v15 = vpop.permute.xlu1 %4042 }
 0x151   : > { %v1025_v21 = vadd.f32 %v995_v51, %v918_v58  ;;  %2280 = vmatpush.msra.mxu1 %v3989_v8  ;;  %2370 = vmatpush.msra.mxu0 %v4560_v12  ;;  %v2407_v12 = vsel %vm440_vm1, %v3999_v59, %v4000_v57  ;;  %v2620_v32 = vsel %vm724_vm3, %v4019_v9, %v4020_v0  ;;  %v4038_v51 = vpop.permute.xlu0 %4037  ;;  %v4044_v58 = vunpack.i.l.bf16 %v5125_v15 }
 0x152   : > { %3610 = vmatmul.msk.f32.vlgmr.msra.gmra.mxu2 %vm451_vm0, %v5019_v52  ;;  %2483 = vmatpush.msra.mxu3 %v4000_v57  ;;  %v2514_v56 = vsel %vm617_vm2, %v4009_v27, %v4010_v28  ;;  %v4040_v54 = vunpack.i.h.bf16 %v4038_v51  ;;  %v5132_v57 = vld [vmem:[%s5522_s3 + $0x130] sm:$0xff]  ;;  %v4045_v9 = vunpack.i.h.bf16 %v5125_v15 }
 0x153   : > { %v5043_v24 = vadd.f32 %v1102_v60, %v1025_v21  ;;  %2281 = vmatpush.msra.mxu1 %v3990_v34  ;;  %2371 = vmatpush.msra.mxu0 %v4602_v39  ;;  %v4015_v34 = vunpack.i.h.bf16 %v5058_v18  ;;  %v4035_v60 = vunpack.i.h.bf16 %v5114_v35  ;;  %v5174_v18 = vld [vmem:[%s5522_s3 + $0x138] sm:$0xff] }
 0x154   : > { %2459 = vmatpush.msra.mxu2 %v2409_v61  ;;  %v2727_v21 = vsel %vm831_vm5, %v4040_v54, %v4044_v58 }
 0x155   : > { %v1079_v1 = vpop.f32.mrf.mxu2  ;;  %3615 = vmatmul.msk.f32.gmra.mxu3 %vm451_vm0, %v5039_v22  ;;  %v998_v3 = vpop.f32.mrf.mxu0  ;;  %v2512_v30 = vsel %vm617_vm2, %v4014_v16, %v4015_v34  ;;  %v2513_v62 = vsel %vm617_vm2, %v4015_v34, %v4025_v38  ;;  %v2619_v63 = vsel %vm724_vm3, %v4030_v31, %v4035_v60 }
 0x156   : > { %v5056_v6 = vadd.f32 %v1079_v1, %v1024_v23  ;;  %v891_v7 = vpop.f32.mrf.mxu1  ;;  %2460 = vmatpush.msra.mxu2 %v2407_v12  ;;  %v2406_v23 = vsel %vm440_vm1, %v4005_v20, %v3999_v59  ;;  %v4039_v12 = vunpack.i.l.bf16 %v4038_v51  ;;  %v3637_v51 = vld [vmem:[%s5522_s3 + $0x148] sm:$0xff] }
 0x157   : > { %v921_v39 = vadd.f32 %v891_v7, %v4957_v44 }
 0x158   : > { %3599 = vmatmul.msk.f32.gmra.mxu1 %vm451_vm0, %v4984_v11  ;;  %v1105_v4 = vpop.f32.mrf.mxu3  ;;  %3607 = vmatmul.msk.f32.gmra.mxu0 %vm451_vm0, %v3605_v17  ;;  %v4024_v11 = vunpack.i.l.bf16 %v5079_v14  ;;  %v5199_v29 = vpop.permute.xlu1 %4057 }
 0x159   : > { %v1028_v10 = vadd.f32 %v998_v3, %v921_v39  ;;  %v5183_v16 = vpop.permute.xlu0 %4052 }
 0x15a   : > { %3611 = vmatmul.msk.f32.gmra.mxu2 %vm451_vm0, %v3605_v17 }
 0x15b   : > { %v1135_v8 = vadd.f32 %v1105_v4, %v1028_v10  ;;  %v5154_v4 = vpop.permute.xlu2 %4047 }
 0x15d   : > { %v1082_v42 = vpop.f32.mrf.mxu2  ;;  %3624 = vmatmul.msk.f32.vlgmr.msrb.gmra.mxu3 %vm451_vm0, %v5070_v2  ;;  %v1125_v43 = vpop.f32.mrf.mxu0 }
 0x15e   : > { %v5085_v44 = vadd.f32 %v1082_v42, %v1027_v49  ;;  %v1018_v46 = vpop.f32.mrf.mxu1  ;;  %2648 = vmatpush.msrb.mxu3 %v2620_v32 }
 0x15f   : > { %v1026_v33 = vadd.f32 %v1018_v46, %v4992_v19  ;;  %v2618_v19 = vsel %vm724_vm3, %v4029_v26, %v4030_v31  ;;  %v5194_v46 = vld [vmem:[%s5522_s3 + $0x150] sm:$0xff]  ;;  %v3636_v31 = vld [vmem:[%s5522_s3 + $0x140] sm:$0xff]  ;;  %v4054_v26 = vunpack.i.l.bf16 %v5183_v16 }
 0x160   : > { %3608 = vmatmul.msk.f32.vlgmr.msrb.gmra.mxu1 %vm451_vm0, %v5019_v52  ;;  %v1232_v37 = vpop.f32.mrf.mxu3  ;;  %3616 = vmatmul.msk.f32.vlgmr.msrb.gmra.mxu0 %vm451_vm0, %v5007_v45 }
 0x161   : > { %v1133_v41 = vadd.f32 %v1125_v43, %v1026_v33  ;;  %2436 = vmatpush.msrb.mxu1 %v2408_v47  ;;  %2542 = vmatpush.msrb.mxu0 %v2514_v56 }
 0x162   : > { %3622 = vmatmul.msk.f32.vlgmr.msrb.gmra.mxu2 %vm451_vm0, %v5070_v2  ;;  %2649 = vmatpush.msrb.mxu3 %v2618_v19 }
 0x163   : > { %v1240_v5 = vadd.f32 %v1232_v37, %v1133_v41  ;;  %2437 = vmatpush.msrb.mxu1 %v2406_v23  ;;  %2543 = vmatpush.msrb.mxu0 %v2512_v30  ;;  %v5197_v47 = vpop.permute.xlu2 %4062  ;;  %v4060_v23 = vunpack.i.h.bf16 %v5199_v29  ;;  %v4059_v41 = vunpack.i.l.bf16 %v5199_v29 }
 0x164   : > { %2588 = vmatpush.msrb.mxu2 %v4024_v11 }
 0x165   : > { %v1209_v40 = vpop.f32.mrf.mxu2  ;;  %3625 = vmatmul.msk.f32.gmra.mxu3 %vm451_vm0, %v5111_v36  ;;  %v1128_v48 = vpop.f32.mrf.mxu0 }
 0x166   : > { %v5119_v13 = vadd.f32 %v1209_v40, %v5043_v24  ;;  %v1021_v49 = vpop.f32.mrf.mxu1  ;;  %2589 = vmatpush.msrb.mxu2 %v4025_v38  ;;  %v5226_v40 = vpop.permute.xlu0 %4067 }
 0x167   : > { %v1029_v50 = vadd.f32 %v1021_v49, %v5022_v55  ;;  %v4034_v55 = vunpack.i.l.bf16 %v5114_v35 }
 0x168   : > { %3609 = vmatmul.msk.f32.gmra.mxu1 %vm451_vm0, %v3605_v17  ;;  %v1235_v53 = vpop.f32.mrf.mxu3  ;;  %3617 = vmatmul.msk.f32.gmra.mxu0 %vm451_vm0, %v5039_v22  ;;  %v2515_v17 = vsel %vm617_vm2, %v4010_v28, %v4024_v11 }
 0x169   : > { %v1136_v52 = vadd.f32 %v1128_v48, %v1029_v50  ;;  %v2621_v7 = vsel %vm724_vm3, %v4020_v0, %v4034_v55  ;;  %v4049_v0 = vunpack.i.l.bf16 %v5154_v4 }
 0x16a   : > { %3623 = vmatmul.msk.f32.gmra.mxu2 %vm451_vm0, %v5111_v36 }
 0x16b   : > { %v1243_v59 = vadd.f32 %v1235_v53, %v1136_v52  ;;  %v2724_v27 = vsel %vm831_vm5, %v4045_v9, %v4049_v0  ;;  %v5233_v49 = vpop.permute.xlu2 %4077 }
 0x16c   : > { %v4080_v15 = vunpack.i.h.bf16 %v5233_v49 }
 0x16d   : > { %v1212_v61 = vpop.f32.mrf.mxu2  ;;  %3634 = vmatmul.msk.f32.vlgmr.msra.gmra.mxu3 %vm451_vm0, %v5132_v57  ;;  %v1293_v24 = vpop.f32.mrf.mxu0 }
 0x16e   : > { %v5142_v1 = vadd.f32 %v1212_v61, %v1135_v8  ;;  %v1186_v3 = vpop.f32.mrf.mxu1  ;;  %2777 = vmatpush.msra.mxu3 %v2727_v21  ;;  %v4064_v21 = vunpack.i.l.bf16 %v5197_v47  ;;  %v4070_v61 = vunpack.i.h.bf16 %v5226_v40 }
 0x16f   : > { %v1238_v39 = vadd.f32 %v1186_v3, %v5056_v6  ;;  %v4050_v6 = vunpack.i.h.bf16 %v5154_v4  ;;  %v4065_v3 = vunpack.i.h.bf16 %v5197_v47 }
 0x170   : > { %3618 = vmatmul.msk.f32.vlgmr.msra.gmra.mxu1 %vm451_vm0, %v5007_v45  ;;  %v1383_v10 = vpop.f32.mrf.mxu3  ;;  %3626 = vmatmul.msk.f32.vlgmr.msra.gmra.mxu0 %vm451_vm0, %v5070_v2  ;;  %v2726_v45 = vsel %vm831_vm5, %v4039_v12, %v4040_v54 }
 0x171   : > { %v1345_v25 = vadd.f32 %v1293_v24, %v1238_v39  ;;  %2565 = vmatpush.msra.mxu1 %v2515_v17  ;;  %2671 = vmatpush.msra.mxu0 %v2621_v7  ;;  %v2725_v2 = vsel %vm831_vm5, %v4049_v0, %v4050_v6  ;;  %v4069_v24 = vunpack.i.l.bf16 %v5226_v40  ;;  %v5263_v17 = vpop.permute.xlu0 %4082 }
 0x172   : > { %3632 = vmatmul.msk.f32.vlgmr.msra.gmra.mxu2 %vm451_vm0, %v5132_v57  ;;  %2778 = vmatpush.msra.mxu3 %v2725_v2 }
 0x173   : > { %v1435_v28 = vadd.f32 %v1383_v10, %v1345_v25  ;;  %2566 = vmatpush.msra.mxu1 %v2513_v62  ;;  %2672 = vmatpush.msra.mxu0 %v2619_v63  ;;  %v2832_v63 = vsel %vm938_vm4, %v4064_v21, %v4054_v26 }
 0x174   : > { %2754 = vmatpush.msra.mxu2 %v2726_v45  ;;  %v4084_v45 = vunpack.i.l.bf16 %v5263_v17 }
 0x175   : > { %v1339_v8 = vpop.f32.mrf.mxu2  ;;  %3635 = vmatmul.msk.f32.gmra.mxu3 %vm451_vm0, %v5174_v18  ;;  %v1296_v32 = vpop.f32.mrf.mxu0 }
 0x176   : > { %v5180_v20 = vadd.f32 %v1339_v8, %v1240_v5  ;;  %v1189_v14 = vpop.f32.mrf.mxu1  ;;  %2755 = vmatpush.msra.mxu2 %v2724_v27  ;;  %v5224_v5 = vld [vmem:[%s5522_s3 + $0x158] sm:$0xff] }
 0x177   : > { %v1241_v34 = vadd.f32 %v1189_v14, %v5085_v44  ;;  %v4055_v44 = vunpack.i.h.bf16 %v5183_v16  ;;  %v4085_v14 = vunpack.i.h.bf16 %v5263_v17 }
 0x178   : > { %3619 = vmatmul.msk.f32.gmra.mxu1 %vm451_vm0, %v5039_v22  ;;  %v1386_v42 = vpop.f32.mrf.mxu3  ;;  %3627 = vmatmul.msk.f32.gmra.mxu0 %vm451_vm0, %v5111_v36 }
 0x179   : > { %v1348_v43 = vadd.f32 %v1296_v32, %v1241_v34  ;;  %v2833_v38 = vsel %vm938_vm4, %v4054_v26, %v4055_v44 }
 0x17a   : > { %3633 = vmatmul.msk.f32.gmra.mxu2 %vm451_vm0, %v5174_v18 }
 0x17b   : > { %v1438_v56 = vadd.f32 %v1386_v42, %v1348_v43  ;;  %v5295_v42 = vpop.permute.xlu2 %4092 }
 0x17d   : > { %v1342_v22 = vpop.f32.mrf.mxu2  ;;  %3646 = vmatmul.msk.f32.vlgmr.msrb.gmra.mxu3 %vm451_vm0, %v5194_v46  ;;  %v1406_v33 = vpop.f32.mrf.mxu0 }
 0x17e   : > { %v5207_v37 = vadd.f32 %v1342_v22, %v1243_v59  ;;  %v1316_v11 = vpop.f32.mrf.mxu1  ;;  %2906 = vmatpush.msrb.mxu3 %v4055_v44 }
 0x17f   : > { %v1346_v30 = vadd.f32 %v1316_v11, %v5119_v13  ;;  %v2831_v13 = vsel %vm938_vm4, %v4059_v41, %v4060_v23 }
 0x180   : > { %3630 = vmatmul.msk.f32.vlgmr.msrb.gmra.mxu1 %vm451_vm0, %v5132_v57  ;;  %v1518_v19 = vpop.f32.mrf.mxu3  ;;  %3638 = vmatmul.msk.f32.vlgmr.msrb.gmra.mxu0 %vm451_vm0, %v3636_v31  ;;  %v4079_v57 = vunpack.i.l.bf16 %v5233_v49 }
 0x181   : > { %v1436_v36 = vadd.f32 %v1406_v33, %v1346_v30  ;;  %2694 = vmatpush.msrb.mxu1 %v4034_v55  ;;  %2800 = vmatpush.msrb.mxu0 %v4044_v58  ;;  %v5248_v58 = vpop.permute.xlu1 %4072  ;;  %v4098_v33 = vpop.permute.xlu0 %4097 }
 0x182   : > { %3642 = vmatmul.msk.f32.vlgmr.msrb.gmra.mxu2 %vm451_vm0, %v3636_v31  ;;  %2907 = vmatpush.msrb.mxu3 %v4060_v23  ;;  %v4075_v7 = vunpack.i.h.bf16 %v5248_v58  ;;  %v4074_v39 = vunpack.i.l.bf16 %v5248_v58  ;;  %v4100_v26 = vunpack.i.h.bf16 %v4098_v33  ;;  %v5313_v23 = vld [vmem:[%s5522_s3 + $0x170] sm:$0xff] }
 0x183   : > { %v5228_v48 = vadd.f32 %v1518_v19, %v1436_v36  ;;  %2695 = vmatpush.msrb.mxu1 %v4035_v60  ;;  %2801 = vmatpush.msrb.mxu0 %v4050_v6  ;;  %v5254_v60 = vld [vmem:[%s5522_s3 + $0x160] sm:$0xff]  ;;  %v2938_v6 = vsel %vm1045_vm6, %v4069_v24, %v4070_v61  ;;  %v4095_v19 = vunpack.i.h.bf16 %v5295_v42 }
 0x184   : > { %2883 = vmatpush.msrb.mxu2 %v2833_v38  ;;  %v2937_v49 = vsel %vm1045_vm6, %v4075_v7, %v4085_v14 }
 0x185   : > { %v1495_v50 = vpop.f32.mrf.mxu2  ;;  %3647 = vmatmul.msk.f32.gmra.mxu3 %vm451_vm0, %v5224_v5  ;;  %v1409_v53 = vpop.f32.mrf.mxu0 }
 0x186   : > { %v5240_v52 = vadd.f32 %v1495_v50, %v1435_v28  ;;  %v1319_v54 = vpop.f32.mrf.mxu1  ;;  %2884 = vmatpush.msrb.mxu2 %v2831_v13  ;;  %v2936_v28 = vsel %vm1045_vm6, %v4074_v39, %v4075_v7  ;;  %v4099_v13 = vunpack.i.l.bf16 %v4098_v33 }
 0x187   : > { %v1349_v35 = vadd.f32 %v1319_v54, %v5142_v1  ;;  %v3044_v1 = vsel %vm1152_vm7, %v4079_v57, %v4080_v15 }
 0x188   : > { %3631 = vmatmul.msk.f32.gmra.mxu1 %vm451_vm0, %v5174_v18  ;;  %v1521_v55 = vpop.f32.mrf.mxu3  ;;  %3639 = vmatmul.msk.f32.gmra.mxu0 %vm451_vm0, %v3637_v51  ;;  %v2830_v18 = vsel %vm938_vm4, %v4065_v3, %v4059_v41 }
 0x189   : > { %v1439_v59 = vadd.f32 %v1409_v53, %v1349_v35  ;;  %v4088_v2 = vpop.permute.xlu1 %4087  ;;  %v5333_v35 = vpop.permute.xlu2 %4107 }
 0x18a   : > { %3643 = vmatmul.msk.f32.gmra.mxu2 %vm451_vm0, %v3637_v51  ;;  %v4090_v8 = vunpack.i.h.bf16 %v4088_v2  ;;  %v4089_v32 = vunpack.i.l.bf16 %v4088_v2  ;;  %v4109_v21 = vunpack.i.l.bf16 %v5333_v35 }
 0x18b   : > { %v1551_v12 = vadd.f32 %v1521_v55, %v1439_v59  ;;  %v4110_v59 = vunpack.i.h.bf16 %v5333_v35 }
 0x18c   : > { %v3042_v16 = vsel %vm1152_vm7, %v4089_v32, %v4090_v8  ;;  %v3258_v32 = vld [vmem:[%s5384_s28 + $0x8] sm:$0xff] }
 0x18d   : > { %v1498_v9 = vpop.f32.mrf.mxu2  ;;  %3656 = vmatmul.msk.f32.vlgmr.msra.gmra.mxu3 %vm451_vm0, %v5254_v60  ;;  %v1541_v4 = vpop.f32.mrf.mxu0  ;;  %v3149_v24 = vsel %vm1259_vm8, %v4109_v21, %v4110_v59 }
 0x18e   : > { %v5269_v10 = vadd.f32 %v1498_v9, %v1438_v56  ;;  %v1429_v62 = vpop.f32.mrf.mxu1  ;;  %3072 = vmatpush.msra.mxu3 %v3044_v1 }
 0x18f   : > { %v1437_v0 = vadd.f32 %v1429_v62, %v5180_v20  ;;  %v5289_v20 = vld [vmem:[%s5522_s3 + $0x168] sm:$0xff]  ;;  %v4161_v62 = vmov 0  }
 0x190   : > { %3640 = vmatmul.msk.f32.vlgmr.msra.gmra.mxu1 %vm451_vm0, %v3636_v31  ;;  %v1647_v25 = vpop.f32.mrf.mxu3  ;;  %3648 = vmatmul.msk.f32.vlgmr.msra.gmra.mxu0 %vm451_vm0, %v5194_v46 }
 0x191   : > { %v1549_v27 = vadd.f32 %v1541_v4, %v1437_v0  ;;  %2860 = vmatpush.msra.mxu1 %v2832_v63  ;;  %2966 = vmatpush.msra.mxu0 %v2938_v6  ;;  %v5306_v11 = vpop.permute.xlu1 %4102  ;;  %v5368_v4 = vld [vmem:[%s5522_s3 + $0x190] sm:$0xff]  ;;  %v3668_v0 = vld [vmem:[%s5522_s3 + $0x180] sm:$0xff] }
 0x192   : > { %3654 = vmatmul.msk.f32.vlgmr.msra.gmra.mxu2 %vm451_vm0, %v5254_v60  ;;  %3073 = vmatpush.msra.mxu3 %v3042_v16  ;;  %v4104_v30 = vunpack.i.l.bf16 %v5306_v11  ;;  %v4105_v55 = vunpack.i.h.bf16 %v5306_v11  ;;  %v3669_v16 = vld [vmem:[%s5522_s3 + $0x188] sm:$0xff]  ;;  %v3260_v11 = vld [vmem:[%s5384_s28 + $0x18] sm:$0xff] }
 0x193   : > { %v5292_v34 = vadd.f32 %v1647_v25, %v1549_v27  ;;  %2861 = vmatpush.msra.mxu1 %v2830_v18  ;;  %2967 = vmatpush.msra.mxu0 %v2936_v28  ;;  %v3239_v27 = vld [vmem:[%s5523_s4] sm:$0xff] }
 0x194   : > { %3012 = vmatpush.msra.mxu2 %v4084_v45  ;;  %v3151_v36 = vsel %vm1259_vm8, %v4100_v26, %v4104_v30  ;;  %4112 = vset.pattern.permute.xlu1 %v4161_v62 }
 0x195   : > { %v1624_v43 = vpop.f32.mrf.mxu2  ;;  %3657 = vmatmul.msk.f32.gmra.mxu3 %vm451_vm0, %v5289_v20  ;;  %v1544_v44 = vpop.f32.mrf.mxu0  ;;  %4111 = vset.pattern.permute.xlu0 %v4161_v62 }
 0x196   : > { %v5300_v47 = vadd.f32 %v1624_v43, %v5228_v48  ;;  %v1432_v56 = vpop.f32.mrf.mxu1  ;;  %3013 = vmatpush.msra.mxu2 %v4085_v14  ;;  %3243 = vperm.xlu0 %4111, %v3239_v27  }
 0x197   : > { %v1440_v29 = vadd.f32 %v1432_v56, %v5207_v37  ;;  %v4094_v37 = vunpack.i.l.bf16 %v5295_v42 }
 0x198   : > { %3641 = vmatmul.msk.f32.gmra.mxu1 %vm451_vm0, %v3637_v51  ;;  %v1650_v22 = vpop.f32.mrf.mxu3  ;;  %3649 = vmatmul.msk.f32.gmra.mxu0 %vm451_vm0, %v5224_v5  ;;  %v2939_v51 = vsel %vm1045_vm6, %v4070_v61, %v4084_v45  ;;  %v3150_v61 = vsel %vm1259_vm8, %v4099_v13, %v4100_v26 }
 0x199   : > { %v1552_v31 = vadd.f32 %v1544_v44, %v1440_v29  ;;  %v3045_v54 = vsel %vm1152_vm7, %v4080_v15, %v4094_v37  ;;  %v3684_v29 = vld [vmem:[%s5522_s3 + $0x1a0] sm:$0xff] }
 0x19a   : > { %3655 = vmatmul.msk.f32.gmra.mxu2 %vm451_vm0, %v5289_v20 }
 0x19b   : > { %v1658_v41 = vadd.f32 %v1650_v22, %v1552_v31  ;;  %v3261_v22 = vld [vmem:[%s5384_s28 + $0x20] sm:$0xff] }
 0x19d   : > { %v1627_v38 = vpop.f32.mrf.mxu2  ;;  %3666 = vmatmul.msk.f32.vlgmr.msrb.gmra.mxu3 %vm451_vm0, %v5313_v23  ;;  %v1707_v48 = vpop.f32.mrf.mxu0 }
 0x19e   : > { %v5323_v50 = vadd.f32 %v1627_v38, %v1551_v12  ;;  %v1601_v53 = vpop.f32.mrf.mxu1  ;;  %3201 = vmatpush.msrb.mxu3 %v3151_v36  ;;  %3275 = vrot.lane.b32.xlu0 %v3260_v11, %s4156_s15  ;;  %v3685_v36 = vld [vmem:[%s5522_s3 + $0x1a8] sm:$0xff]  ;;  %v3257_v38 = vld [vmem:[%s5384_s28] sm:$0xff] }
 0x19f   : > { %v1653_v57 = vadd.f32 %v1601_v53, %v5240_v52  ;;  %v3043_v52 = vsel %vm1152_vm7, %v4090_v8, %v4095_v19  ;;  %v5400_v8 = vld [vmem:[%s5522_s3 + $0x198] sm:$0xff]  ;;  %3269 = vrot.lane.b32.xlu2 %v3257_v38, %s4156_s15 }
 0x1a0   : > { %3650 = vmatmul.msk.f32.vlgmr.msrb.gmra.mxu1 %vm451_vm0, %v5194_v46  ;;  %v1813_v40 = vpop.f32.mrf.mxu3  ;;  %3658 = vmatmul.msk.f32.vlgmr.msrb.gmra.mxu0 %vm451_vm0, %v5254_v60  ;;  %v3661_v46 = vld [vmem:[%s5522_s3 + $0x178] sm:$0xff]  ;;  %v3148_v60 = vsel %vm1259_vm8, %v4105_v55, %v4109_v21  ;;  %v3259_v55 = vld [vmem:[%s5384_s28 + $0x10] sm:$0xff] }
 0x1a1   : > { %v1759_v15 = vadd.f32 %v1707_v48, %v1653_v57  ;;  %2989 = vmatpush.msrb.mxu1 %v2939_v51  ;;  %3095 = vmatpush.msrb.mxu0 %v3045_v54 }
 0x1a2   : > { %3664 = vmatmul.msk.f32.vlgmr.msrb.gmra.mxu2 %vm451_vm0, %v5313_v23  ;;  %3202 = vmatpush.msrb.mxu3 %v3149_v24 }
 0x1a3   : > { %v1865_v58 = vadd.f32 %v1813_v40, %v1759_v15  ;;  %2990 = vmatpush.msrb.mxu1 %v2937_v49  ;;  %3096 = vmatpush.msrb.mxu0 %v3043_v52 }
 0x1a4   : > { %3178 = vmatpush.msrb.mxu2 %v3150_v61 }
 0x1a5   : > { %v1753_v12 = vpop.f32.mrf.mxu2  ;;  %3667 = vmatmul.msk.f32.gmra.mxu3 %vm451_vm0, %v3661_v46  ;;  %v1710_v1 = vpop.f32.mrf.mxu0 }
 0x1a6   : > { %v1761_v3 = vadd.f32 %v1753_v12, %v5292_v34  ;;  %v1604_v17 = vpop.f32.mrf.mxu1  ;;  %3179 = vmatpush.msrb.mxu2 %v3148_v60 }
 0x1a7   : > { %v1656_v7 = vadd.f32 %v1604_v17, %v5269_v10  ;;  %v3240_v10 = vld [vmem:[%s5523_s4 + $0x8] sm:$0xff]  ;;  %3273 = vrot.lane.b32.xlu2 %v3259_v55, %s4156_s15 }
 0x1a8   : > { %3651 = vmatmul.msk.f32.gmra.mxu1 %vm451_vm0, %v5224_v5  ;;  %v1816_v39 = vpop.f32.mrf.mxu3  ;;  %3659 = vmatmul.msk.f32.gmra.mxu0 %vm451_vm0, %v5289_v20 }
 0x1a9   : > { %v1762_v9 = vadd.f32 %v1710_v1, %v1656_v7  ;;  %3248 = vperm.xlu1 %4112, %v3240_v10  }
 0x1aa   : > { %3665 = vmatmul.msk.f32.gmra.mxu2 %vm451_vm0, %v3661_v46 }
 0x1ab   : > { %v1868_v5 = vadd.f32 %v1816_v39, %v1762_v9 }
 0x1ad   : > { %v1756_v63 = vpop.f32.mrf.mxu2  ;;  %3678 = vmatmul.msk.f32.vlgmr.msra.gmra.mxu3 %vm451_vm0, %v5368_v4  ;;  %v1836_v6 = vpop.f32.mrf.mxu0 }
 0x1ae   : > { %v1764_v25 = vadd.f32 %v1756_v63, %v1658_v41  ;;  %v1730_v45 = vpop.f32.mrf.mxu1 }
 0x1af   : > { %v1760_v18 = vadd.f32 %v1730_v45, %v5300_v47 }
 0x1b0   : > { %3662 = vmatmul.msk.f32.vlgmr.msra.gmra.mxu1 %vm451_vm0, %v5313_v23  ;;  %v1942_v2 = vpop.f32.mrf.mxu3  ;;  %3670 = vmatmul.msk.f32.vlgmr.msra.gmra.mxu0 %vm451_vm0, %v3668_v0 }
 0x1b1   : > { %v1866_v28 = vadd.f32 %v1836_v6, %v1760_v18  ;;  %3118 = vmatpush.msra.mxu1 %v4094_v37  ;;  %3224 = vmatpush.msra.mxu0 %v4104_v30 }
 0x1b2   : > { %3674 = vmatmul.msk.f32.vlgmr.msra.gmra.mxu2 %vm451_vm0, %v3668_v0  ;;  %3271 = vrot.lane.b32.xlu1 %v3258_v32, %s4156_s15 }
 0x1b3   : > { %v1972_v20 = vadd.f32 %v1942_v2, %v1866_v28  ;;  %3119 = vmatpush.msra.mxu1 %v4095_v19  ;;  %3225 = vmatpush.msra.mxu0 %v4110_v59 }
 0x1b5   : > { %v1919_v14 = vpop.f32.mrf.mxu2  ;;  %3679 = vmatmul.msk.f32.gmra.mxu3 %vm451_vm0, %v5400_v8  ;;  %v1839_v34 = vpop.f32.mrf.mxu0 }
 0x1b6   : > { %v1971_v43 = vadd.f32 %v1919_v14, %v1865_v58  ;;  %v1733_v44 = vpop.f32.mrf.mxu1 }
 0x1b7   : > { %v1763_v47 = vadd.f32 %v1733_v44, %v5323_v50 }
 0x1b8   : > { %3663 = vmatmul.msk.f32.gmra.mxu1 %vm451_vm0, %v3661_v46  ;;  %v1945_v42 = vpop.f32.mrf.mxu3  ;;  %3671 = vmatmul.msk.f32.gmra.mxu0 %vm451_vm0, %v3669_v16  ;;  %v3262_v46 = vld [vmem:[%s5384_s28 + $0x28] sm:$0xff] }
 0x1b9   : > { %v1869_v56 = vadd.f32 %v1839_v34, %v1763_v47  ;;  %3279 = vrot.lane.b32.xlu2 %v3262_v46, %s4156_s15 }
 0x1ba   : > { %3675 = vmatmul.msk.f32.gmra.mxu2 %vm451_vm0, %v3669_v16  ;;  %3277 = vrot.lane.b32.xlu1 %v3261_v22, %s4156_s15  ;;  %s3701_s15 = smul.u32 96, %s5537_s22 }
 0x1bb   : > { %v1975_v33 = vadd.f32 %v1945_v42, %v1869_v56 }
 0x1bc   : > { %s408_s30 = sadd.s32 %s3701_s15, %s3700_s17 }
 0x1bd   : > { %v1922_v31 = vpop.f32.mrf.mxu2  ;;  %3688 = vmatmul.msk.f32.vlgmr.msrb.gmra.mxu3 %vm451_vm0, %v3684_v29  ;;  %v1965_v26 = vpop.f32.mrf.mxu0  ;;  %s3477_s21 = sshll.u32 %s408_s30, 3 }
 0x1be   : > { %v1974_v23 = vadd.f32 %v1922_v31, %v1868_v5  ;;  %v1859_v37 = vpop.f32.mrf.mxu1  ;;  %s5482_s19 = scalar_lea.vmem %s5525_s6, %s3477_s21 }
 0x1bf   : > { %v1867_v30 = vadd.f32 %v1859_v37, %v1761_v3 }
 0x1c0   : > { %3672 = vmatmul.msk.f32.vlgmr.msrb.gmra.mxu1 %vm451_vm0, %v3668_v0  ;;  %v2071_v41 = vpop.f32.mrf.mxu3  ;;  %3680 = vmatmul.msk.f32.vlgmr.msrb.gmra.mxu0 %vm451_vm0, %v5368_v4 }
 0x1c1   : > { %v1973_v19 = vadd.f32 %v1965_v26, %v1867_v30 }
 0x1c2   : > { %3686 = vmatmul.msk.f32.vlgmr.msrb.gmra.mxu2 %vm451_vm0, %v3684_v29 }
 0x1c3   : > { %v2079_v48 = vadd.f32 %v2071_v41, %v1973_v19 }
 0x1c5   : > { %v2048_v13 = vpop.f32.mrf.mxu2  ;;  %3689 = vmatmul.msk.f32.gmra.mxu3 %vm451_vm0, %v3685_v36  ;;  %v1968_v50 = vpop.f32.mrf.mxu0 }
 0x1c6   : > { %v2078_v53 = vadd.f32 %v2048_v13, %v1972_v20  ;;  %v1862_v51 = vpop.f32.mrf.mxu1 }
 0x1c7   : > { %v1870_v54 = vadd.f32 %v1862_v51, %v1764_v25 }
 0x1c8   : > { %3673 = vmatmul.msk.f32.gmra.mxu1 %vm451_vm0, %v3669_v16  ;;  %v2074_v35 = vpop.f32.mrf.mxu3  ;;  %3681 = vmatmul.msk.f32.gmra.mxu0 %vm451_vm0, %v5400_v8 }
 0x1c9   : > { %v1976_v57 = vadd.f32 %v1968_v50, %v1870_v54 }
 0x1ca   : > { %3687 = vmatmul.msk.f32.gmra.mxu2 %vm451_vm0, %v3685_v36 }
 0x1cb   : > { %v2082_v59 = vadd.f32 %v2074_v35, %v1976_v57 }
 0x1cd   : > { %v2051_v21 = vpop.f32.mrf.mxu2  ;;  %v2131_v40 = vpop.f32.mrf.mxu0 }
 0x1ce   : > { %v2081_v49 = vadd.f32 %v2051_v21, %v1975_v33  ;;  %v2025_v52 = vpop.f32.mrf.mxu1 }
 0x1cf   : > { %v2077_v15 = vadd.f32 %v2025_v52, %v1971_v43 }
 0x1d0   : > { %3682 = vmatmul.msk.f32.vlgmr.msra.gmra.mxu1 %vm451_vm0, %v5368_v4  ;;  %v2237_v61 = vpop.f32.mrf.mxu3  ;;  %3690 = vmatmul.msk.f32.vlgmr.msra.gmra.mxu0 %vm451_vm0, %v3684_v29 }
 0x1d1   : > { %v2183_v24 = vadd.f32 %v2131_v40, %v2077_v15 }
 0x1d3   : > { %v2289_v58 = vadd.f32 %v2237_v61, %v2183_v24 }
 0x1d5   : > { %v2177_v60 = vpop.f32.mrf.mxu2  ;;  %v2134_v12 = vpop.f32.mrf.mxu0 }
 0x1d6   : > { %v2185_v1 = vadd.f32 %v2177_v60, %v2079_v48  ;;  %v2028_v3 = vpop.f32.mrf.mxu1 }
 0x1d7   : > { %v2080_v17 = vadd.f32 %v2028_v3, %v1974_v23 }
 0x1d8   : > { %3683 = vmatmul.msk.f32.gmra.mxu1 %vm451_vm0, %v5400_v8  ;;  %v2240_v7 = vpop.f32.mrf.mxu3  ;;  %3691 = vmatmul.msk.f32.gmra.mxu0 %vm451_vm0, %v3685_v36 }
 0x1d9   : > { %v2186_v39 = vadd.f32 %v2134_v12, %v2080_v17 }
 0x1db   : > { %v2292_v9 = vadd.f32 %v2240_v7, %v2186_v39 }
 0x1dd   : > { %v2180_v4 = vpop.f32.mrf.mxu2  ;;  %v2260_v62 = vpop.f32.mrf.mxu0 }
 0x1de   : > { %v2188_v10 = vadd.f32 %v2180_v4, %v2082_v59  ;;  %v2154_v5 = vpop.f32.mrf.mxu1 }
 0x1df   : > { %v2184_v63 = vadd.f32 %v2154_v5, %v2078_v53 }
 0x1e0   : > { %v2350_v6 = vpop.f32.mrf.mxu3 }
 0x1e1   : > { %v2290_v0 = vadd.f32 %v2260_v62, %v2184_v63 }
 0x1e3   : > { %v2380_v25 = vadd.f32 %v2350_v6, %v2290_v0 }
 0x1e5   : > { %v2327_v45 = vpop.f32.mrf.mxu2  ;;  %v2263_v18 = vpop.f32.mrf.mxu0 }
 0x1e6   : > { %v2379_v2 = vadd.f32 %v2327_v45, %v2289_v58  ;;  %v2157_v28 = vpop.f32.mrf.mxu1 }
 0x1e7   : > { %v2187_v27 = vadd.f32 %v2157_v28, %v2081_v49 }
 0x1e8   : > { %v2353_v32 = vpop.f32.mrf.mxu3 }
 0x1e9   : > { %v2293_v8 = vadd.f32 %v2263_v18, %v2187_v27 }
 0x1eb   : > { %v2383_v20 = vadd.f32 %v2353_v32, %v2293_v8 }
 0x1ed   : > { %v2330_v14 = vpop.f32.mrf.mxu2  ;;  %v2373_v34 = vpop.f32.mrf.mxu0 }
 0x1ee   : > { %v2382_v16 = vadd.f32 %v2330_v14, %v2292_v9  ;;  %v2283_v43 = vpop.f32.mrf.mxu1 }
 0x1ef   : > { %v2291_v44 = vadd.f32 %v2283_v43, %v2185_v1 }
 0x1f0   : > { %v2485_v47 = vpop.f32.mrf.mxu3 }
 0x1f1   : > { %v2381_v42 = vadd.f32 %v2373_v34, %v2291_v44 }
 0x1f3   : > { %v5447_v56 = vadd.f32 %v2485_v47, %v2381_v42 }
 0x1f5   : > { %v2462_v29 = vpop.f32.mrf.mxu2  ;;  %v2376_v22 = vpop.f32.mrf.mxu0 }
 0x1f6   : > { %v2286_v33 = vpop.f32.mrf.mxu1  ;;  %v2492_v17 = vadd.f32 %v2462_v29, %v2380_v25 }
 0x1f7   : > { %v2294_v31 = vadd.f32 %v2286_v33, %v2188_v10 }
 0x1f8   : > { %v2488_v26 = vpop.f32.mrf.mxu3 }
 0x1f9   : > { %v2384_v11 = vadd.f32 %v2376_v22, %v2294_v31  ;;  %v3270_v4 = vpop.permute.xlu2 %3269 }
 0x1fb   : > { %v5449_v23 = vadd.f32 %v2488_v26, %v2384_v11 }
 0x1fd   : > { %v2465_v37 = vpop.f32.mrf.mxu2  ;;  %v2545_v30 = vpop.f32.mrf.mxu0 }
 0x1fe   : > { %v2439_v41 = vpop.f32.mrf.mxu1  ;;  %v2495_v18 = vadd.f32 %v2465_v37, %v2383_v20 }
 0x1ff   : > { %v2491_v1 = vadd.f32 %v2439_v41, %v2379_v2 }
 0x200   : > { %v2651_v19 = vpop.f32.mrf.mxu3 }
 0x201   : > { %v2597_v39 = vadd.f32 %v2545_v30, %v2491_v1  ;;  %v5472_v29 = vpop.permute.xlu2 %3273 }
 0x203   : > { %v2703_v6 = vadd.f32 %v2651_v19, %v2597_v39 }
 0x205   : > { %v2591_v36 = vpop.f32.mrf.mxu2  ;;  %v2548_v38 = vpop.f32.mrf.mxu0 }
 0x206   : > { %v2442_v48 = vpop.f32.mrf.mxu1  ;;  %v2599_v33 = vadd.f32 %v2591_v36, %v5447_v56 }
 0x207   : > { %v2494_v0 = vadd.f32 %v2442_v48, %v2382_v16 }
 0x208   : > { %v2654_v13 = vpop.f32.mrf.mxu3  ;;  %v3244_v11 = vpop.permute.xlu0 %3243 }
 0x209   : > { %v2600_v27 = vadd.f32 %v2548_v38, %v2494_v0 }
 0x20b   : > { %v2706_v16 = vadd.f32 %v2654_v13, %v2600_v27 }
 0x20d   : > { %v5451_v50 = vpop.f32.mrf.mxu2  ;;  %v2674_v53 = vpop.f32.mrf.mxu0 }
 0x20e   : > { %v2568_v51 = vpop.f32.mrf.mxu1 }
 0x20f   : > { %v2598_v7 = vadd.f32 %v2568_v51, %v2492_v17 }
 0x210   : > { %v2780_v54 = vpop.f32.mrf.mxu3 }
 0x211   : > { %v2704_v63 = vadd.f32 %v2674_v53, %v2598_v7 }
 0x213   : > { %v2810_v28 = vadd.f32 %v2780_v54, %v2704_v63  ;;  %v3280_v1 = vpop.permute.xlu2 %3279  ;;  %v3276_v63 = vpop.permute.xlu0 %3275 }
 0x215   : > { %v2757_v35 = vpop.f32.mrf.mxu2  ;;  %v2677_v57 = vpop.f32.mrf.mxu0 }
 0x216   : > { %v2571_v55 = vpop.f32.mrf.mxu1  ;;  %v2809_v2 = vadd.f32 %v2757_v35, %v2703_v6 }
 0x217   : > { %v2601_v25 = vadd.f32 %v2571_v55, %v2495_v18 }
 0x218   : > { %v2783_v59 = vpop.f32.mrf.mxu3 }
 0x219   : > { %v2707_v44 = vadd.f32 %v2677_v57, %v2601_v25 }
 0x21b   : > { %v5463_v9 = vpop.permute.xlu1 %3248  ;;  %v2813_v37 = vadd.f32 %v2783_v59, %v2707_v44 }
 0x21d   : > { %v2760_v21 = vpop.f32.mrf.mxu2  ;;  %v5453_v40 = vpop.f32.mrf.mxu0 }
 0x21e   : > { %v2697_v49 = vpop.f32.mrf.mxu1  ;;  %v2812_v26 = vadd.f32 %v2760_v21, %v2706_v16 }
 0x21f   : > { %v2705_v30 = vadd.f32 %v2697_v49, %v2599_v33 }
 0x220   : > { %v5455_v52 = vpop.f32.mrf.mxu3 }
 0x221   : > { %v2811_v56 = vadd.f32 %v5453_v40, %v2705_v30 }
 0x223   : > { %v2917_v17 = vadd.f32 %v5455_v52, %v2811_v56 }
 0x224   : > { %v3272_v42 = vpop.permute.xlu1 %3271 }
 0x225   : > { %v2886_v15 = vpop.f32.mrf.mxu2  ;;  %v5457_v61 = vpop.f32.mrf.mxu0  ;;  %v3282_v48 = vsel %vm831_vm5, %v3272_v42, %v5472_v29  ;;  %v3281_v36 = vsel %vm831_vm5, %v3270_v4, %v3272_v42 }
 0x226   : > { %v5459_v24 = vpop.f32.mrf.mxu1  ;;  %v2916_v8 = vadd.f32 %v2886_v15, %v2810_v28 }
 0x228   : > { %v5461_v46 = vpop.f32.mrf.mxu3 }
 0x22c   : > { %v3278_v40 = vpop.permute.xlu1 %3277 }
 0x22d   : > { %v2889_v58 = vpop.f32.mrf.mxu2  ;;  %v2969_v60 = vpop.f32.mrf.mxu0 }
 0x22e   : > { %v2863_v12 = vpop.f32.mrf.mxu1  ;;  %v2919_v53 = vadd.f32 %v2889_v58, %v2813_v37  ;;  %v2602_v58 = vadd.f32 %v5451_v50, %v5449_v23 }
 0x22f   : > { %v2915_v32 = vadd.f32 %v2863_v12, %v2809_v2 }
 0x230   : > { %v3075_v3 = vpop.f32.mrf.mxu3  ;;  %v2708_v7 = vadd.f32 %v5459_v24, %v2602_v58 }
 0x231   : > { %v3021_v20 = vadd.f32 %v2969_v60, %v2915_v32 }
 0x232   : > { %v2814_v24 = vadd.f32 %v5457_v61, %v2708_v7 }
 0x233   : > { %v3127_v19 = vadd.f32 %v3075_v3, %v3021_v20 }
 0x235   : > { %v5465_v62 = vpop.f32.mrf.mxu2  ;;  %v2972_v10 = vpop.f32.mrf.mxu0 }
 0x236   : > { %v2866_v5 = vpop.f32.mrf.mxu1  ;;  %v3023_v6 = vadd.f32 %v5465_v62, %v2917_v17 }
 0x237   : > { %v2918_v38 = vadd.f32 %v2866_v5, %v2812_v26  ;;  %v3284_v5 = vsel %vm831_vm5, %v3278_v40, %v3280_v1 }
 0x238   : > { %v3078_v45 = vpop.f32.mrf.mxu3 }
 0x239   : > { %v3024_v21 = vadd.f32 %v2972_v10, %v2918_v38 }
 0x23b   : > { %v3130_v4 = vadd.f32 %v3078_v45, %v3024_v21  ;;  %v3283_v45 = vsel %vm831_vm5, %v3276_v63, %v3278_v40 }
 0x23d   : > { %v5469_v14 = vpop.f32.mrf.mxu2  ;;  %v3098_v34 = vpop.f32.mrf.mxu0 }
 0x23e   : > { %v2992_v43 = vpop.f32.mrf.mxu1 }
 0x23f   : > { %v3022_v47 = vadd.f32 %v2992_v43, %v2916_v8  ;;  %v2920_v8 = vadd.f32 %v5461_v46, %v2814_v24 }
 0x240   : > { %v3204_v22 = vpop.f32.mrf.mxu3 }
 0x241   : > { %v3128_v31 = vadd.f32 %v3098_v34, %v3022_v47  ;;  %v3026_v44 = vadd.f32 %v5469_v14, %v2920_v8 }
 0x243   : > { %v3234_v41 = vadd.f32 %v3204_v22, %v3128_v31 }
 0x245   : > { %v3252_v51 = vadd.f32 %v3244_v11, %v3234_v41  ;;  %v3181_v13 = vpop.f32.mrf.mxu2  ;;  %v3101_v54 = vpop.f32.mrf.mxu0 }
 0x246   : > { %v3233_v35 = vadd.f32 %v3181_v13, %v3127_v19  ;;  %v2995_v57 = vpop.f32.mrf.mxu1 }
 0x247   : > { %v3292_v55 = vadd.f32 %v3282_v48, %v3252_v51  ;;  %v3025_v59 = vadd.f32 %v2995_v57, %v2919_v53 }
 0x248   : > { %v3251_v49 = vadd.f32 %v3244_v11, %v3233_v35  ;;  %v3207_v15 = vpop.f32.mrf.mxu3 }
 0x249   : > { %v3298_v60 = vmax.f32 %v3292_v55, 0.0  ;;  %v3131_v12 = vadd.f32 %v3101_v54, %v3025_v59 }
 0x24a   : > { %v3291_v3 = vadd.f32 %v3281_v36, %v3251_v49 }
 0x24b   : > { %3304 = vst [vmem:[%s5482_s19 + $0x8] sm:$0xff] %v3298_v60  ;;  %v3237_v39 = vadd.f32 %v3207_v15, %v3131_v12 }
 0x24c   : > { %v3297_v10 = vmax.f32 %v3291_v3, 0.0 }
 0x24d   : > { %v3255_v23 = vadd.f32 %v5463_v9, %v3237_v39  ;;  %v3184_v50 = vpop.f32.mrf.mxu2  ;;  %v3227_v0 = vpop.f32.mrf.mxu0 }
 0x24e   : > { %3303 = vst [vmem:[%s5482_s19] sm:$0xff] %v3297_v10  ;;  %v3236_v18 = vadd.f32 %v3184_v50, %v3130_v4  ;;  %v3121_v52 = vpop.f32.mrf.mxu1 }
 0x24f   : > { %v3295_v2 = vadd.f32 %v3284_v5, %v3255_v23  ;;  %v3129_v28 = vadd.f32 %v3121_v52, %v3023_v6 }
 0x250   : > { %v3254_v25 = vadd.f32 %v5463_v9, %v3236_v18 }
 0x251   : > { %v3301_v27 = vmax.f32 %v3295_v2, 0.0  ;;  %v3235_v62 = vadd.f32 %v3227_v0, %v3129_v28 }
 0x252   : > { %v3294_v32 = vadd.f32 %v3283_v45, %v3254_v25 }
 0x253   : > { %3308 = vst [vmem:[%s5482_s19 + $0x20] sm:$0xff] %v3301_v27  ;;  %v3253_v34 = vadd.f32 %v3244_v11, %v3235_v62 }
 0x254   : > { %v3300_v43 = vmax.f32 %v3294_v32, 0.0 }
 0x255   : > { %v3293_v61 = vadd.f32 %v5472_v29, %v3253_v34  ;;  %v3230_v42 = vpop.f32.mrf.mxu0 }
 0x256   : > { %3307 = vst [vmem:[%s5482_s19 + $0x18] sm:$0xff] %v3300_v43  ;;  %v3124_v47 = vpop.f32.mrf.mxu1 }
 0x257   : > { %v3299_v16 = vmax.f32 %v3293_v61, 0.0  ;;  %v3132_v20 = vadd.f32 %v3124_v47, %v3026_v44 }
 0x259   : > { %3306 = vst.msk [vmem:[%s5482_s19 + $0x10] sm:$0xff] %vm3305_vm9, %v3299_v16  ;;  %v3238_v22 = vadd.f32 %v3230_v42, %v3132_v20 }
 0x25b   : > { %v3256_v33 = vadd.f32 %v5463_v9, %v3238_v22 }
 0x25d   : > { %v3296_v31 = vadd.f32 %v3280_v1, %v3256_v33 }
 0x25f   : > { %v3302_v46 = vmax.f32 %v3296_v31, 0.0 }
 0x261   : > { %3309 = vst.msk [vmem:[%s5482_s19 + $0x28] sm:$0xff] %vm3305_vm9, %v3302_v46 }
 0x262 PF: > { %s16_s25 = sadd.s32 1, %s4151_s25   ;;  %s5526_s21 = smov %s4143_s23 }
 0x263   : > { %p13_p10 = scmp.ge.s32.totalorder %s16_s25, 34   ;;  %s5527_s22 = smov %s4147_s24 }
 0x264   : > { %s5528_s23 = smov %s5531_s26  ;;  %s5529_s24 = smov %s5535_s27 }
 0x265   :  { %15 = sbr.rel (!%p13_p10) target bundleno = 3 (0x3), region = 109 }

</bundles_post_ra>
